<compile_context>
chip_gen: v6e
topology: v6e:2x2x1
jax: 0.10.0
libtpu: 0.0.40
codegen_flags: <defaults>
</compile_context>

<pallas_src>
import math
import functools

import numpy as np
import jax
import jax.numpy as jnp
from jax import lax
from jax.experimental import pallas as pl
from jax.experimental.pallas import tpu as pltpu  # noqa: F401  (namespace kept for TPU-specific tuning)

EPS = 1e-6

# ----- packed-slab layout: one 128-lane-wide column slot per weight matrix -----
COL = 128
(M_SA_QG, M_SA_KG, M_SA_VG,
 M_SA_QL, M_SA_KL, M_SA_VL,
 M_SA_OUT,
 M_CA_Q, M_CA_K, M_CA_V, M_CA_OUT,
 M_FF1, M_FF2) = range(13)
N_MAT = 13


# ---------------- fused Pallas kernel ----------------

def _decoder_kernel(x_ref, v_ref, bias_ref, w_ref, b_ref, ln_ref, fn_ref, o_ref,
                    *, n_block, n_head, dim_ff, eps):
    B, Sp, D = x_ref.shape            # Sp is already a multiple of 8 (padded by wrapper)
    Sv = v_ref.shape[1]
    H = n_head
    Dk = D // H
    R = B * Sp
    scale = 1.0 / math.sqrt(Dk)

    # ---- constants built once, outside the block loop (JAX does not CSE broadcasts) ----
    # CLS-row selector in the flattened (B*Sp, D) layout (row r is CLS iff r % Sp == 0).
    is_cls = lax.broadcasted_iota(jnp.int32, (B, Sp, D), 1).reshape(R, D) == 0
    # Per-head 0/1 column masks (1, 1, D): head h owns columns [h*Dk, (h+1)*Dk).
    col = lax.broadcasted_iota(jnp.int32, (1, 1, D), 2)
    head_mask = [jnp.where((col >= h * Dk) & (col < (h + 1) * Dk), 1.0, 0.0)
                 for h in range(H)]

    def layernorm(t, g, b):
        # Reference LayerNorm: a_2*(x-mean)/(std+eps)+b_2 with UNBIASED std (ddof=1).
        mean = jnp.mean(t, axis=-1, keepdims=True)
        var = jnp.sum((t - mean) ** 2, axis=-1, keepdims=True) / (D - 1)
        inv = 1.0 / (jnp.sqrt(var) + eps)       # exact reciprocal on a (rows, 1) tensor
        return g * (t - mean) * inv + b

    def W(blk, m, din, dout):
        # 128-lane-aligned column start, aligned sublane start -> no relayout on load.
        return w_ref[blk, :din, m * COL:m * COL + dout]

    def linear(t, blk, m, din, dout):
        return (jnp.dot(t, W(blk, m, din, dout), preferred_element_type=jnp.float32)
                + b_ref[blk, m:m + 1, :dout])

    def attend(q2, k3, v3, bias):
        # q2: (R, D) flat queries; k3/v3: (B, Sk, D); bias: (B, Sp, Sk) additive or None.
        # Heads are taken with full-width contractions against 0/1 column masks, so
        # there are no Dk=8 lane slices and no lane-dim concatenate of head outputs.
        q3 = (q2 * scale).reshape(B, Sp, D)      # tile-aligned reshape (Sp % 8 == 0)
        out = None
        for h in range(H):
            s = jnp.einsum('bqd,bkd->bqk', q3 * head_mask[h], k3,
                           preferred_element_type=jnp.float32)
            if bias is not None:
                s = s + bias
            s = s - jnp.max(s, axis=-1, keepdims=True)
            p = jnp.exp(s)
            p = p * pl.reciprocal(jnp.sum(p, axis=-1, keepdims=True), approx=True)
            oh = jnp.einsum('bqk,bkd->bqd', p, v3 * head_mask[h],
                            preferred_element_type=jnp.float32)
            out = oh if out is None else out + oh
        return out.reshape(R, D)

    x = x_ref[...].reshape(R, D)                 # carried flat; reshape is tile-aligned
    mem3 = v_ref[...]                            # (B, Sv, D) cross-attention memory
    mem2 = mem3.reshape(B * Sv, D)
    bias = bias_ref[...]                         # (B, Sp, Sp) additive mask bias

    for blk in range(n_block):
        # --- sublayer 0: special self-attention (CLS row -> *_global, rest -> *_linear) ---
        y = layernorm(x, ln_ref[blk, 0, 0:1, :], ln_ref[blk, 0, 1:2, :])
        q = jnp.where(is_cls, linear(y, blk, M_SA_QG, D, D), linear(y, blk, M_SA_QL, D, D))
        k = jnp.where(is_cls, linear(y, blk, M_SA_KG, D, D), linear(y, blk, M_SA_KL, D, D))
        v = jnp.where(is_cls, linear(y, blk, M_SA_VG, D, D), linear(y, blk, M_SA_VL, D, D))
        a = attend(q, k.reshape(B, Sp, D), v.reshape(B, Sp, D), bias)
        x = x + linear(a, blk, M_SA_OUT, D, D)

        # --- sublayer 1: multi-head cross-attention over the image memory (no mask) ---
        y = layernorm(x, ln_ref[blk, 1, 0:1, :], ln_ref[blk, 1, 1:2, :])
        q = linear(y, blk, M_CA_Q, D, D)
        k = linear(mem2, blk, M_CA_K, D, D).reshape(B, Sv, D)
        vv = linear(mem2, blk, M_CA_V, D, D).reshape(B, Sv, D)
        a = attend(q, k, vv, None)
        x = x + linear(a, blk, M_CA_OUT, D, D)

        # --- sublayer 2: position-wise feed-forward ---
        y = layernorm(x, ln_ref[blk, 2, 0:1, :], ln_ref[blk, 2, 1:2, :])
        h1 = jnp.maximum(linear(y, blk, M_FF1, D, dim_ff), 0.0)
        x = x + linear(h1, blk, M_FF2, dim_ff, D)

    # final LayerNorm of the TransformerDecoder
    o_ref[...] = layernorm(x, fn_ref[0:1, :], fn_ref[1:2, :]).reshape(B, Sp, D)


# ---------------- wrapper ----------------

def _pad8(n):
    return ((n + 7) // 8) * 8


@functools.partial(jax.jit, static_argnames=("n_head", "n_block", "dim_ff", "eps"))
def transformer_decoder(packed, x, v, mask_bias, *, n_head, n_block, dim_ff, eps=EPS):
    B, Sx, D = x.shape
    Sp = _pad8(Sx)
    # Pad the sequence dim to a sublane-tile multiple so every in-kernel reshape is free.
    x_p = jnp.pad(x, ((0, 0), (0, Sp - Sx), (0, 0)))
    bias_p = jnp.full((B, Sp, Sp), -1e9, jnp.float32)
    bias_p = bias_p.at[:, :Sx, :Sx].set(mask_bias)   # padded key columns stay masked
    kernel = functools.partial(_decoder_kernel, n_block=n_block, n_head=n_head,
                               dim_ff=dim_ff, eps=eps)
    out_p = pl.pallas_call(
        kernel,
        out_shape=jax.ShapeDtypeStruct((B, Sp, D), jnp.float32),
    )(x_p, v, bias_p, *packed)
    return out_p[:, :Sx, :]


# ---------------- parameter packing (done once, outside the traced path) ----------------

def pack_params(params):
    """Pack all decoder parameters into 4 slabs.

    Weight slab: (n_block, max(dim, dim_ff), N_MAT*128), every matrix stored transposed
    to (Din, Dout) and starting at a 128-lane-aligned column; bias slab (n_block, N_MAT,
    128); per-block LN slab (n_block, 3, 2, dim); final LN slab (2, dim).
    """
    blocks = params["blocks"]
    nb = len(blocks)
    dim = int(params["norm_g"].shape[0])
    dim_ff = int(blocks[0]["ffn"]["w1_b"].shape[0])
    rows = max(dim, dim_ff)

    w_slab = np.zeros((nb, rows, N_MAT * COL), np.float32)
    b_slab = np.zeros((nb, N_MAT, COL), np.float32)
    ln_slab = np.zeros((nb, 3, 2, dim), np.float32)

    def put(bi, m, W_torch, b):
        Wt = np.asarray(W_torch).T                   # torch (Dout, Din) -> (Din, Dout)
        din, dout = Wt.shape
        w_slab[bi, :din, m * COL:m * COL + dout] = Wt
        b_slab[bi, m, :dout] = np.asarray(b)

    for bi, blk in enumerate(blocks):
        sa, ca, ffn = blk["self_attn"], blk["cross_attn"], blk["ffn"]
        put(bi, M_SA_QG, sa["qg_w"], sa["qg_b"])
        put(bi, M_SA_KG, sa["kg_w"], sa["kg_b"])
        put(bi, M_SA_VG, sa["vg_w"], sa["vg_b"])
        put(bi, M_SA_QL, sa["ql_w"], sa["ql_b"])
        put(bi, M_SA_KL, sa["kl_w"], sa["kl_b"])
        put(bi, M_SA_VL, sa["vl_w"], sa["vl_b"])
        put(bi, M_SA_OUT, sa["out_w"], sa["out_b"])
        put(bi, M_CA_Q, ca["w0_w"], ca["w0_b"])
        put(bi, M_CA_K, ca["w1_w"], ca["w1_b"])
        put(bi, M_CA_V, ca["w2_w"], ca["w2_b"])
        put(bi, M_CA_OUT, ca["w3_w"], ca["w3_b"])
        put(bi, M_FF1, ffn["w1_w"], ffn["w1_b"])
        put(bi, M_FF2, ffn["w2_w"], ffn["w2_b"])
        for li in range(3):
            ln_slab[bi, li, 0] = np.asarray(blk[f"ln{li}_g"])
            ln_slab[bi, li, 1] = np.asarray(blk[f"ln{li}_b"])

    fn_slab = np.stack([np.asarray(params["norm_g"]), np.asarray(params["norm_b"])])
    return (jnp.asarray(w_slab), jnp.asarray(b_slab),
            jnp.asarray(ln_slab), jnp.asarray(fn_slab))


# ---------------- pure-JAX reference (mirrors the PyTorch module) ----------------

def _reference_decoder(params, x, v, mask_bias, n_head, eps=EPS):
    H = n_head

    def ln(t, g, b):
        mean = t.mean(-1, keepdims=True)
        var = ((t - mean) ** 2).sum(-1, keepdims=True) / (t.shape[-1] - 1)
        return g * (t - mean) / (jnp.sqrt(var) + eps) + b

    def lin(t, Wt, b):
        return t @ jnp.asarray(Wt).T + b

    def mha(q, k, vv, bias):
        B, Sq, D = q.shape
        Sk = k.shape[1]
        Dk = D // H
        qh = q.reshape(B, Sq, H, Dk).transpose(0, 2, 1, 3)
        kh = k.reshape(B, Sk, H, Dk).transpose(0, 2, 1, 3)
        vh = vv.reshape(B, Sk, H, Dk).transpose(0, 2, 1, 3)
        s = jnp.einsum('bhqd,bhkd->bhqk', qh, kh) / math.sqrt(Dk)
        if bias is not None:
            s = s + bias[:, None]
        p = jax.nn.softmax(s, axis=-1)
        o = jnp.einsum('bhqk,bhkd->bhqd', p, vh)
        return o.transpose(0, 2, 1, 3).reshape(B, Sq, D)

    for blk in params["blocks"]:
        sa, ca, ffn = blk["self_attn"], blk["cross_attn"], blk["ffn"]
        y = ln(x, blk["ln0_g"], blk["ln0_b"])
        cls, feat = y[:, :1], y[:, 1:]
        q = jnp.concatenate([lin(cls, sa["qg_w"], sa["qg_b"]),
                             lin(feat, sa["ql_w"], sa["ql_b"])], axis=1)
        k = jnp.concatenate([lin(cls, sa["kg_w"], sa["kg_b"]),
                             lin(feat, sa["kl_w"], sa["kl_b"])], axis=1)
        vv = jnp.concatenate([lin(cls, sa["vg_w"], sa["vg_b"]),
                              lin(feat, sa["vl_w"], sa["vl_b"])], axis=1)
        x = x + lin(mha(q, k, vv, mask_bias), sa["out_w"], sa["out_b"])

        y = ln(x, blk["ln1_g"], blk["ln1_b"])
        q = lin(y, ca["w0_w"], ca["w0_b"])
        k = lin(v, ca["w1_w"], ca["w1_b"])
        vv = lin(v, ca["w2_w"], ca["w2_b"])
        x = x + lin(mha(q, k, vv, None), ca["w3_w"], ca["w3_b"])

        y = ln(x, blk["ln2_g"], blk["ln2_b"])
        x = x + lin(jnp.maximum(lin(y, ffn["w1_w"], ffn["w1_b"]), 0.0),
                    ffn["w2_w"], ffn["w2_b"])

    return ln(x, params["norm_g"], params["norm_b"])


# ---------------- deterministic parameter init ----------------

def _lin_params(key, din, dout, scale=0.05):
    kw, kb = jax.random.split(key)
    W = jax.random.normal(kw, (dout, din), jnp.float32) * scale
    b = jax.random.normal(kb, (dout,), jnp.float32) * scale
    return W, b


def init_params(key, dim, dim_ff, n_head, n_block):
    blocks = []
    for _ in range(n_block):
        key, *ks = jax.random.split(key, 14)
        sa = {}
        for name, kk in zip(["qg", "kg", "vg", "ql", "kl", "vl", "out"], ks[:7]):
            W, b = _lin_params(kk, dim, dim)
            sa[name + "_w"], sa[name + "_b"] = W, b
        ca = {}
        for j, kk in enumerate(ks[7:11]):
            W, b = _lin_params(kk, dim, dim)
            ca[f"w{j}_w"], ca[f"w{j}_b"] = W, b
        ffn = {}
        W, b = _lin_params(ks[11], dim, dim_ff)
        ffn["w1_w"], ffn["w1_b"] = W, b
        W, b = _lin_params(ks[12], dim_ff, dim)
        ffn["w2_w"], ffn["w2_b"] = W, b
        bp = {"self_attn": sa, "cross_attn": ca, "ffn": ffn}
        for li in range(3):
            key, kg, kb2 = jax.random.split(key, 3)
            bp[f"ln{li}_g"] = 1.0 + 0.05 * jax.random.normal(kg, (dim,), jnp.float32)
            bp[f"ln{li}_b"] = 0.05 * jax.random.normal(kb2, (dim,), jnp.float32)
        blocks.append(bp)
    key, kg, kb2 = jax.random.split(key, 3)
    return {"blocks": blocks,
            "norm_g": 1.0 + 0.05 * jax.random.normal(kg, (dim,), jnp.float32),
            "norm_b": 0.05 * jax.random.normal(kb2, (dim,), jnp.float32)}


if __name__ == "__main__":
    dim, dim_ff, n_head, n_block = 32, 64, 4, 2
    B, Sx, Sv = 2, 9, 8   # Sx = 1 CLS/Diff token + 8 caption tokens; Sv = image memory

    root = jax.random.PRNGKey(0)
    kp, kx, kv = jax.random.split(root, 3)
    params = init_params(kp, dim, dim_ff, n_head, n_block)
    packed = pack_params(params)

    x = jax.random.normal(kx, (B, Sx, dim), jnp.float32)   # decoder states
    v = jax.random.normal(kv, (B, Sv, dim), jnp.float32)   # cross-attention memory

    # subsequent (causal) mask as in the PyTorch reference; masked_fill(mask==0, -1e9)
    mask = jnp.broadcast_to(jnp.tril(jnp.ones((Sx, Sx), jnp.float32)), (B, Sx, Sx))
    mask_bias = jnp.where(mask == 0, -1e9, 0.0).astype(jnp.float32)

    out = transformer_decoder(packed, x, v, mask_bias,
                              n_head=n_head, n_block=n_block, dim_ff=dim_ff)
    out = jax.block_until_ready(out)

    assert out.shape == (B, Sx, dim) and out.dtype == jnp.float32
    assert bool(jnp.all(jnp.isfinite(out)))

    ref = _reference_decoder(params, x, v, mask_bias, n_head)
    max_err = float(jnp.max(jnp.abs(out - ref)))
    assert max_err < 3e-2, f"kernel/reference mismatch: max_err={max_err}"
    # TODO(synk): dropout layers are identity (eval mode); the embedding / image-encoder /
    # output-projection / beam-search parts of Model stay outside this decoder kernel.
    print("KERNEL_OK")
</pallas_src>

<mosaic_0001>
module attributes {stable_mosaic.version = 11 : i64} {
  func.func @_decoder_kernel(%arg0: memref<2x16x32xf32, #tpu.memory_space<vmem>>, %arg1: memref<2x8x32xf32, #tpu.memory_space<vmem>>, %arg2: memref<2x16x16xf32, #tpu.memory_space<vmem>>, %arg3: memref<2x64x1664xf32, #tpu.memory_space<vmem>>, %arg4: memref<2x13x128xf32, #tpu.memory_space<vmem>>, %arg5: memref<2x3x2x32xf32, #tpu.memory_space<vmem>>, %arg6: memref<2x32xf32, #tpu.memory_space<vmem>>, %arg7: memref<2x16x32xf32, #tpu.memory_space<vmem>>) attributes {dimension_semantics = [], scalar_prefetch = 0 : i64, scratch_operands = 0 : i64, tpu.core_type = #tpu.core_type<tc>} {
    %0 = tpu.iota {dimensions = array<i32: 1>} : vector<2x16x32xi32>
    %1 = vector.shape_cast %0 : vector<2x16x32xi32> to vector<32x32xi32>
    %c0_i32 = arith.constant 0 : i32
    %2 = vector.broadcast %c0_i32 : i32 to vector<32x32xi32>
    %3 = arith.cmpi eq, %1, %2 : vector<32x32xi32>
    %4 = tpu.iota {dimensions = array<i32: 2>} : vector<1x1x32xi32>
    %c0_i32_0 = arith.constant 0 : i32
    %5 = vector.broadcast %c0_i32_0 : i32 to vector<1x1x32xi32>
    %6 = arith.cmpi sge, %4, %5 : vector<1x1x32xi32>
    %c8_i32 = arith.constant 8 : i32
    %7 = vector.broadcast %c8_i32 : i32 to vector<1x1x32xi32>
    %8 = arith.cmpi slt, %4, %7 : vector<1x1x32xi32>
    %9 = arith.andi %6, %8 : vector<1x1x32xi1>
    %cst = arith.constant 1.000000e+00 : f32
    %cst_1 = arith.constant 0.000000e+00 : f32
    %10 = vector.broadcast %cst : f32 to vector<1x1x32xf32>
    %11 = vector.broadcast %cst_1 : f32 to vector<1x1x32xf32>
    %12 = arith.select %9, %10, %11 : vector<1x1x32xi1>, vector<1x1x32xf32>
    %c8_i32_2 = arith.constant 8 : i32
    %13 = vector.broadcast %c8_i32_2 : i32 to vector<1x1x32xi32>
    %14 = arith.cmpi sge, %4, %13 : vector<1x1x32xi32>
    %c16_i32 = arith.constant 16 : i32
    %15 = vector.broadcast %c16_i32 : i32 to vector<1x1x32xi32>
    %16 = arith.cmpi slt, %4, %15 : vector<1x1x32xi32>
    %17 = arith.andi %14, %16 : vector<1x1x32xi1>
    %cst_3 = arith.constant 1.000000e+00 : f32
    %cst_4 = arith.constant 0.000000e+00 : f32
    %18 = vector.broadcast %cst_3 : f32 to vector<1x1x32xf32>
    %19 = vector.broadcast %cst_4 : f32 to vector<1x1x32xf32>
    %20 = arith.select %17, %18, %19 : vector<1x1x32xi1>, vector<1x1x32xf32>
    %c16_i32_5 = arith.constant 16 : i32
    %21 = vector.broadcast %c16_i32_5 : i32 to vector<1x1x32xi32>
    %22 = arith.cmpi sge, %4, %21 : vector<1x1x32xi32>
    %c24_i32 = arith.constant 24 : i32
    %23 = vector.broadcast %c24_i32 : i32 to vector<1x1x32xi32>
    %24 = arith.cmpi slt, %4, %23 : vector<1x1x32xi32>
    %25 = arith.andi %22, %24 : vector<1x1x32xi1>
    %cst_6 = arith.constant 1.000000e+00 : f32
    %cst_7 = arith.constant 0.000000e+00 : f32
    %26 = vector.broadcast %cst_6 : f32 to vector<1x1x32xf32>
    %27 = vector.broadcast %cst_7 : f32 to vector<1x1x32xf32>
    %28 = arith.select %25, %26, %27 : vector<1x1x32xi1>, vector<1x1x32xf32>
    %c24_i32_8 = arith.constant 24 : i32
    %29 = vector.broadcast %c24_i32_8 : i32 to vector<1x1x32xi32>
    %30 = arith.cmpi sge, %4, %29 : vector<1x1x32xi32>
    %c32_i32 = arith.constant 32 : i32
    %31 = vector.broadcast %c32_i32 : i32 to vector<1x1x32xi32>
    %32 = arith.cmpi slt, %4, %31 : vector<1x1x32xi32>
    %33 = arith.andi %30, %32 : vector<1x1x32xi1>
    %cst_9 = arith.constant 1.000000e+00 : f32
    %cst_10 = arith.constant 0.000000e+00 : f32
    %34 = vector.broadcast %cst_9 : f32 to vector<1x1x32xf32>
    %35 = vector.broadcast %cst_10 : f32 to vector<1x1x32xf32>
    %36 = arith.select %33, %34, %35 : vector<1x1x32xi1>, vector<1x1x32xf32>
    %c0 = arith.constant 0 : index
    %c0_11 = arith.constant 0 : index
    %c0_12 = arith.constant 0 : index
    %37 = vector.load %arg0[%c0, %c0_11, %c0_12] : memref<2x16x32xf32, #tpu.memory_space<vmem>>, vector<2x16x32xf32>
    %38 = vector.shape_cast %37 : vector<2x16x32xf32> to vector<32x32xf32>
    %c0_13 = arith.constant 0 : index
    %c0_14 = arith.constant 0 : index
    %c0_15 = arith.constant 0 : index
    %39 = vector.load %arg1[%c0_13, %c0_14, %c0_15] : memref<2x8x32xf32, #tpu.memory_space<vmem>>, vector<2x8x32xf32>
    %40 = vector.shape_cast %39 : vector<2x8x32xf32> to vector<16x32xf32>
    %c0_16 = arith.constant 0 : index
    %c0_17 = arith.constant 0 : index
    %c0_18 = arith.constant 0 : index
    %41 = vector.load %arg2[%c0_16, %c0_17, %c0_18] : memref<2x16x16xf32, #tpu.memory_space<vmem>>, vector<2x16x16xf32>
    %c0_19 = arith.constant 0 : index
    %c0_20 = arith.constant 0 : index
    %c0_21 = arith.constant 0 : index
    %c0_22 = arith.constant 0 : index
    %42 = vector.load %arg5[%c0_19, %c0_20, %c0_21, %c0_22] : memref<2x3x2x32xf32, #tpu.memory_space<vmem>>, vector<1x1x1x32xf32>
    %43 = vector.shape_cast %42 : vector<1x1x1x32xf32> to vector<1x32xf32>
    %c0_23 = arith.constant 0 : index
    %c0_24 = arith.constant 0 : index
    %c1 = arith.constant 1 : index
    %c0_25 = arith.constant 0 : index
    %44 = vector.load %arg5[%c0_23, %c0_24, %c1, %c0_25] : memref<2x3x2x32xf32, #tpu.memory_space<vmem>>, vector<1x1x1x32xf32>
    %45 = vector.shape_cast %44 : vector<1x1x1x32xf32> to vector<1x32xf32>
    %cst_26 = arith.constant dense<0.000000e+00> : vector<32xf32>
    %46 = vector.multi_reduction <add>, %38, %cst_26 [1] : vector<32x32xf32> to vector<32xf32>
    %47 = vector.shape_cast %46 : vector<32xf32> to vector<32x1xf32>
    %cst_27 = arith.constant 3.200000e+01 : f32
    %48 = vector.broadcast %cst_27 : f32 to vector<32x1xf32>
    %49 = arith.divf %47, %48 : vector<32x1xf32>
    %50 = vector.broadcast %49 : vector<32x1xf32> to vector<32x32xf32>
    %51 = arith.subf %38, %50 : vector<32x32xf32>
    %52 = arith.mulf %51, %51 : vector<32x32xf32>
    %cst_28 = arith.constant dense<0.000000e+00> : vector<32xf32>
    %53 = vector.multi_reduction <add>, %52, %cst_28 [1] : vector<32x32xf32> to vector<32xf32>
    %54 = vector.shape_cast %53 : vector<32xf32> to vector<32x1xf32>
    %cst_29 = arith.constant 3.100000e+01 : f32
    %55 = vector.broadcast %cst_29 : f32 to vector<32x1xf32>
    %56 = arith.divf %54, %55 : vector<32x1xf32>
    %57 = math.sqrt %56 : vector<32x1xf32>
    %cst_30 = arith.constant 9.99999997E-7 : f32
    %58 = vector.broadcast %cst_30 : f32 to vector<32x1xf32>
    %59 = arith.addf %57, %58 : vector<32x1xf32>
    %cst_31 = arith.constant 1.000000e+00 : f32
    %60 = vector.broadcast %cst_31 : f32 to vector<32x1xf32>
    %61 = arith.divf %60, %59 : vector<32x1xf32>
    %62 = vector.broadcast %49 : vector<32x1xf32> to vector<32x32xf32>
    %63 = arith.subf %38, %62 : vector<32x32xf32>
    %64 = vector.broadcast %43 : vector<1x32xf32> to vector<32x32xf32>
    %65 = arith.mulf %64, %63 : vector<32x32xf32>
    %66 = vector.broadcast %61 : vector<32x1xf32> to vector<32x32xf32>
    %67 = arith.mulf %65, %66 : vector<32x32xf32>
    %68 = vector.broadcast %45 : vector<1x32xf32> to vector<32x32xf32>
    %69 = arith.addf %67, %68 : vector<32x32xf32>
    %c0_32 = arith.constant 0 : index
    %c0_33 = arith.constant 0 : index
    %c0_34 = arith.constant 0 : index
    %70 = vector.load %arg3[%c0_32, %c0_33, %c0_34] : memref<2x64x1664xf32, #tpu.memory_space<vmem>>, vector<1x32x32xf32>
    %71 = vector.shape_cast %70 : vector<1x32x32xf32> to vector<32x32xf32>
    %cst_35 = arith.constant dense<0.000000e+00> : vector<32x32xf32>
    %72 = tpu.matmul %69, %71, %cst_35 {dimension_numbers = #tpu.dot_dimension_numbers<[1], [0], [0], [1], [0, 0, 1, 1], [], []>} : vector<32x32xf32>, vector<32x32xf32>, vector<32x32xf32> -> vector<32x32xf32>
    %c0_36 = arith.constant 0 : index
    %c0_37 = arith.constant 0 : index
    %c0_38 = arith.constant 0 : index
    %73 = vector.load %arg4[%c0_36, %c0_37, %c0_38] : memref<2x13x128xf32, #tpu.memory_space<vmem>>, vector<1x1x32xf32>
    %74 = vector.shape_cast %73 : vector<1x1x32xf32> to vector<1x32xf32>
    %75 = vector.broadcast %74 : vector<1x32xf32> to vector<32x32xf32>
    %76 = arith.addf %72, %75 : vector<32x32xf32>
    %c0_39 = arith.constant 0 : index
    %c0_40 = arith.constant 0 : index
    %c384 = arith.constant 384 : index
    %77 = vector.load %arg3[%c0_39, %c0_40, %c384] : memref<2x64x1664xf32, #tpu.memory_space<vmem>>, vector<1x32x32xf32>
    %78 = vector.shape_cast %77 : vector<1x32x32xf32> to vector<32x32xf32>
    %cst_41 = arith.constant dense<0.000000e+00> : vector<32x32xf32>
    %79 = tpu.matmul %69, %78, %cst_41 {dimension_numbers = #tpu.dot_dimension_numbers<[1], [0], [0], [1], [0, 0, 1, 1], [], []>} : vector<32x32xf32>, vector<32x32xf32>, vector<32x32xf32> -> vector<32x32xf32>
    %c0_42 = arith.constant 0 : index
    %c3 = arith.constant 3 : index
    %c0_43 = arith.constant 0 : index
    %80 = vector.load %arg4[%c0_42, %c3, %c0_43] : memref<2x13x128xf32, #tpu.memory_space<vmem>>, vector<1x1x32xf32>
    %81 = vector.shape_cast %80 : vector<1x1x32xf32> to vector<1x32xf32>
    %82 = vector.broadcast %81 : vector<1x32xf32> to vector<32x32xf32>
    %83 = arith.addf %79, %82 : vector<32x32xf32>
    %84 = arith.select %3, %76, %83 : vector<32x32xi1>, vector<32x32xf32>
    %c0_44 = arith.constant 0 : index
    %c0_45 = arith.constant 0 : index
    %c128 = arith.constant 128 : index
    %85 = vector.load %arg3[%c0_44, %c0_45, %c128] : memref<2x64x1664xf32, #tpu.memory_space<vmem>>, vector<1x32x32xf32>
    %86 = vector.shape_cast %85 : vector<1x32x32xf32> to vector<32x32xf32>
    %cst_46 = arith.constant dense<0.000000e+00> : vector<32x32xf32>
    %87 = tpu.matmul %69, %86, %cst_46 {dimension_numbers = #tpu.dot_dimension_numbers<[1], [0], [0], [1], [0, 0, 1, 1], [], []>} : vector<32x32xf32>, vector<32x32xf32>, vector<32x32xf32> -> vector<32x32xf32>
    %c0_47 = arith.constant 0 : index
    %c1_48 = arith.constant 1 : index
    %c0_49 = arith.constant 0 : index
    %88 = vector.load %arg4[%c0_47, %c1_48, %c0_49] : memref<2x13x128xf32, #tpu.memory_space<vmem>>, vector<1x1x32xf32>
    %89 = vector.shape_cast %88 : vector<1x1x32xf32> to vector<1x32xf32>
    %90 = vector.broadcast %89 : vector<1x32xf32> to vector<32x32xf32>
    %91 = arith.addf %87, %90 : vector<32x32xf32>
    %c0_50 = arith.constant 0 : index
    %c0_51 = arith.constant 0 : index
    %c512 = arith.constant 512 : index
    %92 = vector.load %arg3[%c0_50, %c0_51, %c512] : memref<2x64x1664xf32, #tpu.memory_space<vmem>>, vector<1x32x32xf32>
    %93 = vector.shape_cast %92 : vector<1x32x32xf32> to vector<32x32xf32>
    %cst_52 = arith.constant dense<0.000000e+00> : vector<32x32xf32>
    %94 = tpu.matmul %69, %93, %cst_52 {dimension_numbers = #tpu.dot_dimension_numbers<[1], [0], [0], [1], [0, 0, 1, 1], [], []>} : vector<32x32xf32>, vector<32x32xf32>, vector<32x32xf32> -> vector<32x32xf32>
    %c0_53 = arith.constant 0 : index
    %c4 = arith.constant 4 : index
    %c0_54 = arith.constant 0 : index
    %95 = vector.load %arg4[%c0_53, %c4, %c0_54] : memref<2x13x128xf32, #tpu.memory_space<vmem>>, vector<1x1x32xf32>
    %96 = vector.shape_cast %95 : vector<1x1x32xf32> to vector<1x32xf32>
    %97 = vector.broadcast %96 : vector<1x32xf32> to vector<32x32xf32>
    %98 = arith.addf %94, %97 : vector<32x32xf32>
    %99 = arith.select %3, %91, %98 : vector<32x32xi1>, vector<32x32xf32>
    %c0_55 = arith.constant 0 : index
    %c0_56 = arith.constant 0 : index
    %c256 = arith.constant 256 : index
    %100 = vector.load %arg3[%c0_55, %c0_56, %c256] : memref<2x64x1664xf32, #tpu.memory_space<vmem>>, vector<1x32x32xf32>
    %101 = vector.shape_cast %100 : vector<1x32x32xf32> to vector<32x32xf32>
    %cst_57 = arith.constant dense<0.000000e+00> : vector<32x32xf32>
    %102 = tpu.matmul %69, %101, %cst_57 {dimension_numbers = #tpu.dot_dimension_numbers<[1], [0], [0], [1], [0, 0, 1, 1], [], []>} : vector<32x32xf32>, vector<32x32xf32>, vector<32x32xf32> -> vector<32x32xf32>
    %c0_58 = arith.constant 0 : index
    %c2 = arith.constant 2 : index
    %c0_59 = arith.constant 0 : index
    %103 = vector.load %arg4[%c0_58, %c2, %c0_59] : memref<2x13x128xf32, #tpu.memory_space<vmem>>, vector<1x1x32xf32>
    %104 = vector.shape_cast %103 : vector<1x1x32xf32> to vector<1x32xf32>
    %105 = vector.broadcast %104 : vector<1x32xf32> to vector<32x32xf32>
    %106 = arith.addf %102, %105 : vector<32x32xf32>
    %c0_60 = arith.constant 0 : index
    %c0_61 = arith.constant 0 : index
    %c640 = arith.constant 640 : index
    %107 = vector.load %arg3[%c0_60, %c0_61, %c640] : memref<2x64x1664xf32, #tpu.memory_space<vmem>>, vector<1x32x32xf32>
    %108 = vector.shape_cast %107 : vector<1x32x32xf32> to vector<32x32xf32>
    %cst_62 = arith.constant dense<0.000000e+00> : vector<32x32xf32>
    %109 = tpu.matmul %69, %108, %cst_62 {dimension_numbers = #tpu.dot_dimension_numbers<[1], [0], [0], [1], [0, 0, 1, 1], [], []>} : vector<32x32xf32>, vector<32x32xf32>, vector<32x32xf32> -> vector<32x32xf32>
    %c0_63 = arith.constant 0 : index
    %c5 = arith.constant 5 : index
    %c0_64 = arith.constant 0 : index
    %110 = vector.load %arg4[%c0_63, %c5, %c0_64] : memref<2x13x128xf32, #tpu.memory_space<vmem>>, vector<1x1x32xf32>
    %111 = vector.shape_cast %110 : vector<1x1x32xf32> to vector<1x32xf32>
    %112 = vector.broadcast %111 : vector<1x32xf32> to vector<32x32xf32>
    %113 = arith.addf %109, %112 : vector<32x32xf32>
    %114 = arith.select %3, %106, %113 : vector<32x32xi1>, vector<32x32xf32>
    %115 = vector.shape_cast %99 : vector<32x32xf32> to vector<2x16x32xf32>
    %116 = vector.shape_cast %114 : vector<32x32xf32> to vector<2x16x32xf32>
    %cst_65 = arith.constant 0.353553385 : f32
    %117 = vector.broadcast %cst_65 : f32 to vector<32x32xf32>
    %118 = arith.mulf %84, %117 : vector<32x32xf32>
    %119 = vector.shape_cast %118 : vector<32x32xf32> to vector<2x16x32xf32>
    %120 = vector.broadcast %12 : vector<1x1x32xf32> to vector<2x16x32xf32>
    %121 = arith.mulf %119, %120 : vector<2x16x32xf32>
    "tpu.trace_start"() <{level = 10 : i32, message = "bqd,bkd->bqk"}> : () -> ()
    %cst_66 = arith.constant dense<0.000000e+00> : vector<2x16x16xf32>
    %122 = tpu.matmul %121, %115, %cst_66 {dimension_numbers = #tpu.dot_dimension_numbers<[2], [2], [1], [1], [0, 0, 0, 1, 1, 1], [0], [0]>} : vector<2x16x32xf32>, vector<2x16x32xf32>, vector<2x16x16xf32> -> vector<2x16x16xf32>
    "tpu.trace_stop"() : () -> ()
    %123 = arith.addf %122, %41 : vector<2x16x16xf32>
    %cst_67 = arith.constant dense<0xFF800000> : vector<2x16xf32>
    %124 = vector.multi_reduction <maximumf>, %123, %cst_67 [2] : vector<2x16x16xf32> to vector<2x16xf32>
    %125 = vector.shape_cast %124 : vector<2x16xf32> to vector<2x16x1xf32>
    %126 = vector.broadcast %125 : vector<2x16x1xf32> to vector<2x16x16xf32>
    %127 = arith.subf %123, %126 : vector<2x16x16xf32>
    %128 = math.exp %127 : vector<2x16x16xf32>
    %cst_68 = arith.constant dense<0.000000e+00> : vector<2x16xf32>
    %129 = vector.multi_reduction <add>, %128, %cst_68 [2] : vector<2x16x16xf32> to vector<2x16xf32>
    %130 = vector.shape_cast %129 : vector<2x16xf32> to vector<2x16x1xf32>
    %131 = tpu.reciprocal %130 {approx = true} : vector<2x16x1xf32> -> vector<2x16x1xf32>
    %132 = vector.broadcast %131 : vector<2x16x1xf32> to vector<2x16x16xf32>
    %133 = arith.mulf %128, %132 : vector<2x16x16xf32>
    %134 = vector.broadcast %12 : vector<1x1x32xf32> to vector<2x16x32xf32>
    %135 = arith.mulf %116, %134 : vector<2x16x32xf32>
    "tpu.trace_start"() <{level = 10 : i32, message = "bqk,bkd->bqd"}> : () -> ()
    %cst_69 = arith.constant dense<0.000000e+00> : vector<2x16x32xf32>
    %136 = tpu.matmul %133, %135, %cst_69 {dimension_numbers = #tpu.dot_dimension_numbers<[2], [1], [1], [2], [0, 0, 0, 1, 1, 2], [0], [0]>} : vector<2x16x16xf32>, vector<2x16x32xf32>, vector<2x16x32xf32> -> vector<2x16x32xf32>
    "tpu.trace_stop"() : () -> ()
    %137 = vector.broadcast %20 : vector<1x1x32xf32> to vector<2x16x32xf32>
    %138 = arith.mulf %119, %137 : vector<2x16x32xf32>
    "tpu.trace_start"() <{level = 10 : i32, message = "bqd,bkd->bqk"}> : () -> ()
    %cst_70 = arith.constant dense<0.000000e+00> : vector<2x16x16xf32>
    %139 = tpu.matmul %138, %115, %cst_70 {dimension_numbers = #tpu.dot_dimension_numbers<[2], [2], [1], [1], [0, 0, 0, 1, 1, 1], [0], [0]>} : vector<2x16x32xf32>, vector<2x16x32xf32>, vector<2x16x16xf32> -> vector<2x16x16xf32>
    "tpu.trace_stop"() : () -> ()
    %140 = arith.addf %139, %41 : vector<2x16x16xf32>
    %cst_71 = arith.constant dense<0xFF800000> : vector<2x16xf32>
    %141 = vector.multi_reduction <maximumf>, %140, %cst_71 [2] : vector<2x16x16xf32> to vector<2x16xf32>
    %142 = vector.shape_cast %141 : vector<2x16xf32> to vector<2x16x1xf32>
    %143 = vector.broadcast %142 : vector<2x16x1xf32> to vector<2x16x16xf32>
    %144 = arith.subf %140, %143 : vector<2x16x16xf32>
    %145 = math.exp %144 : vector<2x16x16xf32>
    %cst_72 = arith.constant dense<0.000000e+00> : vector<2x16xf32>
    %146 = vector.multi_reduction <add>, %145, %cst_72 [2] : vector<2x16x16xf32> to vector<2x16xf32>
    %147 = vector.shape_cast %146 : vector<2x16xf32> to vector<2x16x1xf32>
    %148 = tpu.reciprocal %147 {approx = true} : vector<2x16x1xf32> -> vector<2x16x1xf32>
    %149 = vector.broadcast %148 : vector<2x16x1xf32> to vector<2x16x16xf32>
    %150 = arith.mulf %145, %149 : vector<2x16x16xf32>
    %151 = vector.broadcast %20 : vector<1x1x32xf32> to vector<2x16x32xf32>
    %152 = arith.mulf %116, %151 : vector<2x16x32xf32>
    "tpu.trace_start"() <{level = 10 : i32, message = "bqk,bkd->bqd"}> : () -> ()
    %cst_73 = arith.constant dense<0.000000e+00> : vector<2x16x32xf32>
    %153 = tpu.matmul %150, %152, %cst_73 {dimension_numbers = #tpu.dot_dimension_numbers<[2], [1], [1], [2], [0, 0, 0, 1, 1, 2], [0], [0]>} : vector<2x16x16xf32>, vector<2x16x32xf32>, vector<2x16x32xf32> -> vector<2x16x32xf32>
    "tpu.trace_stop"() : () -> ()
    %154 = arith.addf %136, %153 : vector<2x16x32xf32>
    %155 = vector.broadcast %28 : vector<1x1x32xf32> to vector<2x16x32xf32>
    %156 = arith.mulf %119, %155 : vector<2x16x32xf32>
    "tpu.trace_start"() <{level = 10 : i32, message = "bqd,bkd->bqk"}> : () -> ()
    %cst_74 = arith.constant dense<0.000000e+00> : vector<2x16x16xf32>
    %157 = tpu.matmul %156, %115, %cst_74 {dimension_numbers = #tpu.dot_dimension_numbers<[2], [2], [1], [1], [0, 0, 0, 1, 1, 1], [0], [0]>} : vector<2x16x32xf32>, vector<2x16x32xf32>, vector<2x16x16xf32> -> vector<2x16x16xf32>
    "tpu.trace_stop"() : () -> ()
    %158 = arith.addf %157, %41 : vector<2x16x16xf32>
    %cst_75 = arith.constant dense<0xFF800000> : vector<2x16xf32>
    %159 = vector.multi_reduction <maximumf>, %158, %cst_75 [2] : vector<2x16x16xf32> to vector<2x16xf32>
    %160 = vector.shape_cast %159 : vector<2x16xf32> to vector<2x16x1xf32>
    %161 = vector.broadcast %160 : vector<2x16x1xf32> to vector<2x16x16xf32>
    %162 = arith.subf %158, %161 : vector<2x16x16xf32>
    %163 = math.exp %162 : vector<2x16x16xf32>
    %cst_76 = arith.constant dense<0.000000e+00> : vector<2x16xf32>
    %164 = vector.multi_reduction <add>, %163, %cst_76 [2] : vector<2x16x16xf32> to vector<2x16xf32>
    %165 = vector.shape_cast %164 : vector<2x16xf32> to vector<2x16x1xf32>
    %166 = tpu.reciprocal %165 {approx = true} : vector<2x16x1xf32> -> vector<2x16x1xf32>
    %167 = vector.broadcast %166 : vector<2x16x1xf32> to vector<2x16x16xf32>
    %168 = arith.mulf %163, %167 : vector<2x16x16xf32>
    %169 = vector.broadcast %28 : vector<1x1x32xf32> to vector<2x16x32xf32>
    %170 = arith.mulf %116, %169 : vector<2x16x32xf32>
    "tpu.trace_start"() <{level = 10 : i32, message = "bqk,bkd->bqd"}> : () -> ()
    %cst_77 = arith.constant dense<0.000000e+00> : vector<2x16x32xf32>
    %171 = tpu.matmul %168, %170, %cst_77 {dimension_numbers = #tpu.dot_dimension_numbers<[2], [1], [1], [2], [0, 0, 0, 1, 1, 2], [0], [0]>} : vector<2x16x16xf32>, vector<2x16x32xf32>, vector<2x16x32xf32> -> vector<2x16x32xf32>
    "tpu.trace_stop"() : () -> ()
    %172 = arith.addf %154, %171 : vector<2x16x32xf32>
    %173 = vector.broadcast %36 : vector<1x1x32xf32> to vector<2x16x32xf32>
    %174 = arith.mulf %119, %173 : vector<2x16x32xf32>
    "tpu.trace_start"() <{level = 10 : i32, message = "bqd,bkd->bqk"}> : () -> ()
    %cst_78 = arith.constant dense<0.000000e+00> : vector<2x16x16xf32>
    %175 = tpu.matmul %174, %115, %cst_78 {dimension_numbers = #tpu.dot_dimension_numbers<[2], [2], [1], [1], [0, 0, 0, 1, 1, 1], [0], [0]>} : vector<2x16x32xf32>, vector<2x16x32xf32>, vector<2x16x16xf32> -> vector<2x16x16xf32>
    "tpu.trace_stop"() : () -> ()
    %176 = arith.addf %175, %41 : vector<2x16x16xf32>
    %cst_79 = arith.constant dense<0xFF800000> : vector<2x16xf32>
    %177 = vector.multi_reduction <maximumf>, %176, %cst_79 [2] : vector<2x16x16xf32> to vector<2x16xf32>
    %178 = vector.shape_cast %177 : vector<2x16xf32> to vector<2x16x1xf32>
    %179 = vector.broadcast %178 : vector<2x16x1xf32> to vector<2x16x16xf32>
    %180 = arith.subf %176, %179 : vector<2x16x16xf32>
    %181 = math.exp %180 : vector<2x16x16xf32>
    %cst_80 = arith.constant dense<0.000000e+00> : vector<2x16xf32>
    %182 = vector.multi_reduction <add>, %181, %cst_80 [2] : vector<2x16x16xf32> to vector<2x16xf32>
    %183 = vector.shape_cast %182 : vector<2x16xf32> to vector<2x16x1xf32>
    %184 = tpu.reciprocal %183 {approx = true} : vector<2x16x1xf32> -> vector<2x16x1xf32>
    %185 = vector.broadcast %184 : vector<2x16x1xf32> to vector<2x16x16xf32>
    %186 = arith.mulf %181, %185 : vector<2x16x16xf32>
    %187 = vector.broadcast %36 : vector<1x1x32xf32> to vector<2x16x32xf32>
    %188 = arith.mulf %116, %187 : vector<2x16x32xf32>
    "tpu.trace_start"() <{level = 10 : i32, message = "bqk,bkd->bqd"}> : () -> ()
    %cst_81 = arith.constant dense<0.000000e+00> : vector<2x16x32xf32>
    %189 = tpu.matmul %186, %188, %cst_81 {dimension_numbers = #tpu.dot_dimension_numbers<[2], [1], [1], [2], [0, 0, 0, 1, 1, 2], [0], [0]>} : vector<2x16x16xf32>, vector<2x16x32xf32>, vector<2x16x32xf32> -> vector<2x16x32xf32>
    "tpu.trace_stop"() : () -> ()
    %190 = arith.addf %172, %189 : vector<2x16x32xf32>
    %191 = vector.shape_cast %190 : vector<2x16x32xf32> to vector<32x32xf32>
    %c0_82 = arith.constant 0 : index
    %c0_83 = arith.constant 0 : index
    %c768 = arith.constant 768 : index
    %192 = vector.load %arg3[%c0_82, %c0_83, %c768] : memref<2x64x1664xf32, #tpu.memory_space<vmem>>, vector<1x32x32xf32>
    %193 = vector.shape_cast %192 : vector<1x32x32xf32> to vector<32x32xf32>
    %cst_84 = arith.constant dense<0.000000e+00> : vector<32x32xf32>
    %194 = tpu.matmul %191, %193, %cst_84 {dimension_numbers = #tpu.dot_dimension_numbers<[1], [0], [0], [1], [0, 0, 1, 1], [], []>} : vector<32x32xf32>, vector<32x32xf32>, vector<32x32xf32> -> vector<32x32xf32>
    %c0_85 = arith.constant 0 : index
    %c6 = arith.constant 6 : index
    %c0_86 = arith.constant 0 : index
    %195 = vector.load %arg4[%c0_85, %c6, %c0_86] : memref<2x13x128xf32, #tpu.memory_space<vmem>>, vector<1x1x32xf32>
    %196 = vector.shape_cast %195 : vector<1x1x32xf32> to vector<1x32xf32>
    %197 = vector.broadcast %196 : vector<1x32xf32> to vector<32x32xf32>
    %198 = arith.addf %194, %197 : vector<32x32xf32>
    %199 = arith.addf %38, %198 : vector<32x32xf32>
    %c0_87 = arith.constant 0 : index
    %c1_88 = arith.constant 1 : index
    %c0_89 = arith.constant 0 : index
    %c0_90 = arith.constant 0 : index
    %200 = vector.load %arg5[%c0_87, %c1_88, %c0_89, %c0_90] : memref<2x3x2x32xf32, #tpu.memory_space<vmem>>, vector<1x1x1x32xf32>
    %201 = vector.shape_cast %200 : vector<1x1x1x32xf32> to vector<1x32xf32>
    %c0_91 = arith.constant 0 : index
    %c1_92 = arith.constant 1 : index
    %c1_93 = arith.constant 1 : index
    %c0_94 = arith.constant 0 : index
    %202 = vector.load %arg5[%c0_91, %c1_92, %c1_93, %c0_94] : memref<2x3x2x32xf32, #tpu.memory_space<vmem>>, vector<1x1x1x32xf32>
    %203 = vector.shape_cast %202 : vector<1x1x1x32xf32> to vector<1x32xf32>
    %cst_95 = arith.constant dense<0.000000e+00> : vector<32xf32>
    %204 = vector.multi_reduction <add>, %199, %cst_95 [1] : vector<32x32xf32> to vector<32xf32>
    %205 = vector.shape_cast %204 : vector<32xf32> to vector<32x1xf32>
    %cst_96 = arith.constant 3.200000e+01 : f32
    %206 = vector.broadcast %cst_96 : f32 to vector<32x1xf32>
    %207 = arith.divf %205, %206 : vector<32x1xf32>
    %208 = vector.broadcast %207 : vector<32x1xf32> to vector<32x32xf32>
    %209 = arith.subf %199, %208 : vector<32x32xf32>
    %210 = arith.mulf %209, %209 : vector<32x32xf32>
    %cst_97 = arith.constant dense<0.000000e+00> : vector<32xf32>
    %211 = vector.multi_reduction <add>, %210, %cst_97 [1] : vector<32x32xf32> to vector<32xf32>
    %212 = vector.shape_cast %211 : vector<32xf32> to vector<32x1xf32>
    %cst_98 = arith.constant 3.100000e+01 : f32
    %213 = vector.broadcast %cst_98 : f32 to vector<32x1xf32>
    %214 = arith.divf %212, %213 : vector<32x1xf32>
    %215 = math.sqrt %214 : vector<32x1xf32>
    %cst_99 = arith.constant 9.99999997E-7 : f32
    %216 = vector.broadcast %cst_99 : f32 to vector<32x1xf32>
    %217 = arith.addf %215, %216 : vector<32x1xf32>
    %cst_100 = arith.constant 1.000000e+00 : f32
    %218 = vector.broadcast %cst_100 : f32 to vector<32x1xf32>
    %219 = arith.divf %218, %217 : vector<32x1xf32>
    %220 = vector.broadcast %207 : vector<32x1xf32> to vector<32x32xf32>
    %221 = arith.subf %199, %220 : vector<32x32xf32>
    %222 = vector.broadcast %201 : vector<1x32xf32> to vector<32x32xf32>
    %223 = arith.mulf %222, %221 : vector<32x32xf32>
    %224 = vector.broadcast %219 : vector<32x1xf32> to vector<32x32xf32>
    %225 = arith.mulf %223, %224 : vector<32x32xf32>
    %226 = vector.broadcast %203 : vector<1x32xf32> to vector<32x32xf32>
    %227 = arith.addf %225, %226 : vector<32x32xf32>
    %c0_101 = arith.constant 0 : index
    %c0_102 = arith.constant 0 : index
    %c896 = arith.constant 896 : index
    %228 = vector.load %arg3[%c0_101, %c0_102, %c896] : memref<2x64x1664xf32, #tpu.memory_space<vmem>>, vector<1x32x32xf32>
    %229 = vector.shape_cast %228 : vector<1x32x32xf32> to vector<32x32xf32>
    %cst_103 = arith.constant dense<0.000000e+00> : vector<32x32xf32>
    %230 = tpu.matmul %227, %229, %cst_103 {dimension_numbers = #tpu.dot_dimension_numbers<[1], [0], [0], [1], [0, 0, 1, 1], [], []>} : vector<32x32xf32>, vector<32x32xf32>, vector<32x32xf32> -> vector<32x32xf32>
    %c0_104 = arith.constant 0 : index
    %c7 = arith.constant 7 : index
    %c0_105 = arith.constant 0 : index
    %231 = vector.load %arg4[%c0_104, %c7, %c0_105] : memref<2x13x128xf32, #tpu.memory_space<vmem>>, vector<1x1x32xf32>
    %232 = vector.shape_cast %231 : vector<1x1x32xf32> to vector<1x32xf32>
    %233 = vector.broadcast %232 : vector<1x32xf32> to vector<32x32xf32>
    %234 = arith.addf %230, %233 : vector<32x32xf32>
    %c0_106 = arith.constant 0 : index
    %c0_107 = arith.constant 0 : index
    %c1024 = arith.constant 1024 : index
    %235 = vector.load %arg3[%c0_106, %c0_107, %c1024] : memref<2x64x1664xf32, #tpu.memory_space<vmem>>, vector<1x32x32xf32>
    %236 = vector.shape_cast %235 : vector<1x32x32xf32> to vector<32x32xf32>
    %cst_108 = arith.constant dense<0.000000e+00> : vector<16x32xf32>
    %237 = tpu.matmul %40, %236, %cst_108 {dimension_numbers = #tpu.dot_dimension_numbers<[1], [0], [0], [1], [0, 0, 1, 1], [], []>} : vector<16x32xf32>, vector<32x32xf32>, vector<16x32xf32> -> vector<16x32xf32>
    %c0_109 = arith.constant 0 : index
    %c8 = arith.constant 8 : index
    %c0_110 = arith.constant 0 : index
    %238 = vector.load %arg4[%c0_109, %c8, %c0_110] : memref<2x13x128xf32, #tpu.memory_space<vmem>>, vector<1x1x32xf32>
    %239 = vector.shape_cast %238 : vector<1x1x32xf32> to vector<1x32xf32>
    %240 = vector.broadcast %239 : vector<1x32xf32> to vector<16x32xf32>
    %241 = arith.addf %237, %240 : vector<16x32xf32>
    %242 = vector.shape_cast %241 : vector<16x32xf32> to vector<2x8x32xf32>
    %c0_111 = arith.constant 0 : index
    %c0_112 = arith.constant 0 : index
    %c1152 = arith.constant 1152 : index
    %243 = vector.load %arg3[%c0_111, %c0_112, %c1152] : memref<2x64x1664xf32, #tpu.memory_space<vmem>>, vector<1x32x32xf32>
    %244 = vector.shape_cast %243 : vector<1x32x32xf32> to vector<32x32xf32>
    %cst_113 = arith.constant dense<0.000000e+00> : vector<16x32xf32>
    %245 = tpu.matmul %40, %244, %cst_113 {dimension_numbers = #tpu.dot_dimension_numbers<[1], [0], [0], [1], [0, 0, 1, 1], [], []>} : vector<16x32xf32>, vector<32x32xf32>, vector<16x32xf32> -> vector<16x32xf32>
    %c0_114 = arith.constant 0 : index
    %c9 = arith.constant 9 : index
    %c0_115 = arith.constant 0 : index
    %246 = vector.load %arg4[%c0_114, %c9, %c0_115] : memref<2x13x128xf32, #tpu.memory_space<vmem>>, vector<1x1x32xf32>
    %247 = vector.shape_cast %246 : vector<1x1x32xf32> to vector<1x32xf32>
    %248 = vector.broadcast %247 : vector<1x32xf32> to vector<16x32xf32>
    %249 = arith.addf %245, %248 : vector<16x32xf32>
    %250 = vector.shape_cast %249 : vector<16x32xf32> to vector<2x8x32xf32>
    %cst_116 = arith.constant 0.353553385 : f32
    %251 = vector.broadcast %cst_116 : f32 to vector<32x32xf32>
    %252 = arith.mulf %234, %251 : vector<32x32xf32>
    %253 = vector.shape_cast %252 : vector<32x32xf32> to vector<2x16x32xf32>
    %254 = vector.broadcast %12 : vector<1x1x32xf32> to vector<2x16x32xf32>
    %255 = arith.mulf %253, %254 : vector<2x16x32xf32>
    "tpu.trace_start"() <{level = 10 : i32, message = "bqd,bkd->bqk"}> : () -> ()
    %cst_117 = arith.constant dense<0.000000e+00> : vector<2x16x8xf32>
    %256 = tpu.matmul %255, %242, %cst_117 {dimension_numbers = #tpu.dot_dimension_numbers<[2], [2], [1], [1], [0, 0, 0, 1, 1, 1], [0], [0]>} : vector<2x16x32xf32>, vector<2x8x32xf32>, vector<2x16x8xf32> -> vector<2x16x8xf32>
    "tpu.trace_stop"() : () -> ()
    %cst_118 = arith.constant dense<0xFF800000> : vector<2x16xf32>
    %257 = vector.multi_reduction <maximumf>, %256, %cst_118 [2] : vector<2x16x8xf32> to vector<2x16xf32>
    %258 = vector.shape_cast %257 : vector<2x16xf32> to vector<2x16x1xf32>
    %259 = vector.broadcast %258 : vector<2x16x1xf32> to vector<2x16x8xf32>
    %260 = arith.subf %256, %259 : vector<2x16x8xf32>
    %261 = math.exp %260 : vector<2x16x8xf32>
    %cst_119 = arith.constant dense<0.000000e+00> : vector<2x16xf32>
    %262 = vector.multi_reduction <add>, %261, %cst_119 [2] : vector<2x16x8xf32> to vector<2x16xf32>
    %263 = vector.shape_cast %262 : vector<2x16xf32> to vector<2x16x1xf32>
    %264 = tpu.reciprocal %263 {approx = true} : vector<2x16x1xf32> -> vector<2x16x1xf32>
    %265 = vector.broadcast %264 : vector<2x16x1xf32> to vector<2x16x8xf32>
    %266 = arith.mulf %261, %265 : vector<2x16x8xf32>
    %267 = vector.broadcast %12 : vector<1x1x32xf32> to vector<2x8x32xf32>
    %268 = arith.mulf %250, %267 : vector<2x8x32xf32>
    "tpu.trace_start"() <{level = 10 : i32, message = "bqk,bkd->bqd"}> : () -> ()
    %cst_120 = arith.constant dense<0.000000e+00> : vector<2x16x32xf32>
    %269 = tpu.matmul %266, %268, %cst_120 {dimension_numbers = #tpu.dot_dimension_numbers<[2], [1], [1], [2], [0, 0, 0, 1, 1, 2], [0], [0]>} : vector<2x16x8xf32>, vector<2x8x32xf32>, vector<2x16x32xf32> -> vector<2x16x32xf32>
    "tpu.trace_stop"() : () -> ()
    %270 = vector.broadcast %20 : vector<1x1x32xf32> to vector<2x16x32xf32>
    %271 = arith.mulf %253, %270 : vector<2x16x32xf32>
    "tpu.trace_start"() <{level = 10 : i32, message = "bqd,bkd->bqk"}> : () -> ()
    %cst_121 = arith.constant dense<0.000000e+00> : vector<2x16x8xf32>
    %272 = tpu.matmul %271, %242, %cst_121 {dimension_numbers = #tpu.dot_dimension_numbers<[2], [2], [1], [1], [0, 0, 0, 1, 1, 1], [0], [0]>} : vector<2x16x32xf32>, vector<2x8x32xf32>, vector<2x16x8xf32> -> vector<2x16x8xf32>
    "tpu.trace_stop"() : () -> ()
    %cst_122 = arith.constant dense<0xFF800000> : vector<2x16xf32>
    %273 = vector.multi_reduction <maximumf>, %272, %cst_122 [2] : vector<2x16x8xf32> to vector<2x16xf32>
    %274 = vector.shape_cast %273 : vector<2x16xf32> to vector<2x16x1xf32>
    %275 = vector.broadcast %274 : vector<2x16x1xf32> to vector<2x16x8xf32>
    %276 = arith.subf %272, %275 : vector<2x16x8xf32>
    %277 = math.exp %276 : vector<2x16x8xf32>
    %cst_123 = arith.constant dense<0.000000e+00> : vector<2x16xf32>
    %278 = vector.multi_reduction <add>, %277, %cst_123 [2] : vector<2x16x8xf32> to vector<2x16xf32>
    %279 = vector.shape_cast %278 : vector<2x16xf32> to vector<2x16x1xf32>
    %280 = tpu.reciprocal %279 {approx = true} : vector<2x16x1xf32> -> vector<2x16x1xf32>
    %281 = vector.broadcast %280 : vector<2x16x1xf32> to vector<2x16x8xf32>
    %282 = arith.mulf %277, %281 : vector<2x16x8xf32>
    %283 = vector.broadcast %20 : vector<1x1x32xf32> to vector<2x8x32xf32>
    %284 = arith.mulf %250, %283 : vector<2x8x32xf32>
    "tpu.trace_start"() <{level = 10 : i32, message = "bqk,bkd->bqd"}> : () -> ()
    %cst_124 = arith.constant dense<0.000000e+00> : vector<2x16x32xf32>
    %285 = tpu.matmul %282, %284, %cst_124 {dimension_numbers = #tpu.dot_dimension_numbers<[2], [1], [1], [2], [0, 0, 0, 1, 1, 2], [0], [0]>} : vector<2x16x8xf32>, vector<2x8x32xf32>, vector<2x16x32xf32> -> vector<2x16x32xf32>
    "tpu.trace_stop"() : () -> ()
    %286 = arith.addf %269, %285 : vector<2x16x32xf32>
    %287 = vector.broadcast %28 : vector<1x1x32xf32> to vector<2x16x32xf32>
    %288 = arith.mulf %253, %287 : vector<2x16x32xf32>
    "tpu.trace_start"() <{level = 10 : i32, message = "bqd,bkd->bqk"}> : () -> ()
    %cst_125 = arith.constant dense<0.000000e+00> : vector<2x16x8xf32>
    %289 = tpu.matmul %288, %242, %cst_125 {dimension_numbers = #tpu.dot_dimension_numbers<[2], [2], [1], [1], [0, 0, 0, 1, 1, 1], [0], [0]>} : vector<2x16x32xf32>, vector<2x8x32xf32>, vector<2x16x8xf32> -> vector<2x16x8xf32>
    "tpu.trace_stop"() : () -> ()
    %cst_126 = arith.constant dense<0xFF800000> : vector<2x16xf32>
    %290 = vector.multi_reduction <maximumf>, %289, %cst_126 [2] : vector<2x16x8xf32> to vector<2x16xf32>
    %291 = vector.shape_cast %290 : vector<2x16xf32> to vector<2x16x1xf32>
    %292 = vector.broadcast %291 : vector<2x16x1xf32> to vector<2x16x8xf32>
    %293 = arith.subf %289, %292 : vector<2x16x8xf32>
    %294 = math.exp %293 : vector<2x16x8xf32>
    %cst_127 = arith.constant dense<0.000000e+00> : vector<2x16xf32>
    %295 = vector.multi_reduction <add>, %294, %cst_127 [2] : vector<2x16x8xf32> to vector<2x16xf32>
    %296 = vector.shape_cast %295 : vector<2x16xf32> to vector<2x16x1xf32>
    %297 = tpu.reciprocal %296 {approx = true} : vector<2x16x1xf32> -> vector<2x16x1xf32>
    %298 = vector.broadcast %297 : vector<2x16x1xf32> to vector<2x16x8xf32>
    %299 = arith.mulf %294, %298 : vector<2x16x8xf32>
    %300 = vector.broadcast %28 : vector<1x1x32xf32> to vector<2x8x32xf32>
    %301 = arith.mulf %250, %300 : vector<2x8x32xf32>
    "tpu.trace_start"() <{level = 10 : i32, message = "bqk,bkd->bqd"}> : () -> ()
    %cst_128 = arith.constant dense<0.000000e+00> : vector<2x16x32xf32>
    %302 = tpu.matmul %299, %301, %cst_128 {dimension_numbers = #tpu.dot_dimension_numbers<[2], [1], [1], [2], [0, 0, 0, 1, 1, 2], [0], [0]>} : vector<2x16x8xf32>, vector<2x8x32xf32>, vector<2x16x32xf32> -> vector<2x16x32xf32>
    "tpu.trace_stop"() : () -> ()
    %303 = arith.addf %286, %302 : vector<2x16x32xf32>
    %304 = vector.broadcast %36 : vector<1x1x32xf32> to vector<2x16x32xf32>
    %305 = arith.mulf %253, %304 : vector<2x16x32xf32>
    "tpu.trace_start"() <{level = 10 : i32, message = "bqd,bkd->bqk"}> : () -> ()
    %cst_129 = arith.constant dense<0.000000e+00> : vector<2x16x8xf32>
    %306 = tpu.matmul %305, %242, %cst_129 {dimension_numbers = #tpu.dot_dimension_numbers<[2], [2], [1], [1], [0, 0, 0, 1, 1, 1], [0], [0]>} : vector<2x16x32xf32>, vector<2x8x32xf32>, vector<2x16x8xf32> -> vector<2x16x8xf32>
    "tpu.trace_stop"() : () -> ()
    %cst_130 = arith.constant dense<0xFF800000> : vector<2x16xf32>
    %307 = vector.multi_reduction <maximumf>, %306, %cst_130 [2] : vector<2x16x8xf32> to vector<2x16xf32>
    %308 = vector.shape_cast %307 : vector<2x16xf32> to vector<2x16x1xf32>
    %309 = vector.broadcast %308 : vector<2x16x1xf32> to vector<2x16x8xf32>
    %310 = arith.subf %306, %309 : vector<2x16x8xf32>
    %311 = math.exp %310 : vector<2x16x8xf32>
    %cst_131 = arith.constant dense<0.000000e+00> : vector<2x16xf32>
    %312 = vector.multi_reduction <add>, %311, %cst_131 [2] : vector<2x16x8xf32> to vector<2x16xf32>
    %313 = vector.shape_cast %312 : vector<2x16xf32> to vector<2x16x1xf32>
    %314 = tpu.reciprocal %313 {approx = true} : vector<2x16x1xf32> -> vector<2x16x1xf32>
    %315 = vector.broadcast %314 : vector<2x16x1xf32> to vector<2x16x8xf32>
    %316 = arith.mulf %311, %315 : vector<2x16x8xf32>
    %317 = vector.broadcast %36 : vector<1x1x32xf32> to vector<2x8x32xf32>
    %318 = arith.mulf %250, %317 : vector<2x8x32xf32>
    "tpu.trace_start"() <{level = 10 : i32, message = "bqk,bkd->bqd"}> : () -> ()
    %cst_132 = arith.constant dense<0.000000e+00> : vector<2x16x32xf32>
    %319 = tpu.matmul %316, %318, %cst_132 {dimension_numbers = #tpu.dot_dimension_numbers<[2], [1], [1], [2], [0, 0, 0, 1, 1, 2], [0], [0]>} : vector<2x16x8xf32>, vector<2x8x32xf32>, vector<2x16x32xf32> -> vector<2x16x32xf32>
    "tpu.trace_stop"() : () -> ()
    %320 = arith.addf %303, %319 : vector<2x16x32xf32>
    %321 = vector.shape_cast %320 : vector<2x16x32xf32> to vector<32x32xf32>
    %c0_133 = arith.constant 0 : index
    %c0_134 = arith.constant 0 : index
    %c1280 = arith.constant 1280 : index
    %322 = vector.load %arg3[%c0_133, %c0_134, %c1280] : memref<2x64x1664xf32, #tpu.memory_space<vmem>>, vector<1x32x32xf32>
    %323 = vector.shape_cast %322 : vector<1x32x32xf32> to vector<32x32xf32>
    %cst_135 = arith.constant dense<0.000000e+00> : vector<32x32xf32>
    %324 = tpu.matmul %321, %323, %cst_135 {dimension_numbers = #tpu.dot_dimension_numbers<[1], [0], [0], [1], [0, 0, 1, 1], [], []>} : vector<32x32xf32>, vector<32x32xf32>, vector<32x32xf32> -> vector<32x32xf32>
    %c0_136 = arith.constant 0 : index
    %c10 = arith.constant 10 : index
    %c0_137 = arith.constant 0 : index
    %325 = vector.load %arg4[%c0_136, %c10, %c0_137] : memref<2x13x128xf32, #tpu.memory_space<vmem>>, vector<1x1x32xf32>
    %326 = vector.shape_cast %325 : vector<1x1x32xf32> to vector<1x32xf32>
    %327 = vector.broadcast %326 : vector<1x32xf32> to vector<32x32xf32>
    %328 = arith.addf %324, %327 : vector<32x32xf32>
    %329 = arith.addf %199, %328 : vector<32x32xf32>
    %c0_138 = arith.constant 0 : index
    %c2_139 = arith.constant 2 : index
    %c0_140 = arith.constant 0 : index
    %c0_141 = arith.constant 0 : index
    %330 = vector.load %arg5[%c0_138, %c2_139, %c0_140, %c0_141] : memref<2x3x2x32xf32, #tpu.memory_space<vmem>>, vector<1x1x1x32xf32>
    %331 = vector.shape_cast %330 : vector<1x1x1x32xf32> to vector<1x32xf32>
    %c0_142 = arith.constant 0 : index
    %c2_143 = arith.constant 2 : index
    %c1_144 = arith.constant 1 : index
    %c0_145 = arith.constant 0 : index
    %332 = vector.load %arg5[%c0_142, %c2_143, %c1_144, %c0_145] : memref<2x3x2x32xf32, #tpu.memory_space<vmem>>, vector<1x1x1x32xf32>
    %333 = vector.shape_cast %332 : vector<1x1x1x32xf32> to vector<1x32xf32>
    %cst_146 = arith.constant dense<0.000000e+00> : vector<32xf32>
    %334 = vector.multi_reduction <add>, %329, %cst_146 [1] : vector<32x32xf32> to vector<32xf32>
    %335 = vector.shape_cast %334 : vector<32xf32> to vector<32x1xf32>
    %cst_147 = arith.constant 3.200000e+01 : f32
    %336 = vector.broadcast %cst_147 : f32 to vector<32x1xf32>
    %337 = arith.divf %335, %336 : vector<32x1xf32>
    %338 = vector.broadcast %337 : vector<32x1xf32> to vector<32x32xf32>
    %339 = arith.subf %329, %338 : vector<32x32xf32>
    %340 = arith.mulf %339, %339 : vector<32x32xf32>
    %cst_148 = arith.constant dense<0.000000e+00> : vector<32xf32>
    %341 = vector.multi_reduction <add>, %340, %cst_148 [1] : vector<32x32xf32> to vector<32xf32>
    %342 = vector.shape_cast %341 : vector<32xf32> to vector<32x1xf32>
    %cst_149 = arith.constant 3.100000e+01 : f32
    %343 = vector.broadcast %cst_149 : f32 to vector<32x1xf32>
    %344 = arith.divf %342, %343 : vector<32x1xf32>
    %345 = math.sqrt %344 : vector<32x1xf32>
    %cst_150 = arith.constant 9.99999997E-7 : f32
    %346 = vector.broadcast %cst_150 : f32 to vector<32x1xf32>
    %347 = arith.addf %345, %346 : vector<32x1xf32>
    %cst_151 = arith.constant 1.000000e+00 : f32
    %348 = vector.broadcast %cst_151 : f32 to vector<32x1xf32>
    %349 = arith.divf %348, %347 : vector<32x1xf32>
    %350 = vector.broadcast %337 : vector<32x1xf32> to vector<32x32xf32>
    %351 = arith.subf %329, %350 : vector<32x32xf32>
    %352 = vector.broadcast %331 : vector<1x32xf32> to vector<32x32xf32>
    %353 = arith.mulf %352, %351 : vector<32x32xf32>
    %354 = vector.broadcast %349 : vector<32x1xf32> to vector<32x32xf32>
    %355 = arith.mulf %353, %354 : vector<32x32xf32>
    %356 = vector.broadcast %333 : vector<1x32xf32> to vector<32x32xf32>
    %357 = arith.addf %355, %356 : vector<32x32xf32>
    %c0_152 = arith.constant 0 : index
    %c0_153 = arith.constant 0 : index
    %c1408 = arith.constant 1408 : index
    %358 = vector.load %arg3[%c0_152, %c0_153, %c1408] : memref<2x64x1664xf32, #tpu.memory_space<vmem>>, vector<1x32x64xf32>
    %359 = vector.shape_cast %358 : vector<1x32x64xf32> to vector<32x64xf32>
    %cst_154 = arith.constant dense<0.000000e+00> : vector<32x64xf32>
    %360 = tpu.matmul %357, %359, %cst_154 {dimension_numbers = #tpu.dot_dimension_numbers<[1], [0], [0], [1], [0, 0, 1, 1], [], []>} : vector<32x32xf32>, vector<32x64xf32>, vector<32x64xf32> -> vector<32x64xf32>
    %c0_155 = arith.constant 0 : index
    %c11 = arith.constant 11 : index
    %c0_156 = arith.constant 0 : index
    %361 = vector.load %arg4[%c0_155, %c11, %c0_156] : memref<2x13x128xf32, #tpu.memory_space<vmem>>, vector<1x1x64xf32>
    %362 = vector.shape_cast %361 : vector<1x1x64xf32> to vector<1x64xf32>
    %363 = vector.broadcast %362 : vector<1x64xf32> to vector<32x64xf32>
    %364 = arith.addf %360, %363 : vector<32x64xf32>
    %cst_157 = arith.constant 0.000000e+00 : f32
    %365 = vector.broadcast %cst_157 : f32 to vector<32x64xf32>
    %366 = arith.maximumf %364, %365 : vector<32x64xf32>
    %c0_158 = arith.constant 0 : index
    %c0_159 = arith.constant 0 : index
    %c1536 = arith.constant 1536 : index
    %367 = vector.load %arg3[%c0_158, %c0_159, %c1536] : memref<2x64x1664xf32, #tpu.memory_space<vmem>>, vector<1x64x32xf32>
    %368 = vector.shape_cast %367 : vector<1x64x32xf32> to vector<64x32xf32>
    %cst_160 = arith.constant dense<0.000000e+00> : vector<32x32xf32>
    %369 = tpu.matmul %366, %368, %cst_160 {dimension_numbers = #tpu.dot_dimension_numbers<[1], [0], [0], [1], [0, 0, 1, 1], [], []>} : vector<32x64xf32>, vector<64x32xf32>, vector<32x32xf32> -> vector<32x32xf32>
    %c0_161 = arith.constant 0 : index
    %c12 = arith.constant 12 : index
    %c0_162 = arith.constant 0 : index
    %370 = vector.load %arg4[%c0_161, %c12, %c0_162] : memref<2x13x128xf32, #tpu.memory_space<vmem>>, vector<1x1x32xf32>
    %371 = vector.shape_cast %370 : vector<1x1x32xf32> to vector<1x32xf32>
    %372 = vector.broadcast %371 : vector<1x32xf32> to vector<32x32xf32>
    %373 = arith.addf %369, %372 : vector<32x32xf32>
    %374 = arith.addf %329, %373 : vector<32x32xf32>
    %c1_163 = arith.constant 1 : index
    %c0_164 = arith.constant 0 : index
    %c0_165 = arith.constant 0 : index
    %c0_166 = arith.constant 0 : index
    %375 = vector.load %arg5[%c1_163, %c0_164, %c0_165, %c0_166] : memref<2x3x2x32xf32, #tpu.memory_space<vmem>>, vector<1x1x1x32xf32>
    %376 = vector.shape_cast %375 : vector<1x1x1x32xf32> to vector<1x32xf32>
    %c1_167 = arith.constant 1 : index
    %c0_168 = arith.constant 0 : index
    %c1_169 = arith.constant 1 : index
    %c0_170 = arith.constant 0 : index
    %377 = vector.load %arg5[%c1_167, %c0_168, %c1_169, %c0_170] : memref<2x3x2x32xf32, #tpu.memory_space<vmem>>, vector<1x1x1x32xf32>
    %378 = vector.shape_cast %377 : vector<1x1x1x32xf32> to vector<1x32xf32>
    %cst_171 = arith.constant dense<0.000000e+00> : vector<32xf32>
    %379 = vector.multi_reduction <add>, %374, %cst_171 [1] : vector<32x32xf32> to vector<32xf32>
    %380 = vector.shape_cast %379 : vector<32xf32> to vector<32x1xf32>
    %cst_172 = arith.constant 3.200000e+01 : f32
    %381 = vector.broadcast %cst_172 : f32 to vector<32x1xf32>
    %382 = arith.divf %380, %381 : vector<32x1xf32>
    %383 = vector.broadcast %382 : vector<32x1xf32> to vector<32x32xf32>
    %384 = arith.subf %374, %383 : vector<32x32xf32>
    %385 = arith.mulf %384, %384 : vector<32x32xf32>
    %cst_173 = arith.constant dense<0.000000e+00> : vector<32xf32>
    %386 = vector.multi_reduction <add>, %385, %cst_173 [1] : vector<32x32xf32> to vector<32xf32>
    %387 = vector.shape_cast %386 : vector<32xf32> to vector<32x1xf32>
    %cst_174 = arith.constant 3.100000e+01 : f32
    %388 = vector.broadcast %cst_174 : f32 to vector<32x1xf32>
    %389 = arith.divf %387, %388 : vector<32x1xf32>
    %390 = math.sqrt %389 : vector<32x1xf32>
    %cst_175 = arith.constant 9.99999997E-7 : f32
    %391 = vector.broadcast %cst_175 : f32 to vector<32x1xf32>
    %392 = arith.addf %390, %391 : vector<32x1xf32>
    %cst_176 = arith.constant 1.000000e+00 : f32
    %393 = vector.broadcast %cst_176 : f32 to vector<32x1xf32>
    %394 = arith.divf %393, %392 : vector<32x1xf32>
    %395 = vector.broadcast %382 : vector<32x1xf32> to vector<32x32xf32>
    %396 = arith.subf %374, %395 : vector<32x32xf32>
    %397 = vector.broadcast %376 : vector<1x32xf32> to vector<32x32xf32>
    %398 = arith.mulf %397, %396 : vector<32x32xf32>
    %399 = vector.broadcast %394 : vector<32x1xf32> to vector<32x32xf32>
    %400 = arith.mulf %398, %399 : vector<32x32xf32>
    %401 = vector.broadcast %378 : vector<1x32xf32> to vector<32x32xf32>
    %402 = arith.addf %400, %401 : vector<32x32xf32>
    %c1_177 = arith.constant 1 : index
    %c0_178 = arith.constant 0 : index
    %c0_179 = arith.constant 0 : index
    %403 = vector.load %arg3[%c1_177, %c0_178, %c0_179] : memref<2x64x1664xf32, #tpu.memory_space<vmem>>, vector<1x32x32xf32>
    %404 = vector.shape_cast %403 : vector<1x32x32xf32> to vector<32x32xf32>
    %cst_180 = arith.constant dense<0.000000e+00> : vector<32x32xf32>
    %405 = tpu.matmul %402, %404, %cst_180 {dimension_numbers = #tpu.dot_dimension_numbers<[1], [0], [0], [1], [0, 0, 1, 1], [], []>} : vector<32x32xf32>, vector<32x32xf32>, vector<32x32xf32> -> vector<32x32xf32>
    %c1_181 = arith.constant 1 : index
    %c0_182 = arith.constant 0 : index
    %c0_183 = arith.constant 0 : index
    %406 = vector.load %arg4[%c1_181, %c0_182, %c0_183] : memref<2x13x128xf32, #tpu.memory_space<vmem>>, vector<1x1x32xf32>
    %407 = vector.shape_cast %406 : vector<1x1x32xf32> to vector<1x32xf32>
    %408 = vector.broadcast %407 : vector<1x32xf32> to vector<32x32xf32>
    %409 = arith.addf %405, %408 : vector<32x32xf32>
    %c1_184 = arith.constant 1 : index
    %c0_185 = arith.constant 0 : index
    %c384_186 = arith.constant 384 : index
    %410 = vector.load %arg3[%c1_184, %c0_185, %c384_186] : memref<2x64x1664xf32, #tpu.memory_space<vmem>>, vector<1x32x32xf32>
    %411 = vector.shape_cast %410 : vector<1x32x32xf32> to vector<32x32xf32>
    %cst_187 = arith.constant dense<0.000000e+00> : vector<32x32xf32>
    %412 = tpu.matmul %402, %411, %cst_187 {dimension_numbers = #tpu.dot_dimension_numbers<[1], [0], [0], [1], [0, 0, 1, 1], [], []>} : vector<32x32xf32>, vector<32x32xf32>, vector<32x32xf32> -> vector<32x32xf32>
    %c1_188 = arith.constant 1 : index
    %c3_189 = arith.constant 3 : index
    %c0_190 = arith.constant 0 : index
    %413 = vector.load %arg4[%c1_188, %c3_189, %c0_190] : memref<2x13x128xf32, #tpu.memory_space<vmem>>, vector<1x1x32xf32>
    %414 = vector.shape_cast %413 : vector<1x1x32xf32> to vector<1x32xf32>
    %415 = vector.broadcast %414 : vector<1x32xf32> to vector<32x32xf32>
    %416 = arith.addf %412, %415 : vector<32x32xf32>
    %417 = arith.select %3, %409, %416 : vector<32x32xi1>, vector<32x32xf32>
    %c1_191 = arith.constant 1 : index
    %c0_192 = arith.constant 0 : index
    %c128_193 = arith.constant 128 : index
    %418 = vector.load %arg3[%c1_191, %c0_192, %c128_193] : memref<2x64x1664xf32, #tpu.memory_space<vmem>>, vector<1x32x32xf32>
    %419 = vector.shape_cast %418 : vector<1x32x32xf32> to vector<32x32xf32>
    %cst_194 = arith.constant dense<0.000000e+00> : vector<32x32xf32>
    %420 = tpu.matmul %402, %419, %cst_194 {dimension_numbers = #tpu.dot_dimension_numbers<[1], [0], [0], [1], [0, 0, 1, 1], [], []>} : vector<32x32xf32>, vector<32x32xf32>, vector<32x32xf32> -> vector<32x32xf32>
    %c1_195 = arith.constant 1 : index
    %c1_196 = arith.constant 1 : index
    %c0_197 = arith.constant 0 : index
    %421 = vector.load %arg4[%c1_195, %c1_196, %c0_197] : memref<2x13x128xf32, #tpu.memory_space<vmem>>, vector<1x1x32xf32>
    %422 = vector.shape_cast %421 : vector<1x1x32xf32> to vector<1x32xf32>
    %423 = vector.broadcast %422 : vector<1x32xf32> to vector<32x32xf32>
    %424 = arith.addf %420, %423 : vector<32x32xf32>
    %c1_198 = arith.constant 1 : index
    %c0_199 = arith.constant 0 : index
    %c512_200 = arith.constant 512 : index
    %425 = vector.load %arg3[%c1_198, %c0_199, %c512_200] : memref<2x64x1664xf32, #tpu.memory_space<vmem>>, vector<1x32x32xf32>
    %426 = vector.shape_cast %425 : vector<1x32x32xf32> to vector<32x32xf32>
    %cst_201 = arith.constant dense<0.000000e+00> : vector<32x32xf32>
    %427 = tpu.matmul %402, %426, %cst_201 {dimension_numbers = #tpu.dot_dimension_numbers<[1], [0], [0], [1], [0, 0, 1, 1], [], []>} : vector<32x32xf32>, vector<32x32xf32>, vector<32x32xf32> -> vector<32x32xf32>
    %c1_202 = arith.constant 1 : index
    %c4_203 = arith.constant 4 : index
    %c0_204 = arith.constant 0 : index
    %428 = vector.load %arg4[%c1_202, %c4_203, %c0_204] : memref<2x13x128xf32, #tpu.memory_space<vmem>>, vector<1x1x32xf32>
    %429 = vector.shape_cast %428 : vector<1x1x32xf32> to vector<1x32xf32>
    %430 = vector.broadcast %429 : vector<1x32xf32> to vector<32x32xf32>
    %431 = arith.addf %427, %430 : vector<32x32xf32>
    %432 = arith.select %3, %424, %431 : vector<32x32xi1>, vector<32x32xf32>
    %c1_205 = arith.constant 1 : index
    %c0_206 = arith.constant 0 : index
    %c256_207 = arith.constant 256 : index
    %433 = vector.load %arg3[%c1_205, %c0_206, %c256_207] : memref<2x64x1664xf32, #tpu.memory_space<vmem>>, vector<1x32x32xf32>
    %434 = vector.shape_cast %433 : vector<1x32x32xf32> to vector<32x32xf32>
    %cst_208 = arith.constant dense<0.000000e+00> : vector<32x32xf32>
    %435 = tpu.matmul %402, %434, %cst_208 {dimension_numbers = #tpu.dot_dimension_numbers<[1], [0], [0], [1], [0, 0, 1, 1], [], []>} : vector<32x32xf32>, vector<32x32xf32>, vector<32x32xf32> -> vector<32x32xf32>
    %c1_209 = arith.constant 1 : index
    %c2_210 = arith.constant 2 : index
    %c0_211 = arith.constant 0 : index
    %436 = vector.load %arg4[%c1_209, %c2_210, %c0_211] : memref<2x13x128xf32, #tpu.memory_space<vmem>>, vector<1x1x32xf32>
    %437 = vector.shape_cast %436 : vector<1x1x32xf32> to vector<1x32xf32>
    %438 = vector.broadcast %437 : vector<1x32xf32> to vector<32x32xf32>
    %439 = arith.addf %435, %438 : vector<32x32xf32>
    %c1_212 = arith.constant 1 : index
    %c0_213 = arith.constant 0 : index
    %c640_214 = arith.constant 640 : index
    %440 = vector.load %arg3[%c1_212, %c0_213, %c640_214] : memref<2x64x1664xf32, #tpu.memory_space<vmem>>, vector<1x32x32xf32>
    %441 = vector.shape_cast %440 : vector<1x32x32xf32> to vector<32x32xf32>
    %cst_215 = arith.constant dense<0.000000e+00> : vector<32x32xf32>
    %442 = tpu.matmul %402, %441, %cst_215 {dimension_numbers = #tpu.dot_dimension_numbers<[1], [0], [0], [1], [0, 0, 1, 1], [], []>} : vector<32x32xf32>, vector<32x32xf32>, vector<32x32xf32> -> vector<32x32xf32>
    %c1_216 = arith.constant 1 : index
    %c5_217 = arith.constant 5 : index
    %c0_218 = arith.constant 0 : index
    %443 = vector.load %arg4[%c1_216, %c5_217, %c0_218] : memref<2x13x128xf32, #tpu.memory_space<vmem>>, vector<1x1x32xf32>
    %444 = vector.shape_cast %443 : vector<1x1x32xf32> to vector<1x32xf32>
    %445 = vector.broadcast %444 : vector<1x32xf32> to vector<32x32xf32>
    %446 = arith.addf %442, %445 : vector<32x32xf32>
    %447 = arith.select %3, %439, %446 : vector<32x32xi1>, vector<32x32xf32>
    %448 = vector.shape_cast %432 : vector<32x32xf32> to vector<2x16x32xf32>
    %449 = vector.shape_cast %447 : vector<32x32xf32> to vector<2x16x32xf32>
    %cst_219 = arith.constant 0.353553385 : f32
    %450 = vector.broadcast %cst_219 : f32 to vector<32x32xf32>
    %451 = arith.mulf %417, %450 : vector<32x32xf32>
    %452 = vector.shape_cast %451 : vector<32x32xf32> to vector<2x16x32xf32>
    %453 = vector.broadcast %12 : vector<1x1x32xf32> to vector<2x16x32xf32>
    %454 = arith.mulf %452, %453 : vector<2x16x32xf32>
    "tpu.trace_start"() <{level = 10 : i32, message = "bqd,bkd->bqk"}> : () -> ()
    %cst_220 = arith.constant dense<0.000000e+00> : vector<2x16x16xf32>
    %455 = tpu.matmul %454, %448, %cst_220 {dimension_numbers = #tpu.dot_dimension_numbers<[2], [2], [1], [1], [0, 0, 0, 1, 1, 1], [0], [0]>} : vector<2x16x32xf32>, vector<2x16x32xf32>, vector<2x16x16xf32> -> vector<2x16x16xf32>
    "tpu.trace_stop"() : () -> ()
    %456 = arith.addf %455, %41 : vector<2x16x16xf32>
    %cst_221 = arith.constant dense<0xFF800000> : vector<2x16xf32>
    %457 = vector.multi_reduction <maximumf>, %456, %cst_221 [2] : vector<2x16x16xf32> to vector<2x16xf32>
    %458 = vector.shape_cast %457 : vector<2x16xf32> to vector<2x16x1xf32>
    %459 = vector.broadcast %458 : vector<2x16x1xf32> to vector<2x16x16xf32>
    %460 = arith.subf %456, %459 : vector<2x16x16xf32>
    %461 = math.exp %460 : vector<2x16x16xf32>
    %cst_222 = arith.constant dense<0.000000e+00> : vector<2x16xf32>
    %462 = vector.multi_reduction <add>, %461, %cst_222 [2] : vector<2x16x16xf32> to vector<2x16xf32>
    %463 = vector.shape_cast %462 : vector<2x16xf32> to vector<2x16x1xf32>
    %464 = tpu.reciprocal %463 {approx = true} : vector<2x16x1xf32> -> vector<2x16x1xf32>
    %465 = vector.broadcast %464 : vector<2x16x1xf32> to vector<2x16x16xf32>
    %466 = arith.mulf %461, %465 : vector<2x16x16xf32>
    %467 = vector.broadcast %12 : vector<1x1x32xf32> to vector<2x16x32xf32>
    %468 = arith.mulf %449, %467 : vector<2x16x32xf32>
    "tpu.trace_start"() <{level = 10 : i32, message = "bqk,bkd->bqd"}> : () -> ()
    %cst_223 = arith.constant dense<0.000000e+00> : vector<2x16x32xf32>
    %469 = tpu.matmul %466, %468, %cst_223 {dimension_numbers = #tpu.dot_dimension_numbers<[2], [1], [1], [2], [0, 0, 0, 1, 1, 2], [0], [0]>} : vector<2x16x16xf32>, vector<2x16x32xf32>, vector<2x16x32xf32> -> vector<2x16x32xf32>
    "tpu.trace_stop"() : () -> ()
    %470 = vector.broadcast %20 : vector<1x1x32xf32> to vector<2x16x32xf32>
    %471 = arith.mulf %452, %470 : vector<2x16x32xf32>
    "tpu.trace_start"() <{level = 10 : i32, message = "bqd,bkd->bqk"}> : () -> ()
    %cst_224 = arith.constant dense<0.000000e+00> : vector<2x16x16xf32>
    %472 = tpu.matmul %471, %448, %cst_224 {dimension_numbers = #tpu.dot_dimension_numbers<[2], [2], [1], [1], [0, 0, 0, 1, 1, 1], [0], [0]>} : vector<2x16x32xf32>, vector<2x16x32xf32>, vector<2x16x16xf32> -> vector<2x16x16xf32>
    "tpu.trace_stop"() : () -> ()
    %473 = arith.addf %472, %41 : vector<2x16x16xf32>
    %cst_225 = arith.constant dense<0xFF800000> : vector<2x16xf32>
    %474 = vector.multi_reduction <maximumf>, %473, %cst_225 [2] : vector<2x16x16xf32> to vector<2x16xf32>
    %475 = vector.shape_cast %474 : vector<2x16xf32> to vector<2x16x1xf32>
    %476 = vector.broadcast %475 : vector<2x16x1xf32> to vector<2x16x16xf32>
    %477 = arith.subf %473, %476 : vector<2x16x16xf32>
    %478 = math.exp %477 : vector<2x16x16xf32>
    %cst_226 = arith.constant dense<0.000000e+00> : vector<2x16xf32>
    %479 = vector.multi_reduction <add>, %478, %cst_226 [2] : vector<2x16x16xf32> to vector<2x16xf32>
    %480 = vector.shape_cast %479 : vector<2x16xf32> to vector<2x16x1xf32>
    %481 = tpu.reciprocal %480 {approx = true} : vector<2x16x1xf32> -> vector<2x16x1xf32>
    %482 = vector.broadcast %481 : vector<2x16x1xf32> to vector<2x16x16xf32>
    %483 = arith.mulf %478, %482 : vector<2x16x16xf32>
    %484 = vector.broadcast %20 : vector<1x1x32xf32> to vector<2x16x32xf32>
    %485 = arith.mulf %449, %484 : vector<2x16x32xf32>
    "tpu.trace_start"() <{level = 10 : i32, message = "bqk,bkd->bqd"}> : () -> ()
    %cst_227 = arith.constant dense<0.000000e+00> : vector<2x16x32xf32>
    %486 = tpu.matmul %483, %485, %cst_227 {dimension_numbers = #tpu.dot_dimension_numbers<[2], [1], [1], [2], [0, 0, 0, 1, 1, 2], [0], [0]>} : vector<2x16x16xf32>, vector<2x16x32xf32>, vector<2x16x32xf32> -> vector<2x16x32xf32>
    "tpu.trace_stop"() : () -> ()
    %487 = arith.addf %469, %486 : vector<2x16x32xf32>
    %488 = vector.broadcast %28 : vector<1x1x32xf32> to vector<2x16x32xf32>
    %489 = arith.mulf %452, %488 : vector<2x16x32xf32>
    "tpu.trace_start"() <{level = 10 : i32, message = "bqd,bkd->bqk"}> : () -> ()
    %cst_228 = arith.constant dense<0.000000e+00> : vector<2x16x16xf32>
    %490 = tpu.matmul %489, %448, %cst_228 {dimension_numbers = #tpu.dot_dimension_numbers<[2], [2], [1], [1], [0, 0, 0, 1, 1, 1], [0], [0]>} : vector<2x16x32xf32>, vector<2x16x32xf32>, vector<2x16x16xf32> -> vector<2x16x16xf32>
    "tpu.trace_stop"() : () -> ()
    %491 = arith.addf %490, %41 : vector<2x16x16xf32>
    %cst_229 = arith.constant dense<0xFF800000> : vector<2x16xf32>
    %492 = vector.multi_reduction <maximumf>, %491, %cst_229 [2] : vector<2x16x16xf32> to vector<2x16xf32>
    %493 = vector.shape_cast %492 : vector<2x16xf32> to vector<2x16x1xf32>
    %494 = vector.broadcast %493 : vector<2x16x1xf32> to vector<2x16x16xf32>
    %495 = arith.subf %491, %494 : vector<2x16x16xf32>
    %496 = math.exp %495 : vector<2x16x16xf32>
    %cst_230 = arith.constant dense<0.000000e+00> : vector<2x16xf32>
    %497 = vector.multi_reduction <add>, %496, %cst_230 [2] : vector<2x16x16xf32> to vector<2x16xf32>
    %498 = vector.shape_cast %497 : vector<2x16xf32> to vector<2x16x1xf32>
    %499 = tpu.reciprocal %498 {approx = true} : vector<2x16x1xf32> -> vector<2x16x1xf32>
    %500 = vector.broadcast %499 : vector<2x16x1xf32> to vector<2x16x16xf32>
    %501 = arith.mulf %496, %500 : vector<2x16x16xf32>
    %502 = vector.broadcast %28 : vector<1x1x32xf32> to vector<2x16x32xf32>
    %503 = arith.mulf %449, %502 : vector<2x16x32xf32>
    "tpu.trace_start"() <{level = 10 : i32, message = "bqk,bkd->bqd"}> : () -> ()
    %cst_231 = arith.constant dense<0.000000e+00> : vector<2x16x32xf32>
    %504 = tpu.matmul %501, %503, %cst_231 {dimension_numbers = #tpu.dot_dimension_numbers<[2], [1], [1], [2], [0, 0, 0, 1, 1, 2], [0], [0]>} : vector<2x16x16xf32>, vector<2x16x32xf32>, vector<2x16x32xf32> -> vector<2x16x32xf32>
    "tpu.trace_stop"() : () -> ()
    %505 = arith.addf %487, %504 : vector<2x16x32xf32>
    %506 = vector.broadcast %36 : vector<1x1x32xf32> to vector<2x16x32xf32>
    %507 = arith.mulf %452, %506 : vector<2x16x32xf32>
    "tpu.trace_start"() <{level = 10 : i32, message = "bqd,bkd->bqk"}> : () -> ()
    %cst_232 = arith.constant dense<0.000000e+00> : vector<2x16x16xf32>
    %508 = tpu.matmul %507, %448, %cst_232 {dimension_numbers = #tpu.dot_dimension_numbers<[2], [2], [1], [1], [0, 0, 0, 1, 1, 1], [0], [0]>} : vector<2x16x32xf32>, vector<2x16x32xf32>, vector<2x16x16xf32> -> vector<2x16x16xf32>
    "tpu.trace_stop"() : () -> ()
    %509 = arith.addf %508, %41 : vector<2x16x16xf32>
    %cst_233 = arith.constant dense<0xFF800000> : vector<2x16xf32>
    %510 = vector.multi_reduction <maximumf>, %509, %cst_233 [2] : vector<2x16x16xf32> to vector<2x16xf32>
    %511 = vector.shape_cast %510 : vector<2x16xf32> to vector<2x16x1xf32>
    %512 = vector.broadcast %511 : vector<2x16x1xf32> to vector<2x16x16xf32>
    %513 = arith.subf %509, %512 : vector<2x16x16xf32>
    %514 = math.exp %513 : vector<2x16x16xf32>
    %cst_234 = arith.constant dense<0.000000e+00> : vector<2x16xf32>
    %515 = vector.multi_reduction <add>, %514, %cst_234 [2] : vector<2x16x16xf32> to vector<2x16xf32>
    %516 = vector.shape_cast %515 : vector<2x16xf32> to vector<2x16x1xf32>
    %517 = tpu.reciprocal %516 {approx = true} : vector<2x16x1xf32> -> vector<2x16x1xf32>
    %518 = vector.broadcast %517 : vector<2x16x1xf32> to vector<2x16x16xf32>
    %519 = arith.mulf %514, %518 : vector<2x16x16xf32>
    %520 = vector.broadcast %36 : vector<1x1x32xf32> to vector<2x16x32xf32>
    %521 = arith.mulf %449, %520 : vector<2x16x32xf32>
    "tpu.trace_start"() <{level = 10 : i32, message = "bqk,bkd->bqd"}> : () -> ()
    %cst_235 = arith.constant dense<0.000000e+00> : vector<2x16x32xf32>
    %522 = tpu.matmul %519, %521, %cst_235 {dimension_numbers = #tpu.dot_dimension_numbers<[2], [1], [1], [2], [0, 0, 0, 1, 1, 2], [0], [0]>} : vector<2x16x16xf32>, vector<2x16x32xf32>, vector<2x16x32xf32> -> vector<2x16x32xf32>
    "tpu.trace_stop"() : () -> ()
    %523 = arith.addf %505, %522 : vector<2x16x32xf32>
    %524 = vector.shape_cast %523 : vector<2x16x32xf32> to vector<32x32xf32>
    %c1_236 = arith.constant 1 : index
    %c0_237 = arith.constant 0 : index
    %c768_238 = arith.constant 768 : index
    %525 = vector.load %arg3[%c1_236, %c0_237, %c768_238] : memref<2x64x1664xf32, #tpu.memory_space<vmem>>, vector<1x32x32xf32>
    %526 = vector.shape_cast %525 : vector<1x32x32xf32> to vector<32x32xf32>
    %cst_239 = arith.constant dense<0.000000e+00> : vector<32x32xf32>
    %527 = tpu.matmul %524, %526, %cst_239 {dimension_numbers = #tpu.dot_dimension_numbers<[1], [0], [0], [1], [0, 0, 1, 1], [], []>} : vector<32x32xf32>, vector<32x32xf32>, vector<32x32xf32> -> vector<32x32xf32>
    %c1_240 = arith.constant 1 : index
    %c6_241 = arith.constant 6 : index
    %c0_242 = arith.constant 0 : index
    %528 = vector.load %arg4[%c1_240, %c6_241, %c0_242] : memref<2x13x128xf32, #tpu.memory_space<vmem>>, vector<1x1x32xf32>
    %529 = vector.shape_cast %528 : vector<1x1x32xf32> to vector<1x32xf32>
    %530 = vector.broadcast %529 : vector<1x32xf32> to vector<32x32xf32>
    %531 = arith.addf %527, %530 : vector<32x32xf32>
    %532 = arith.addf %374, %531 : vector<32x32xf32>
    %c1_243 = arith.constant 1 : index
    %c1_244 = arith.constant 1 : index
    %c0_245 = arith.constant 0 : index
    %c0_246 = arith.constant 0 : index
    %533 = vector.load %arg5[%c1_243, %c1_244, %c0_245, %c0_246] : memref<2x3x2x32xf32, #tpu.memory_space<vmem>>, vector<1x1x1x32xf32>
    %534 = vector.shape_cast %533 : vector<1x1x1x32xf32> to vector<1x32xf32>
    %c1_247 = arith.constant 1 : index
    %c1_248 = arith.constant 1 : index
    %c1_249 = arith.constant 1 : index
    %c0_250 = arith.constant 0 : index
    %535 = vector.load %arg5[%c1_247, %c1_248, %c1_249, %c0_250] : memref<2x3x2x32xf32, #tpu.memory_space<vmem>>, vector<1x1x1x32xf32>
    %536 = vector.shape_cast %535 : vector<1x1x1x32xf32> to vector<1x32xf32>
    %cst_251 = arith.constant dense<0.000000e+00> : vector<32xf32>
    %537 = vector.multi_reduction <add>, %532, %cst_251 [1] : vector<32x32xf32> to vector<32xf32>
    %538 = vector.shape_cast %537 : vector<32xf32> to vector<32x1xf32>
    %cst_252 = arith.constant 3.200000e+01 : f32
    %539 = vector.broadcast %cst_252 : f32 to vector<32x1xf32>
    %540 = arith.divf %538, %539 : vector<32x1xf32>
    %541 = vector.broadcast %540 : vector<32x1xf32> to vector<32x32xf32>
    %542 = arith.subf %532, %541 : vector<32x32xf32>
    %543 = arith.mulf %542, %542 : vector<32x32xf32>
    %cst_253 = arith.constant dense<0.000000e+00> : vector<32xf32>
    %544 = vector.multi_reduction <add>, %543, %cst_253 [1] : vector<32x32xf32> to vector<32xf32>
    %545 = vector.shape_cast %544 : vector<32xf32> to vector<32x1xf32>
    %cst_254 = arith.constant 3.100000e+01 : f32
    %546 = vector.broadcast %cst_254 : f32 to vector<32x1xf32>
    %547 = arith.divf %545, %546 : vector<32x1xf32>
    %548 = math.sqrt %547 : vector<32x1xf32>
    %cst_255 = arith.constant 9.99999997E-7 : f32
    %549 = vector.broadcast %cst_255 : f32 to vector<32x1xf32>
    %550 = arith.addf %548, %549 : vector<32x1xf32>
    %cst_256 = arith.constant 1.000000e+00 : f32
    %551 = vector.broadcast %cst_256 : f32 to vector<32x1xf32>
    %552 = arith.divf %551, %550 : vector<32x1xf32>
    %553 = vector.broadcast %540 : vector<32x1xf32> to vector<32x32xf32>
    %554 = arith.subf %532, %553 : vector<32x32xf32>
    %555 = vector.broadcast %534 : vector<1x32xf32> to vector<32x32xf32>
    %556 = arith.mulf %555, %554 : vector<32x32xf32>
    %557 = vector.broadcast %552 : vector<32x1xf32> to vector<32x32xf32>
    %558 = arith.mulf %556, %557 : vector<32x32xf32>
    %559 = vector.broadcast %536 : vector<1x32xf32> to vector<32x32xf32>
    %560 = arith.addf %558, %559 : vector<32x32xf32>
    %c1_257 = arith.constant 1 : index
    %c0_258 = arith.constant 0 : index
    %c896_259 = arith.constant 896 : index
    %561 = vector.load %arg3[%c1_257, %c0_258, %c896_259] : memref<2x64x1664xf32, #tpu.memory_space<vmem>>, vector<1x32x32xf32>
    %562 = vector.shape_cast %561 : vector<1x32x32xf32> to vector<32x32xf32>
    %cst_260 = arith.constant dense<0.000000e+00> : vector<32x32xf32>
    %563 = tpu.matmul %560, %562, %cst_260 {dimension_numbers = #tpu.dot_dimension_numbers<[1], [0], [0], [1], [0, 0, 1, 1], [], []>} : vector<32x32xf32>, vector<32x32xf32>, vector<32x32xf32> -> vector<32x32xf32>
    %c1_261 = arith.constant 1 : index
    %c7_262 = arith.constant 7 : index
    %c0_263 = arith.constant 0 : index
    %564 = vector.load %arg4[%c1_261, %c7_262, %c0_263] : memref<2x13x128xf32, #tpu.memory_space<vmem>>, vector<1x1x32xf32>
    %565 = vector.shape_cast %564 : vector<1x1x32xf32> to vector<1x32xf32>
    %566 = vector.broadcast %565 : vector<1x32xf32> to vector<32x32xf32>
    %567 = arith.addf %563, %566 : vector<32x32xf32>
    %c1_264 = arith.constant 1 : index
    %c0_265 = arith.constant 0 : index
    %c1024_266 = arith.constant 1024 : index
    %568 = vector.load %arg3[%c1_264, %c0_265, %c1024_266] : memref<2x64x1664xf32, #tpu.memory_space<vmem>>, vector<1x32x32xf32>
    %569 = vector.shape_cast %568 : vector<1x32x32xf32> to vector<32x32xf32>
    %cst_267 = arith.constant dense<0.000000e+00> : vector<16x32xf32>
    %570 = tpu.matmul %40, %569, %cst_267 {dimension_numbers = #tpu.dot_dimension_numbers<[1], [0], [0], [1], [0, 0, 1, 1], [], []>} : vector<16x32xf32>, vector<32x32xf32>, vector<16x32xf32> -> vector<16x32xf32>
    %c1_268 = arith.constant 1 : index
    %c8_269 = arith.constant 8 : index
    %c0_270 = arith.constant 0 : index
    %571 = vector.load %arg4[%c1_268, %c8_269, %c0_270] : memref<2x13x128xf32, #tpu.memory_space<vmem>>, vector<1x1x32xf32>
    %572 = vector.shape_cast %571 : vector<1x1x32xf32> to vector<1x32xf32>
    %573 = vector.broadcast %572 : vector<1x32xf32> to vector<16x32xf32>
    %574 = arith.addf %570, %573 : vector<16x32xf32>
    %575 = vector.shape_cast %574 : vector<16x32xf32> to vector<2x8x32xf32>
    %c1_271 = arith.constant 1 : index
    %c0_272 = arith.constant 0 : index
    %c1152_273 = arith.constant 1152 : index
    %576 = vector.load %arg3[%c1_271, %c0_272, %c1152_273] : memref<2x64x1664xf32, #tpu.memory_space<vmem>>, vector<1x32x32xf32>
    %577 = vector.shape_cast %576 : vector<1x32x32xf32> to vector<32x32xf32>
    %cst_274 = arith.constant dense<0.000000e+00> : vector<16x32xf32>
    %578 = tpu.matmul %40, %577, %cst_274 {dimension_numbers = #tpu.dot_dimension_numbers<[1], [0], [0], [1], [0, 0, 1, 1], [], []>} : vector<16x32xf32>, vector<32x32xf32>, vector<16x32xf32> -> vector<16x32xf32>
    %c1_275 = arith.constant 1 : index
    %c9_276 = arith.constant 9 : index
    %c0_277 = arith.constant 0 : index
    %579 = vector.load %arg4[%c1_275, %c9_276, %c0_277] : memref<2x13x128xf32, #tpu.memory_space<vmem>>, vector<1x1x32xf32>
    %580 = vector.shape_cast %579 : vector<1x1x32xf32> to vector<1x32xf32>
    %581 = vector.broadcast %580 : vector<1x32xf32> to vector<16x32xf32>
    %582 = arith.addf %578, %581 : vector<16x32xf32>
    %583 = vector.shape_cast %582 : vector<16x32xf32> to vector<2x8x32xf32>
    %cst_278 = arith.constant 0.353553385 : f32
    %584 = vector.broadcast %cst_278 : f32 to vector<32x32xf32>
    %585 = arith.mulf %567, %584 : vector<32x32xf32>
    %586 = vector.shape_cast %585 : vector<32x32xf32> to vector<2x16x32xf32>
    %587 = vector.broadcast %12 : vector<1x1x32xf32> to vector<2x16x32xf32>
    %588 = arith.mulf %586, %587 : vector<2x16x32xf32>
    "tpu.trace_start"() <{level = 10 : i32, message = "bqd,bkd->bqk"}> : () -> ()
    %cst_279 = arith.constant dense<0.000000e+00> : vector<2x16x8xf32>
    %589 = tpu.matmul %588, %575, %cst_279 {dimension_numbers = #tpu.dot_dimension_numbers<[2], [2], [1], [1], [0, 0, 0, 1, 1, 1], [0], [0]>} : vector<2x16x32xf32>, vector<2x8x32xf32>, vector<2x16x8xf32> -> vector<2x16x8xf32>
    "tpu.trace_stop"() : () -> ()
    %cst_280 = arith.constant dense<0xFF800000> : vector<2x16xf32>
    %590 = vector.multi_reduction <maximumf>, %589, %cst_280 [2] : vector<2x16x8xf32> to vector<2x16xf32>
    %591 = vector.shape_cast %590 : vector<2x16xf32> to vector<2x16x1xf32>
    %592 = vector.broadcast %591 : vector<2x16x1xf32> to vector<2x16x8xf32>
    %593 = arith.subf %589, %592 : vector<2x16x8xf32>
    %594 = math.exp %593 : vector<2x16x8xf32>
    %cst_281 = arith.constant dense<0.000000e+00> : vector<2x16xf32>
    %595 = vector.multi_reduction <add>, %594, %cst_281 [2] : vector<2x16x8xf32> to vector<2x16xf32>
    %596 = vector.shape_cast %595 : vector<2x16xf32> to vector<2x16x1xf32>
    %597 = tpu.reciprocal %596 {approx = true} : vector<2x16x1xf32> -> vector<2x16x1xf32>
    %598 = vector.broadcast %597 : vector<2x16x1xf32> to vector<2x16x8xf32>
    %599 = arith.mulf %594, %598 : vector<2x16x8xf32>
    %600 = vector.broadcast %12 : vector<1x1x32xf32> to vector<2x8x32xf32>
    %601 = arith.mulf %583, %600 : vector<2x8x32xf32>
    "tpu.trace_start"() <{level = 10 : i32, message = "bqk,bkd->bqd"}> : () -> ()
    %cst_282 = arith.constant dense<0.000000e+00> : vector<2x16x32xf32>
    %602 = tpu.matmul %599, %601, %cst_282 {dimension_numbers = #tpu.dot_dimension_numbers<[2], [1], [1], [2], [0, 0, 0, 1, 1, 2], [0], [0]>} : vector<2x16x8xf32>, vector<2x8x32xf32>, vector<2x16x32xf32> -> vector<2x16x32xf32>
    "tpu.trace_stop"() : () -> ()
    %603 = vector.broadcast %20 : vector<1x1x32xf32> to vector<2x16x32xf32>
    %604 = arith.mulf %586, %603 : vector<2x16x32xf32>
    "tpu.trace_start"() <{level = 10 : i32, message = "bqd,bkd->bqk"}> : () -> ()
    %cst_283 = arith.constant dense<0.000000e+00> : vector<2x16x8xf32>
    %605 = tpu.matmul %604, %575, %cst_283 {dimension_numbers = #tpu.dot_dimension_numbers<[2], [2], [1], [1], [0, 0, 0, 1, 1, 1], [0], [0]>} : vector<2x16x32xf32>, vector<2x8x32xf32>, vector<2x16x8xf32> -> vector<2x16x8xf32>
    "tpu.trace_stop"() : () -> ()
    %cst_284 = arith.constant dense<0xFF800000> : vector<2x16xf32>
    %606 = vector.multi_reduction <maximumf>, %605, %cst_284 [2] : vector<2x16x8xf32> to vector<2x16xf32>
    %607 = vector.shape_cast %606 : vector<2x16xf32> to vector<2x16x1xf32>
    %608 = vector.broadcast %607 : vector<2x16x1xf32> to vector<2x16x8xf32>
    %609 = arith.subf %605, %608 : vector<2x16x8xf32>
    %610 = math.exp %609 : vector<2x16x8xf32>
    %cst_285 = arith.constant dense<0.000000e+00> : vector<2x16xf32>
    %611 = vector.multi_reduction <add>, %610, %cst_285 [2] : vector<2x16x8xf32> to vector<2x16xf32>
    %612 = vector.shape_cast %611 : vector<2x16xf32> to vector<2x16x1xf32>
    %613 = tpu.reciprocal %612 {approx = true} : vector<2x16x1xf32> -> vector<2x16x1xf32>
    %614 = vector.broadcast %613 : vector<2x16x1xf32> to vector<2x16x8xf32>
    %615 = arith.mulf %610, %614 : vector<2x16x8xf32>
    %616 = vector.broadcast %20 : vector<1x1x32xf32> to vector<2x8x32xf32>
    %617 = arith.mulf %583, %616 : vector<2x8x32xf32>
    "tpu.trace_start"() <{level = 10 : i32, message = "bqk,bkd->bqd"}> : () -> ()
    %cst_286 = arith.constant dense<0.000000e+00> : vector<2x16x32xf32>
    %618 = tpu.matmul %615, %617, %cst_286 {dimension_numbers = #tpu.dot_dimension_numbers<[2], [1], [1], [2], [0, 0, 0, 1, 1, 2], [0], [0]>} : vector<2x16x8xf32>, vector<2x8x32xf32>, vector<2x16x32xf32> -> vector<2x16x32xf32>
    "tpu.trace_stop"() : () -> ()
    %619 = arith.addf %602, %618 : vector<2x16x32xf32>
    %620 = vector.broadcast %28 : vector<1x1x32xf32> to vector<2x16x32xf32>
    %621 = arith.mulf %586, %620 : vector<2x16x32xf32>
    "tpu.trace_start"() <{level = 10 : i32, message = "bqd,bkd->bqk"}> : () -> ()
    %cst_287 = arith.constant dense<0.000000e+00> : vector<2x16x8xf32>
    %622 = tpu.matmul %621, %575, %cst_287 {dimension_numbers = #tpu.dot_dimension_numbers<[2], [2], [1], [1], [0, 0, 0, 1, 1, 1], [0], [0]>} : vector<2x16x32xf32>, vector<2x8x32xf32>, vector<2x16x8xf32> -> vector<2x16x8xf32>
    "tpu.trace_stop"() : () -> ()
    %cst_288 = arith.constant dense<0xFF800000> : vector<2x16xf32>
    %623 = vector.multi_reduction <maximumf>, %622, %cst_288 [2] : vector<2x16x8xf32> to vector<2x16xf32>
    %624 = vector.shape_cast %623 : vector<2x16xf32> to vector<2x16x1xf32>
    %625 = vector.broadcast %624 : vector<2x16x1xf32> to vector<2x16x8xf32>
    %626 = arith.subf %622, %625 : vector<2x16x8xf32>
    %627 = math.exp %626 : vector<2x16x8xf32>
    %cst_289 = arith.constant dense<0.000000e+00> : vector<2x16xf32>
    %628 = vector.multi_reduction <add>, %627, %cst_289 [2] : vector<2x16x8xf32> to vector<2x16xf32>
    %629 = vector.shape_cast %628 : vector<2x16xf32> to vector<2x16x1xf32>
    %630 = tpu.reciprocal %629 {approx = true} : vector<2x16x1xf32> -> vector<2x16x1xf32>
    %631 = vector.broadcast %630 : vector<2x16x1xf32> to vector<2x16x8xf32>
    %632 = arith.mulf %627, %631 : vector<2x16x8xf32>
    %633 = vector.broadcast %28 : vector<1x1x32xf32> to vector<2x8x32xf32>
    %634 = arith.mulf %583, %633 : vector<2x8x32xf32>
    "tpu.trace_start"() <{level = 10 : i32, message = "bqk,bkd->bqd"}> : () -> ()
    %cst_290 = arith.constant dense<0.000000e+00> : vector<2x16x32xf32>
    %635 = tpu.matmul %632, %634, %cst_290 {dimension_numbers = #tpu.dot_dimension_numbers<[2], [1], [1], [2], [0, 0, 0, 1, 1, 2], [0], [0]>} : vector<2x16x8xf32>, vector<2x8x32xf32>, vector<2x16x32xf32> -> vector<2x16x32xf32>
    "tpu.trace_stop"() : () -> ()
    %636 = arith.addf %619, %635 : vector<2x16x32xf32>
    %637 = vector.broadcast %36 : vector<1x1x32xf32> to vector<2x16x32xf32>
    %638 = arith.mulf %586, %637 : vector<2x16x32xf32>
    "tpu.trace_start"() <{level = 10 : i32, message = "bqd,bkd->bqk"}> : () -> ()
    %cst_291 = arith.constant dense<0.000000e+00> : vector<2x16x8xf32>
    %639 = tpu.matmul %638, %575, %cst_291 {dimension_numbers = #tpu.dot_dimension_numbers<[2], [2], [1], [1], [0, 0, 0, 1, 1, 1], [0], [0]>} : vector<2x16x32xf32>, vector<2x8x32xf32>, vector<2x16x8xf32> -> vector<2x16x8xf32>
    "tpu.trace_stop"() : () -> ()
    %cst_292 = arith.constant dense<0xFF800000> : vector<2x16xf32>
    %640 = vector.multi_reduction <maximumf>, %639, %cst_292 [2] : vector<2x16x8xf32> to vector<2x16xf32>
    %641 = vector.shape_cast %640 : vector<2x16xf32> to vector<2x16x1xf32>
    %642 = vector.broadcast %641 : vector<2x16x1xf32> to vector<2x16x8xf32>
    %643 = arith.subf %639, %642 : vector<2x16x8xf32>
    %644 = math.exp %643 : vector<2x16x8xf32>
    %cst_293 = arith.constant dense<0.000000e+00> : vector<2x16xf32>
    %645 = vector.multi_reduction <add>, %644, %cst_293 [2] : vector<2x16x8xf32> to vector<2x16xf32>
    %646 = vector.shape_cast %645 : vector<2x16xf32> to vector<2x16x1xf32>
    %647 = tpu.reciprocal %646 {approx = true} : vector<2x16x1xf32> -> vector<2x16x1xf32>
    %648 = vector.broadcast %647 : vector<2x16x1xf32> to vector<2x16x8xf32>
    %649 = arith.mulf %644, %648 : vector<2x16x8xf32>
    %650 = vector.broadcast %36 : vector<1x1x32xf32> to vector<2x8x32xf32>
    %651 = arith.mulf %583, %650 : vector<2x8x32xf32>
    "tpu.trace_start"() <{level = 10 : i32, message = "bqk,bkd->bqd"}> : () -> ()
    %cst_294 = arith.constant dense<0.000000e+00> : vector<2x16x32xf32>
    %652 = tpu.matmul %649, %651, %cst_294 {dimension_numbers = #tpu.dot_dimension_numbers<[2], [1], [1], [2], [0, 0, 0, 1, 1, 2], [0], [0]>} : vector<2x16x8xf32>, vector<2x8x32xf32>, vector<2x16x32xf32> -> vector<2x16x32xf32>
    "tpu.trace_stop"() : () -> ()
    %653 = arith.addf %636, %652 : vector<2x16x32xf32>
    %654 = vector.shape_cast %653 : vector<2x16x32xf32> to vector<32x32xf32>
    %c1_295 = arith.constant 1 : index
    %c0_296 = arith.constant 0 : index
    %c1280_297 = arith.constant 1280 : index
    %655 = vector.load %arg3[%c1_295, %c0_296, %c1280_297] : memref<2x64x1664xf32, #tpu.memory_space<vmem>>, vector<1x32x32xf32>
    %656 = vector.shape_cast %655 : vector<1x32x32xf32> to vector<32x32xf32>
    %cst_298 = arith.constant dense<0.000000e+00> : vector<32x32xf32>
    %657 = tpu.matmul %654, %656, %cst_298 {dimension_numbers = #tpu.dot_dimension_numbers<[1], [0], [0], [1], [0, 0, 1, 1], [], []>} : vector<32x32xf32>, vector<32x32xf32>, vector<32x32xf32> -> vector<32x32xf32>
    %c1_299 = arith.constant 1 : index
    %c10_300 = arith.constant 10 : index
    %c0_301 = arith.constant 0 : index
    %658 = vector.load %arg4[%c1_299, %c10_300, %c0_301] : memref<2x13x128xf32, #tpu.memory_space<vmem>>, vector<1x1x32xf32>
    %659 = vector.shape_cast %658 : vector<1x1x32xf32> to vector<1x32xf32>
    %660 = vector.broadcast %659 : vector<1x32xf32> to vector<32x32xf32>
    %661 = arith.addf %657, %660 : vector<32x32xf32>
    %662 = arith.addf %532, %661 : vector<32x32xf32>
    %c1_302 = arith.constant 1 : index
    %c2_303 = arith.constant 2 : index
    %c0_304 = arith.constant 0 : index
    %c0_305 = arith.constant 0 : index
    %663 = vector.load %arg5[%c1_302, %c2_303, %c0_304, %c0_305] : memref<2x3x2x32xf32, #tpu.memory_space<vmem>>, vector<1x1x1x32xf32>
    %664 = vector.shape_cast %663 : vector<1x1x1x32xf32> to vector<1x32xf32>
    %c1_306 = arith.constant 1 : index
    %c2_307 = arith.constant 2 : index
    %c1_308 = arith.constant 1 : index
    %c0_309 = arith.constant 0 : index
    %665 = vector.load %arg5[%c1_306, %c2_307, %c1_308, %c0_309] : memref<2x3x2x32xf32, #tpu.memory_space<vmem>>, vector<1x1x1x32xf32>
    %666 = vector.shape_cast %665 : vector<1x1x1x32xf32> to vector<1x32xf32>
    %cst_310 = arith.constant dense<0.000000e+00> : vector<32xf32>
    %667 = vector.multi_reduction <add>, %662, %cst_310 [1] : vector<32x32xf32> to vector<32xf32>
    %668 = vector.shape_cast %667 : vector<32xf32> to vector<32x1xf32>
    %cst_311 = arith.constant 3.200000e+01 : f32
    %669 = vector.broadcast %cst_311 : f32 to vector<32x1xf32>
    %670 = arith.divf %668, %669 : vector<32x1xf32>
    %671 = vector.broadcast %670 : vector<32x1xf32> to vector<32x32xf32>
    %672 = arith.subf %662, %671 : vector<32x32xf32>
    %673 = arith.mulf %672, %672 : vector<32x32xf32>
    %cst_312 = arith.constant dense<0.000000e+00> : vector<32xf32>
    %674 = vector.multi_reduction <add>, %673, %cst_312 [1] : vector<32x32xf32> to vector<32xf32>
    %675 = vector.shape_cast %674 : vector<32xf32> to vector<32x1xf32>
    %cst_313 = arith.constant 3.100000e+01 : f32
    %676 = vector.broadcast %cst_313 : f32 to vector<32x1xf32>
    %677 = arith.divf %675, %676 : vector<32x1xf32>
    %678 = math.sqrt %677 : vector<32x1xf32>
    %cst_314 = arith.constant 9.99999997E-7 : f32
    %679 = vector.broadcast %cst_314 : f32 to vector<32x1xf32>
    %680 = arith.addf %678, %679 : vector<32x1xf32>
    %cst_315 = arith.constant 1.000000e+00 : f32
    %681 = vector.broadcast %cst_315 : f32 to vector<32x1xf32>
    %682 = arith.divf %681, %680 : vector<32x1xf32>
    %683 = vector.broadcast %670 : vector<32x1xf32> to vector<32x32xf32>
    %684 = arith.subf %662, %683 : vector<32x32xf32>
    %685 = vector.broadcast %664 : vector<1x32xf32> to vector<32x32xf32>
    %686 = arith.mulf %685, %684 : vector<32x32xf32>
    %687 = vector.broadcast %682 : vector<32x1xf32> to vector<32x32xf32>
    %688 = arith.mulf %686, %687 : vector<32x32xf32>
    %689 = vector.broadcast %666 : vector<1x32xf32> to vector<32x32xf32>
    %690 = arith.addf %688, %689 : vector<32x32xf32>
    %c1_316 = arith.constant 1 : index
    %c0_317 = arith.constant 0 : index
    %c1408_318 = arith.constant 1408 : index
    %691 = vector.load %arg3[%c1_316, %c0_317, %c1408_318] : memref<2x64x1664xf32, #tpu.memory_space<vmem>>, vector<1x32x64xf32>
    %692 = vector.shape_cast %691 : vector<1x32x64xf32> to vector<32x64xf32>
    %cst_319 = arith.constant dense<0.000000e+00> : vector<32x64xf32>
    %693 = tpu.matmul %690, %692, %cst_319 {dimension_numbers = #tpu.dot_dimension_numbers<[1], [0], [0], [1], [0, 0, 1, 1], [], []>} : vector<32x32xf32>, vector<32x64xf32>, vector<32x64xf32> -> vector<32x64xf32>
    %c1_320 = arith.constant 1 : index
    %c11_321 = arith.constant 11 : index
    %c0_322 = arith.constant 0 : index
    %694 = vector.load %arg4[%c1_320, %c11_321, %c0_322] : memref<2x13x128xf32, #tpu.memory_space<vmem>>, vector<1x1x64xf32>
    %695 = vector.shape_cast %694 : vector<1x1x64xf32> to vector<1x64xf32>
    %696 = vector.broadcast %695 : vector<1x64xf32> to vector<32x64xf32>
    %697 = arith.addf %693, %696 : vector<32x64xf32>
    %cst_323 = arith.constant 0.000000e+00 : f32
    %698 = vector.broadcast %cst_323 : f32 to vector<32x64xf32>
    %699 = arith.maximumf %697, %698 : vector<32x64xf32>
    %c1_324 = arith.constant 1 : index
    %c0_325 = arith.constant 0 : index
    %c1536_326 = arith.constant 1536 : index
    %700 = vector.load %arg3[%c1_324, %c0_325, %c1536_326] : memref<2x64x1664xf32, #tpu.memory_space<vmem>>, vector<1x64x32xf32>
    %701 = vector.shape_cast %700 : vector<1x64x32xf32> to vector<64x32xf32>
    %cst_327 = arith.constant dense<0.000000e+00> : vector<32x32xf32>
    %702 = tpu.matmul %699, %701, %cst_327 {dimension_numbers = #tpu.dot_dimension_numbers<[1], [0], [0], [1], [0, 0, 1, 1], [], []>} : vector<32x64xf32>, vector<64x32xf32>, vector<32x32xf32> -> vector<32x32xf32>
    %c1_328 = arith.constant 1 : index
    %c12_329 = arith.constant 12 : index
    %c0_330 = arith.constant 0 : index
    %703 = vector.load %arg4[%c1_328, %c12_329, %c0_330] : memref<2x13x128xf32, #tpu.memory_space<vmem>>, vector<1x1x32xf32>
    %704 = vector.shape_cast %703 : vector<1x1x32xf32> to vector<1x32xf32>
    %705 = vector.broadcast %704 : vector<1x32xf32> to vector<32x32xf32>
    %706 = arith.addf %702, %705 : vector<32x32xf32>
    %707 = arith.addf %662, %706 : vector<32x32xf32>
    %c0_331 = arith.constant 0 : index
    %c0_332 = arith.constant 0 : index
    %708 = vector.load %arg6[%c0_331, %c0_332] : memref<2x32xf32, #tpu.memory_space<vmem>>, vector<1x32xf32>
    %c1_333 = arith.constant 1 : index
    %c0_334 = arith.constant 0 : index
    %709 = vector.load %arg6[%c1_333, %c0_334] : memref<2x32xf32, #tpu.memory_space<vmem>>, vector<1x32xf32>
    %cst_335 = arith.constant dense<0.000000e+00> : vector<32xf32>
    %710 = vector.multi_reduction <add>, %707, %cst_335 [1] : vector<32x32xf32> to vector<32xf32>
    %711 = vector.shape_cast %710 : vector<32xf32> to vector<32x1xf32>
    %cst_336 = arith.constant 3.200000e+01 : f32
    %712 = vector.broadcast %cst_336 : f32 to vector<32x1xf32>
    %713 = arith.divf %711, %712 : vector<32x1xf32>
    %714 = vector.broadcast %713 : vector<32x1xf32> to vector<32x32xf32>
    %715 = arith.subf %707, %714 : vector<32x32xf32>
    %716 = arith.mulf %715, %715 : vector<32x32xf32>
    %cst_337 = arith.constant dense<0.000000e+00> : vector<32xf32>
    %717 = vector.multi_reduction <add>, %716, %cst_337 [1] : vector<32x32xf32> to vector<32xf32>
    %718 = vector.shape_cast %717 : vector<32xf32> to vector<32x1xf32>
    %cst_338 = arith.constant 3.100000e+01 : f32
    %719 = vector.broadcast %cst_338 : f32 to vector<32x1xf32>
    %720 = arith.divf %718, %719 : vector<32x1xf32>
    %721 = math.sqrt %720 : vector<32x1xf32>
    %cst_339 = arith.constant 9.99999997E-7 : f32
    %722 = vector.broadcast %cst_339 : f32 to vector<32x1xf32>
    %723 = arith.addf %721, %722 : vector<32x1xf32>
    %cst_340 = arith.constant 1.000000e+00 : f32
    %724 = vector.broadcast %cst_340 : f32 to vector<32x1xf32>
    %725 = arith.divf %724, %723 : vector<32x1xf32>
    %726 = vector.broadcast %713 : vector<32x1xf32> to vector<32x32xf32>
    %727 = arith.subf %707, %726 : vector<32x32xf32>
    %728 = vector.broadcast %708 : vector<1x32xf32> to vector<32x32xf32>
    %729 = arith.mulf %728, %727 : vector<32x32xf32>
    %730 = vector.broadcast %725 : vector<32x1xf32> to vector<32x32xf32>
    %731 = arith.mulf %729, %730 : vector<32x32xf32>
    %732 = vector.broadcast %709 : vector<1x32xf32> to vector<32x32xf32>
    %733 = arith.addf %731, %732 : vector<32x32xf32>
    %734 = vector.shape_cast %733 : vector<32x32xf32> to vector<2x16x32xf32>
    %c0_341 = arith.constant 0 : index
    %c0_342 = arith.constant 0 : index
    %c0_343 = arith.constant 0 : index
    %735 = vector.load %arg7[%c0_341, %c0_342, %c0_343] : memref<2x16x32xf32, #tpu.memory_space<vmem>>, vector<2x16x32xf32>
    tpu.vector_store %arg7[%c0_341, %c0_342, %c0_343], %734 {strides = array<i32>} : memref<2x16x32xf32, #tpu.memory_space<vmem>>, vector<2x16x32xf32>,
    return
  }
}

</mosaic_0001>

<bundles_post_ra>
// kernel: transformer_decoder.1
= control target key start
LH: loop header
LB: loop body
LE: loop exit
PB: predicated region body
PF: predicated region fallthrough
CT: control target
= control target key end

     0   :  { %12 = vsyncpa [#allocation3], 0  ;;  %s11434_s24 = smov [#allocation2]   ;;  %s13116_s0 = inlined_call_operand.vmem [shape: f32[2,16,32], index: 0, kind: input, shape index: {}]   ;;  %s13117_s1 = inlined_call_operand.vmem [shape: f32[2,8,32], index: 1, kind: input, shape index: {}]   ;;  %s13118_s2 = inlined_call_operand.vmem [shape: f32[2,16,16], index: 2, kind: input, shape index: {}]   ;;  %s13119_s3 = inlined_call_operand.hbm [shape: f32[2,64,1664], index: 3, kind: input, shape index: {}]   ;;  %s13120_s4 = inlined_call_operand.vmem [shape: f32[2,13,128], index: 4, kind: input, shape index: {}]   ;;  %s13121_s5 = inlined_call_operand.vmem [shape: f32[2,3,2,32], index: 5, kind: input, shape index: {}]   ;;  %s13122_s6 = inlined_call_operand.vmem [shape: f32[2,32], index: 6, kind: input, shape index: {}]   ;;  %s13123_s7 = inlined_call_operand.vmem [shape: f32[2,16,32], index: 7, kind: output, shape index: {}]  }
   0x1   :  { %s24_s25 = sshll.u32 %s11434_s24, 4  ;;  %s25_s25 = int_to_ptr.vmem [resolvable:$true] %s24_s25 }
   0x2   :  { %s11420_s26 = scalar_lea.vmem %s25_s25, 26624  ;;  %p11425_p1 = scmp.lt.s32.totalorder %s25_s25, %s25_s25 }
   0x3   :  { %p11421_p0 = scmp.ne.s32.totalorder %s25_s25, %s11420_s26  ;;  %p11426_p2 = scmp.lt.s32.totalorder %s11420_s26, %s11420_s26 }
   0x5   :  { %p11427_p3 = por %p11426_p2, %p11425_p1 }
   0x7   :  { %p11428_p4 = pnand %p11427_p3, %p11421_p0 }
   0x9   :  { %11431 = shalt.err (!%p11428_p4)
}
   0xa   :  { %s11435_s27 = smov 1664   ;;  %s11436_s28 = smov 104  }
   0xb   :  { %30 = dma.hbm_to_vmem [thread:$0]  %s13119_s3, 26624, %s25_s25, [#allocation3], %s11435_s27, %s11435_s27, %s11436_s28  }
   0xc   :  { %11432 = dma.done.wait [#allocation3], 26624  }
   0xd   :  { %11433 = vsyncadd [#allocation3], 4294940672  ;;  %vm75_vm0 = vcmask 261120   ;;  %v63_v0 = vld [vmem:[%s13116_s0] sm:$0xff]  ;;  %v65_v1 = vld [vmem:[%s13116_s0 + $0x10] sm:$0xff] }
   0xe   :  { %v64_v2 = vld [vmem:[%s13116_s0 + $0x8] sm:$0xff]  ;;  %v76_v3 = vsel %vm75_vm0, %v63_v0, 0.0  ;;  %v82_v4 = vsel %vm75_vm0, %v65_v1, 0.0  ;;  %v66_v5 = vld [vmem:[%s13116_s0 + $0x18] sm:$0xff]  ;;  %v385_v29 = vld [vmem:[#allocation2 + $0x140] sm:$0xff] }
   0xf   :  { %77 = vadd.xlane.f32.xlu0 %v76_v3  ;;  %83 = vadd.xlane.f32.xlu1 %v82_v4  ;;  %v79_v6 = vsel %vm75_vm0, %v64_v2, 0.0  ;;  %v85_v7 = vsel %vm75_vm0, %v66_v5, 0.0  ;;  %v181_v28 = vld [vmem:[#allocation2 + $0x138] sm:$0xff]  ;;  %v180_v30 = vld [vmem:[#allocation2 + $0xd0] sm:$0xff]  ;;  %v179_v32 = vld [vmem:[#allocation2 + $0x68] sm:$0xff] }
  0x10   :  { %10278 = vmatprep.subr.mxu1 %v181_v28  ;;  %10306 = vmatprep.subr.mxu0 %v385_v29  ;;  %v384_v31 = vld [vmem:[#allocation2 + $0xd8] sm:$0xff]  ;;  %v383_v33 = vld [vmem:[#allocation2 + $0x70] sm:$0xff]  ;;  %v178_v34 = vld [vmem:[#allocation2] sm:$0xff] }
  0x11   :  { %10279 = vmatpush3.msra.mxu1 %v181_v28  ;;  %10307 = vmatpush3.msra.mxu0 %v385_v29  ;;  %v382_v35 = vld [vmem:[#allocation2 + $0x8] sm:$0xff]  ;;  %v11517_v36 = vld [vmem:[#allocation2 + $0x150] sm:$0xff]  ;;  %v284_v28 = vld [vmem:[#allocation2 + $0x18] sm:$0xff] }
  0x12   :  { %10280 = vmatprep.subr.mxu1 %v180_v30  ;;  %10308 = vmatprep.subr.mxu0 %v384_v31  ;;  %v11520_v37 = vld [vmem:[#allocation2 + $0x148] sm:$0xff]  ;;  %v574_v29 = vld [vmem:[#allocation2 + $0x10] sm:$0xff] }
  0x13   :  { %80 = vadd.xlane.f32.xlu0 %v79_v6  ;;  %86 = vadd.xlane.f32.xlu1 %v85_v7  ;;  %v9511_v6 = vld [vmem:[%s13121_s5] ss:$0 sm:$0xff] }
  0x14   :  { %10281 = vmatpush3.msra.mxu1 %v180_v30  ;;  %10309 = vmatpush3.msra.mxu0 %v384_v31  ;;  %v479_v30 = vld [vmem:[#allocation2 + $0x158] sm:$0xff]  ;;  %v478_v31 = vld [vmem:[#allocation2 + $0xf0] sm:$0xff] }
  0x15   :  { %10282 = vmatprep.subr.mxu1 %v179_v32  ;;  %10310 = vmatprep.subr.mxu0 %v383_v33 }
  0x16   :  { %10283 = vmatpush3.msra.mxu1 %v179_v32  ;;  %10311 = vmatpush3.msra.mxu0 %v383_v33  ;;  %v477_v32 = vld [vmem:[#allocation2 + $0x88] sm:$0xff]  ;;  %v476_v33 = vld [vmem:[#allocation2 + $0x20] sm:$0xff] }
  0x17   :  { %10284 = vmatprep.subr.mxu1 %v178_v34  ;;  %10312 = vmatprep.subr.mxu0 %v382_v35 }
  0x18   :  { %10285 = vmatpush3.msra.mxu1 %v178_v34  ;;  %10313 = vmatpush3.msra.mxu0 %v382_v35  ;;  %v671_v34 = vld [vmem:[#allocation2 + $0x160] sm:$0xff]  ;;  %v670_v35 = vld [vmem:[#allocation2 + $0xf8] sm:$0xff] }
  0x19   :  { %10292 = vmatprep.subr.mxu1 %v11517_v36  ;;  %10334 = vmatprep.subr.mxu0 %v11520_v37 }
  0x98   :  { %v78_v8 = vpop.xlane.xlu0 %77  ;;  %v84_v9 = vpop.xlane.xlu1 %83 }
  0x99   :  { %v89_v10 = vmul.f32 0.03125, %v78_v8  ;;  %v91_v11 = vmul.f32 0.03125, %v84_v9  ;;  %v9512_v9 = vld [vmem:[%s13121_s5 + $0x1] ss:$0 sm:$0xff] }
  0x9b   :  { %v11497_v12 = vsub.f32 %v63_v0, %v89_v10  ;;  %v11499_v13 = vsub.f32 %v65_v1, %v91_v11 }
  0x9c   :  { %v81_v14 = vpop.xlane.xlu0 %80  ;;  %v87_v15 = vpop.xlane.xlu1 %86 }
  0x9d   :  { %v90_v16 = vmul.f32 0.03125, %v81_v14  ;;  %v92_v17 = vmul.f32 0.03125, %v87_v15  ;;  %v97_v18 = vmul.f32 %v11497_v12, %v11497_v12  ;;  %v99_v19 = vmul.f32 %v11499_v13, %v11499_v13 }
  0x9e   :  { %v162_v7 = vmul.f32 %v9511_v6, %v11497_v12  ;;  %v164_v15 = vmul.f32 %v9511_v6, %v11499_v13 }
  0x9f   :  { %v11505_v20 = vsub.f32 %v64_v2, %v90_v16  ;;  %v11507_v21 = vsub.f32 %v66_v5, %v92_v17  ;;  %v101_v22 = vsel %vm75_vm0, %v97_v18, 0.0  ;;  %v107_v25 = vsel %vm75_vm0, %v99_v19, 0.0 }
  0xa0   :  { %102 = vadd.xlane.f32.xlu0 %v101_v22 }
  0xa1   :  { %v98_v23 = vmul.f32 %v11505_v20, %v11505_v20  ;;  %v100_v24 = vmul.f32 %v11507_v21, %v11507_v21  ;;  %v163_v11 = vmul.f32 %v9511_v6, %v11505_v20  ;;  %v165_v19 = vmul.f32 %v9511_v6, %v11507_v21  ;;  %v285_v21 = vld [vmem:[#allocation2 + $0x80] sm:$0xff] }
  0xa3   :  { %v104_v26 = vsel %vm75_vm0, %v98_v23, 0.0  ;;  %v110_v27 = vsel %vm75_vm0, %v100_v24, 0.0  ;;  %v286_v24 = vld [vmem:[#allocation2 + $0xe8] sm:$0xff] }
  0xa4   :  { %105 = vadd.xlane.f32.xlu1 %v104_v26  ;;  %108 = vadd.xlane.f32.xlu0 %v107_v25  ;;  %v576_v25 = vld [vmem:[#allocation2 + $0xe0] sm:$0xff] }
  0xa8   :  { %111 = vadd.xlane.f32.xlu1 %v110_v27  ;;  %v575_v27 = vld [vmem:[#allocation2 + $0x78] sm:$0xff] }
 0x129   :  { %v103_v38 = vpop.xlane.xlu0 %102 }
 0x12a   :  { %v114_v39 = vmul.f32 0.032258064, %v103_v38  ;;  %v40_v38 = vlaneseq }
 0x12c   :  { %11034 = vrsqrt.f32 %v114_v39  ;;  %vm120_vm1 = vcmp.eq.f32.partialorder %v114_v39, inf  ;;  %v123_v48 = vand.u32 2147483648, %v114_v39  ;;  %vm122_vm2 = vcmp.eq.f32.partialorder %v114_v39, 0.0 }
 0x12d   :  { %v106_v40 = vpop.xlane.xlu1 %105  ;;  %v109_v42 = vpop.xlane.xlu0 %108 }
 0x12e   :  { %v115_v41 = vmul.f32 0.032258064, %v106_v40  ;;  %v116_v43 = vmul.f32 0.032258064, %v109_v42  ;;  %v11437_v40 = vmov 0.0  }
 0x130   :  { %11036 = vrsqrt.f32 %v115_v41  ;;  %vm127_vm3 = vcmp.eq.f32.partialorder %v115_v41, inf  ;;  %v130_v55 = vand.u32 2147483648, %v115_v41  ;;  %vm129_vm4 = vcmp.eq.f32.partialorder %v115_v41, 0.0 }
 0x131   :  { %11038 = vrsqrt.f32 %v116_v43  ;;  %v112_v44 = vpop.xlane.xlu1 %111  ;;  %vm134_vm5 = vcmp.eq.f32.partialorder %v116_v43, inf  ;;  %v137_v58 = vand.u32 2147483648, %v116_v43  ;;  %vm136_vm6 = vcmp.eq.f32.partialorder %v116_v43, 0.0 }
 0x132   :  { %v117_v45 = vmul.f32 0.032258064, %v112_v44 }
 0x134   :  { %11040 = vrsqrt.f32 %v117_v45  ;;  %vm141_vm7 = vcmp.eq.f32.partialorder %v117_v45, inf  ;;  %v144_v2 = vand.u32 2147483648, %v117_v45  ;;  %vm143_vm8 = vcmp.eq.f32.partialorder %v117_v45, 0.0 }
 0x139   :  { %v11035_v46 = vpop.eup %11034 }
 0x13a   :  { %v119_v47 = vmul.f32 %v11035_v46, %v114_v39 }
 0x13c   :  { %v121_v50 = vsel %vm120_vm1, %v114_v39, %v119_v47  ;;  %v46_v39 = vand.u32 127, %v40_v38 }
 0x13d   :  { %v11037_v49 = vpop.eup %11036  ;;  %v124_v52 = vsel %vm122_vm2, %v123_v48, %v121_v50 }
 0x13e   :  { %v11039_v51 = vpop.eup %11038  ;;  %v126_v53 = vmul.f32 %v11037_v49, %v115_v41  ;;  %v146_v54 = vadd.f32 1e-06, %v124_v52  ;;  %vm55_vm9 = vcmp.ge.s32.totalorder %v46_v39, 16  ;;  %vm56_vm10 = vcmp.lt.s32.totalorder %v46_v39, 24 }
 0x13f   :  { %v133_v56 = vmul.f32 %v11039_v51, %v116_v43  ;;  %vm59_vm11 = vcmp.ge.s32.totalorder %v46_v39, 24  ;;  %vm60_vm12 = vcmp.lt.s32.totalorder %v46_v39, 32  ;;  %vm57_vm13 = vmand %vm55_vm9, %vm56_vm10  ;;  %v11589_v51 = vshrl.u32 %v40_v38, 7 }
 0x140   :  { %v128_v57 = vsel %vm127_vm3, %v115_v41, %v126_v53  ;;  %11042 = vrcp.f32 %v146_v54  ;;  %v11584_v41 = vsel %vm57_vm13, 1.0, %v11437_v40  ;;  %vm61_vm14 = vmand %vm59_vm11, %vm60_vm12  ;;  %v9513_v53 = vld [vmem:[%s13120_s4] ss:$0 sm:$0xff]  ;;  %vm48_vm1 = vcmp.lt.s32.totalorder %v46_v39, 8 }
 0x141   :  { %v11041_v59 = vpop.eup %11040  ;;  %v131_v60 = vsel %vm129_vm4, %v130_v55, %v128_v57  ;;  %v135_v61 = vsel %vm134_vm5, %v116_v43, %v133_v56  ;;  %v11587_v42 = vsel %vm61_vm14, 1.0, %v11437_v40  ;;  %v9518_v55 = vld [vmem:[%s13120_s4 + $0x3] ss:$0 sm:$0xff]  ;;  %vm43_vm15 = vcmp.eq.s32.totalorder %v11589_v51, 0 }
 0x142   :  { %v147_v62 = vadd.f32 1e-06, %v131_v60  ;;  %v138_v63 = vsel %vm136_vm6, %v137_v58, %v135_v61  ;;  %v140_v0 = vmul.f32 %v11041_v59, %v117_v45  ;;  %vm51_vm2 = vcmp.ge.s32.totalorder %v46_v39, 8 }
 0x143   :  { %v148_v1 = vadd.f32 1e-06, %v138_v63  ;;  %vm52_vm3 = vcmp.lt.s32.totalorder %v46_v39, 16  ;;  %vm948_vm5 = vcmask 130048   ;;  %vm2964_vm14 = vcmask 64512  }
 0x144   :  { %11044 = vrcp.f32 %v147_v62  ;;  %v142_v3 = vsel %vm141_vm7, %v117_v45, %v140_v0  ;;  %v9528_v0 = vld [vmem:[%s13120_s4 + $0x4] ss:$0 sm:$0xff]  ;;  %vm53_vm4 = vmand %vm51_vm2, %vm52_vm3 }
 0x145   :  { %11046 = vrcp.f32 %v148_v1  ;;  %v145_v4 = vsel %vm143_vm8, %v144_v2, %v142_v3 }
 0x146   :  { %v149_v5 = vadd.f32 1e-06, %v145_v4  ;;  %v9523_v4 = vld [vmem:[%s13120_s4 + $0x1] ss:$0 sm:$0xff] }
 0x148   :  { %11048 = vrcp.f32 %v149_v5  ;;  %v11609_v5 = vsel %vm48_vm1, 1.0, %v11437_v40 }
 0x14d   :  { %v11043_v8 = vpop.eup %11042 }
 0x14e   :  { %v166_v10 = vmul.f32 %v11043_v8, %v162_v7 }
 0x150   :  { %v11532_v16 = vadd.f32 %v9512_v9, %v166_v10 }
 0x151   :  { %v11045_v14 = vpop.eup %11044 }
 0x152   :  { %v11047_v17 = vpop.eup %11046  ;;  %v167_v18 = vmul.f32 %v11045_v14, %v163_v11  ;;  %10286 = vmatprep.mubr.msk.f32.mxu1 %vm75_vm0, %v11532_v16  ;;  %10314 = vmatprep.mubr.msk.f32.mxu0 %vm75_vm0, %v11532_v16 }
 0x153   :  { %v168_v12 = vmul.f32 %v11047_v17, %v164_v15 }
 0x154   :  { %v11539_v22 = vadd.f32 %v9512_v9, %v167_v18 }
 0x155   :  { %v11049_v23 = vpop.eup %11048  ;;  %v11541_v20 = vadd.f32 %v9512_v9, %v168_v12 }
 0x156   :  { %10287 = vmatmul.mubr.msk.f32.vlgmr.msra.gmra.mxu1 %vm75_vm0, %v11539_v22  ;;  %10315 = vmatmul.mubr.msk.f32.vlgmr.msra.gmra.mxu0 %vm75_vm0, %v11539_v22  ;;  %v169_v13 = vmul.f32 %v11049_v23, %v165_v19 }
 0x157   :  { %10293 = vmatpush3.msra.mxu1 %v11517_v36  ;;  %10289 = vmatprep.mubr.msk.f32.mxu1 %vm75_vm0, %v11541_v20  ;;  %v669_v36 = vld [vmem:[#allocation2 + $0x90] sm:$0xff] }
 0x158   :  { %10294 = vmatprep.subr.mxu1 %v286_v24  ;;  %10317 = vmatprep.mubr.msk.f32.mxu0 %vm75_vm0, %v11541_v20  ;;  %v177_v26 = vadd.f32 %v9512_v9, %v169_v13 }
 0x159   :  { %10335 = vmatpush3.msra.mxu0 %v11520_v37  ;;  %10295 = vmatpush3.msra.mxu1 %v286_v24  ;;  %v668_v37 = vld [vmem:[#allocation2 + $0x28] sm:$0xff] }
 0x15a   :  { %10336 = vmatprep.subr.mxu0 %v576_v25  ;;  %10296 = vmatprep.subr.mxu1 %v285_v21 }
 0x15b   :  { %10337 = vmatpush3.msra.mxu0 %v576_v25  ;;  %10290 = vmatmul.mubr.msk.f32.gmra.mxu1 %vm75_vm0, %v177_v26 }
 0x15c   :  { %10297 = vmatpush3.msra.mxu1 %v285_v21  ;;  %10318 = vmatmul.mubr.msk.f32.gmra.mxu0 %vm75_vm0, %v177_v26 }
 0x15d   :  { %10338 = vmatprep.subr.mxu0 %v575_v27  ;;  %10298 = vmatprep.subr.mxu1 %v284_v28 }
 0x15e   :  { %10300 = vmatprep.mubr.msk.f32.mxu1 %vm75_vm0, %v11532_v16  ;;  %10339 = vmatpush3.msra.mxu0 %v575_v27 }
 0x15f   :  { %10342 = vmatprep.mubr.msk.f32.mxu0 %vm75_vm0, %v11532_v16  ;;  %10299 = vmatpush3.msra.mxu1 %v284_v28  ;;  %v9538_v28 = vld [vmem:[%s13120_s4 + $0x5] ss:$0 sm:$0xff] }
 0x160   :  { %10340 = vmatprep.subr.mxu0 %v574_v29  ;;  %10320 = vmatprep.subr.mxu1 %v479_v30 }
 0x161   :  { %10341 = vmatpush3.msra.mxu0 %v574_v29  ;;  %10301 = vmatmul.mubr.msk.f32.vlgmr.msra.gmra.mxu1 %vm75_vm0, %v11539_v22  ;;  %v11657_v29 = vsel %vm53_vm4, 1.0, %v11437_v40 }
 0x162   :  { %10321 = vmatpush3.msra.mxu1 %v479_v30  ;;  %10343 = vmatmul.mubr.msk.f32.vlgmr.msra.gmra.mxu0 %vm75_vm0, %v11539_v22 }
 0x163   :  { %10303 = vmatprep.mubr.msk.f32.mxu1 %vm75_vm0, %v11541_v20  ;;  %10322 = vmatprep.subr.mxu1 %v478_v31 }
 0x164   :  { %10345 = vmatprep.mubr.msk.f32.mxu0 %vm75_vm0, %v11541_v20  ;;  %10323 = vmatpush3.msra.mxu1 %v478_v31  ;;  %v9533_v31 = vld [vmem:[%s13120_s4 + $0x2] ss:$0 sm:$0xff] }
 0x165   :  { %10324 = vmatprep.subr.mxu1 %v477_v32  ;;  %10304 = vmatmul.mubr.msk.f32.gmra.mxu1 %vm75_vm0, %v177_v26 }
 0x166   :  { %10325 = vmatpush3.msra.mxu1 %v477_v32  ;;  %10346 = vmatmul.mubr.msk.f32.gmra.mxu0 %vm75_vm0, %v177_v26 }
 0x167   :  { %10326 = vmatprep.subr.mxu1 %v476_v33  ;;  %10328 = vmatprep.mubr.msk.f32.mxu1 %vm75_vm0, %v11532_v16 }
 0x168   :  { %10327 = vmatpush3.msra.mxu1 %v476_v33 }
 0x169   :  { %10329 = vmatmul.mubr.msk.f32.vlgmr.msra.gmra.mxu1 %vm75_vm0, %v11539_v22  ;;  %10348 = vmatprep.subr.mxu1 %v671_v34 }
 0x16a   :  { %10331 = vmatprep.mubr.msk.f32.mxu1 %vm75_vm0, %v11541_v20  ;;  %10349 = vmatpush3.msra.mxu1 %v671_v34 }
 0x16b   :  { %10350 = vmatprep.subr.mxu1 %v670_v35 }
 0x16c   :  { %10351 = vmatpush3.msra.mxu1 %v670_v35 }
 0x16d   :  { %10332 = vmatmul.mubr.msk.f32.gmra.mxu1 %vm75_vm0, %v177_v26  ;;  %10352 = vmatprep.subr.mxu1 %v669_v36 }
 0x16e   :  { %10353 = vmatpush3.msra.mxu1 %v669_v36  ;;  %10356 = vmatprep.mubr.msk.f32.mxu1 %vm75_vm0, %v11532_v16 }
 0x16f   :  { %10354 = vmatprep.subr.mxu1 %v668_v37 }
 0x170   :  { %10355 = vmatpush3.msra.mxu1 %v668_v37 }
 0x171   :  { %10357 = vmatmul.mubr.msk.f32.vlgmr.msra.gmra.mxu1 %vm75_vm0, %v11539_v22 }
 0x172   :  { %10359 = vmatprep.mubr.msk.f32.mxu1 %vm75_vm0, %v11541_v20 }
 0x175   :  { %10360 = vmatmul.mubr.msk.f32.gmra.mxu1 %vm75_vm0, %v177_v26 }
 0x216   :  { %v10288_v43 = vpop.f32.mrf.mxu1  ;;  %v10316_v44 = vpop.f32.mrf.mxu0 }
 0x218   :  { %v265_v45 = vpop.f32.mrf.mxu1  ;;  %v457_v46 = vpop.f32.mrf.mxu0 }
 0x219   :  { %v266_v59 = vadd.f32 %v9513_v53, %v265_v45  ;;  %v458_v14 = vadd.f32 %v9523_v4, %v457_v46 }
 0x21b   :  { %v10291_v47 = vpop.f32.mrf.mxu1 }
 0x21c   :  { %v10319_v48 = vpop.f32.mrf.mxu0 }
 0x21d   :  { %v275_v49 = vpop.f32.mrf.mxu1 }
 0x21e   :  { %v467_v50 = vpop.f32.mrf.mxu0  ;;  %v276_v1 = vadd.f32 %v9513_v53, %v275_v49 }
 0x21f   :  { %v468_v24 = vadd.f32 %v9523_v4, %v467_v50 }
 0x221   :  { %v10302_v52 = vpop.f32.mrf.mxu1 }
 0x222   :  { %v10344_v54 = vpop.f32.mrf.mxu0  ;;  %v365_v6 = vadd.f32 %v10302_v52, %v9518_v55 }
 0x223   :  { %v359_v56 = vpop.f32.mrf.mxu1 }
 0x224   :  { %v360_v57 = vadd.f32 %v9518_v55, %v359_v56  ;;  %v649_v58 = vpop.f32.mrf.mxu0  ;;  %v11622_v17 = vmul.f32 0.35355338, %v365_v6 }
 0x225   :  { %v10305_v60 = vpop.f32.mrf.mxu1  ;;  %v650_v37 = vadd.f32 %v9533_v31, %v649_v58  ;;  %v11729_v58 = vld [vmem:[%s13118_s2] sm:$0xff] }
 0x226   :  { %v10347_v61 = vpop.f32.mrf.mxu0  ;;  %v378_v62 = vsel %vm43_vm15, %v266_v59, %v360_v57  ;;  %v375_v12 = vadd.f32 %v10305_v60, %v9518_v55  ;;  %v771_v21 = vmul.f32 %v11622_v17, %v11609_v5  ;;  %v998_v47 = vmul.f32 %v11622_v17, %v11657_v29 }
 0x227   :  { %v369_v63 = vpop.f32.mrf.mxu1  ;;  %v11603_v2 = vmul.f32 0.35355338, %v378_v62 }
 0x228   :  { %v370_v3 = vadd.f32 %v9518_v55, %v369_v63  ;;  %v11645_v26 = vmul.f32 0.35355338, %v375_v12  ;;  %v659_v39 = vpop.f32.mrf.mxu0  ;;  %v11736_v63 = vld [vmem:[%s13118_s2 + $0x8] sm:$0xff]  ;;  %v11752_v12 = vld [vmem:[%s13118_s2 + $0x18] sm:$0xff] }
 0x229   :  { %v10330_v7 = vpop.f32.mrf.mxu1  ;;  %v770_v10 = vmul.f32 %v11603_v2, %v11609_v5  ;;  %v997_v32 = vmul.f32 %v11603_v2, %v11657_v29  ;;  %v660_v48 = vadd.f32 %v9533_v31, %v659_v39 }
 0x22a   :  { %v380_v8 = vsel %vm43_vm15, %v276_v1, %v370_v3  ;;  %v11613_v9 = vadd.f32 %v10330_v7, %v9528_v0  ;;  %v773_v36 = vmul.f32 %v11645_v26, %v11609_v5  ;;  %v1000_v53 = vmul.f32 %v11645_v26, %v11657_v29 }
 0x22b   :  { %v551_v11 = vpop.f32.mrf.mxu1  ;;  %v11617_v15 = vmul.f32 0.35355338, %v380_v8  ;;  %10366 = vmatprep.mubr.msk.f32.mxu0 %vm75_vm0, %v770_v10 }
 0x22c   :  { %v552_v16 = vadd.f32 %v9528_v0, %v551_v11  ;;  %10362 = vmatprep.subr.msk.mxu0 %vm75_vm0, %v11613_v9 }
 0x22d   :  { %v10333_v18 = vpop.f32.mrf.mxu1  ;;  %10363 = vmatpush3.xpose.msk.msra.mxu0 %vm75_vm0, %v11613_v9  ;;  %v772_v23 = vmul.f32 %v11617_v15, %v11609_v5  ;;  %v999_v43 = vmul.f32 %v11617_v15, %v11657_v29 }
 0x22e   :  { %v11628_v19 = vsel %vm43_vm15, %v458_v14, %v552_v16  ;;  %v11630_v22 = vadd.f32 %v10333_v18, %v9528_v0  ;;  %v11746_v14 = vld [vmem:[%s13118_s2 + $0x10] sm:$0xff] }
 0x22f   :  { %v561_v20 = vpop.f32.mrf.mxu1  ;;  %10364 = vmatprep.subr.msk.mxu0 %vm75_vm0, %v11628_v19  ;;  %10373 = vmatprep.mubr.msk.f32.mxu1 %vm75_vm0, %v772_v23 }
 0x230   :  { %v562_v13 = vadd.f32 %v9528_v0, %v561_v20  ;;  %10369 = vmatprep.subr.msk.mxu1 %vm75_vm0, %v11630_v22 }
 0x231   :  { %v10358_v25 = vpop.f32.mrf.mxu1  ;;  %10365 = vmatpush3.xpose.msk.msra.mxu0 %vm75_vm0, %v11628_v19  ;;  %10370 = vmatpush3.xpose.msk.msra.mxu1 %vm75_vm0, %v11630_v22 }
 0x232   :  { %v11649_v27 = vsel %vm43_vm15, %v468_v24, %v562_v13  ;;  %10376 = vmatprep.subr.msk.mxu0 %vm75_vm0, %v11613_v9  ;;  %v11667_v33 = vadd.f32 %v10358_v25, %v9538_v28 }
 0x233   :  { %v743_v30 = vpop.f32.mrf.mxu1  ;;  %10371 = vmatprep.subr.msk.mxu1 %vm75_vm0, %v11649_v27 }
 0x234   :  { %10367 = vmatmul.mubr.msk.f32.vlgmr.msra.gmra.mxu0 %vm75_vm0, %v771_v21  ;;  %v744_v34 = vadd.f32 %v9538_v28, %v743_v30  ;;  %v1208_v46 = vmul.f32 %v11667_v33, %v11657_v29  ;;  %v11715_v54 = vmul.f32 %v11667_v33, %v11609_v5 }
 0x235   :  { %v10361_v35 = vpop.f32.mrf.mxu1  ;;  %10372 = vmatpush3.xpose.msk.msra.mxu1 %vm75_vm0, %v11649_v27  ;;  %10377 = vmatpush3.xpose.msk.msra.mxu0 %vm75_vm0, %v11613_v9 }
 0x236   :  { %10380 = vmatprep.mubr.msk.f32.mxu0 %vm75_vm0, %v997_v32  ;;  %10378 = vmatprep.subr.msk.mxu0 %vm75_vm0, %v11628_v19  ;;  %v11680_v40 = vadd.f32 %v10361_v35, %v9538_v28  ;;  %v11687_v44 = vsel %vm43_vm15, %v650_v37, %v744_v34 }
 0x237   :  { %10383 = vmatprep.subr.msk.mxu1 %vm75_vm0, %v11630_v22  ;;  %v753_v38 = vpop.f32.mrf.mxu1  ;;  %v1207_v49 = vmul.f32 %v11687_v44, %v11657_v29 }
 0x238   :  { %10374 = vmatmul.mubr.msk.f32.vlgmr.msra.gmra.mxu1 %vm75_vm0, %v773_v36  ;;  %v754_v45 = vadd.f32 %v9538_v28, %v753_v38  ;;  %v1210_v50 = vmul.f32 %v11680_v40, %v11657_v29  ;;  %v11723_v56 = vmul.f32 %v11680_v40, %v11609_v5 }
 0x239   :  { %10379 = vmatpush3.xpose.msk.msra.mxu0 %vm75_vm0, %v11628_v19  ;;  %10384 = vmatpush3.xpose.msk.msra.mxu1 %vm75_vm0, %v11630_v22 }
 0x23a   :  { %10387 = vmatprep.mubr.msk.f32.mxu1 %vm75_vm0, %v999_v43  ;;  %10385 = vmatprep.subr.msk.mxu1 %vm75_vm0, %v11649_v27  ;;  %v11707_v52 = vsel %vm43_vm15, %v660_v48, %v754_v45 }
 0x23b   :  { %10390 = vmatprep.subr.mxu0 %v1208_v46  ;;  %v1209_v55 = vmul.f32 %v11707_v52, %v11657_v29 }
 0x23c   :  { %10381 = vmatmul.mubr.msk.f32.vlgmr.msra.gmra.mxu0 %vm75_vm0, %v998_v47 }
 0x23d   :  { %10386 = vmatpush3.xpose.msk.msra.mxu1 %vm75_vm0, %v11649_v27  ;;  %10391 = vmatpush3.msra.mxu0 %v1208_v46 }
 0x23e   :  { %10392 = vmatprep.subr.mxu0 %v1207_v49  ;;  %10397 = vmatprep.subr.mxu1 %v1210_v50 }
 0x23f   :  { %10393 = vmatpush3.msra.mxu0 %v1207_v49 }
 0x240   :  { %10388 = vmatmul.mubr.msk.f32.vlgmr.msra.gmra.mxu1 %vm75_vm0, %v1000_v53  ;;  %10404 = vmatprep.subr.mxu0 %v11715_v54 }
 0x241   :  { %10398 = vmatpush3.msra.mxu1 %v1210_v50 }
 0x242   :  { %10399 = vmatprep.subr.mxu1 %v1209_v55 }
 0x243   :  { %10400 = vmatpush3.msra.mxu1 %v1209_v55 }
 0x244   :  { %10411 = vmatprep.subr.mxu1 %v11723_v56 }
 0x2f4   :  { %v10368_v57 = vpop.f32.mrf.mxu0 }
 0x2f5   :  { %v858_v10 = vadd.f32 %v10368_v57, %v11736_v63 }
 0x2f6   :  { %v852_v59 = vpop.f32.mrf.mxu0 }
 0x2f7   :  { %v853_v60 = vadd.f32 %v852_v59, %v11729_v58  ;;  %v952_v24 = vsel %vm948_vm5, %v858_v10, -inf }
 0x2f8   :  { %v10375_v62 = vpop.f32.mrf.mxu1 }
 0x2f9   :  { %v949_v61 = vsel %vm948_vm5, %v853_v60, -inf  ;;  %v945_v25 = vadd.f32 %v10375_v62, %v11752_v12 }
 0x2fa   :  { %950 = vmax.xlane.f32.xlu0 %v949_v61  ;;  %v939_v3 = vpop.f32.mrf.mxu1 }
 0x2fb   :  { %v940_v23 = vadd.f32 %v939_v3, %v11746_v14  ;;  %v958_v30 = vsel %vm948_vm5, %v945_v25, -inf }
 0x2fc   :  { %v10382_v0 = vpop.f32.mrf.mxu0 }
 0x2fd   :  { %v1079_v1 = vadd.f32 %v10382_v0, %v11736_v63  ;;  %v955_v28 = vsel %vm948_vm5, %v940_v23, -inf }
 0x2fe   :  { %v1073_v4 = vpop.f32.mrf.mxu0 }
 0x2ff   :  { %v1074_v6 = vadd.f32 %v1073_v4, %v11729_v58  ;;  %v1166_v7 = vsel %vm948_vm5, %v1079_v1, -inf }
 0x300   :  { %1167 = vmax.xlane.f32.xlu1 %v1166_v7  ;;  %v10389_v8 = vpop.f32.mrf.mxu1 }
 0x301   :  { %v1163_v11 = vsel %vm948_vm5, %v1074_v6, -inf  ;;  %v1160_v20 = vadd.f32 %v10389_v8, %v11752_v12 }
 0x302   :  { %1164 = vmax.xlane.f32.xlu0 %v1163_v11  ;;  %v1154_v16 = vpop.f32.mrf.mxu1 }
 0x303   :  { %v1155_v18 = vadd.f32 %v1154_v16, %v11746_v14  ;;  %v1172_v21 = vsel %vm948_vm5, %v1160_v20, -inf }
 0x305   :  { %v1169_v13 = vsel %vm948_vm5, %v1155_v18, -inf }
 0x306   :  { %953 = vmax.xlane.f32.xlu0 %v952_v24  ;;  %1170 = vmax.xlane.f32.xlu1 %v1169_v13 }
 0x30a   :  { %1173 = vmax.xlane.f32.xlu1 %v1172_v21  ;;  %956 = vmax.xlane.f32.xlu0 %v955_v28 }
 0x30e   :  { %959 = vmax.xlane.f32.xlu1 %v958_v30 }
 0x383   :  { %v951_v31 = vpop.xlane.xlu0 %950 }
 0x384   :  { %v961_v32 = vsub.f32 %v853_v60, %v951_v31 }
 0x386   :  { %v965_v34 = vmul.f32 1.442695, %v961_v32 }
 0x388   :  { %11050 = vpow2.f32 %v965_v34 }
 0x389   :  { %v1168_v35 = vpop.xlane.xlu1 %1167 }
 0x38a   :  { %v1176_v36 = vsub.f32 %v1079_v1, %v1168_v35 }
 0x38b   :  { %v1165_v37 = vpop.xlane.xlu0 %1164 }
 0x38c   :  { %v1181_v38 = vmul.f32 1.442695, %v1176_v36  ;;  %v1175_v39 = vsub.f32 %v1074_v6, %v1165_v37 }
 0x38e   :  { %11052 = vpow2.f32 %v1181_v38  ;;  %v1179_v43 = vmul.f32 1.442695, %v1175_v39 }
 0x38f   :  { %v954_v45 = vpop.xlane.xlu0 %953  ;;  %v1171_v46 = vpop.xlane.xlu1 %1170 }
 0x390   :  { %11054 = vpow2.f32 %v1179_v43  ;;  %v962_v47 = vsub.f32 %v858_v10, %v954_v45  ;;  %v1177_v48 = vsub.f32 %v1155_v18, %v1171_v46 }
 0x392   :  { %v967_v49 = vmul.f32 1.442695, %v962_v47  ;;  %v1183_v50 = vmul.f32 1.442695, %v1177_v48 }
 0x393   :  { %v1174_v53 = vpop.xlane.xlu1 %1173  ;;  %v957_v55 = vpop.xlane.xlu0 %956 }
 0x394   :  { %11056 = vpow2.f32 %v967_v49  ;;  %v1178_v57 = vsub.f32 %v1160_v20, %v1174_v53  ;;  %v963_v59 = vsub.f32 %v940_v23, %v957_v55 }
 0x395   :  { %v11051_v60 = vpop.eup %11050  ;;  %11058 = vpow2.f32 %v1183_v50  ;;  %v993_v50 = vmul.f32 %v11687_v44, %v11609_v5 }
 0x396   :  { %v1185_v61 = vmul.f32 1.442695, %v1178_v57  ;;  %v969_v62 = vmul.f32 1.442695, %v963_v59  ;;  %v973_v0 = vsel %vm948_vm5, %v11051_v60, 0.0  ;;  %v1535_v59 = vmul.f32 %v11603_v2, %v11584_v41 }
 0x397   :  { %v960_v1 = vpop.xlane.xlu1 %959  ;;  %974 = vadd.xlane.f32.xlu0 %v973_v0  ;;  %v995_v0 = vmul.f32 %v11707_v52, %v11609_v5 }
 0x398   :  { %11060 = vpow2.f32 %v1185_v61  ;;  %v964_v3 = vsub.f32 %v945_v25, %v960_v1 }
 0x399   :  { %11062 = vpow2.f32 %v969_v62 }
 0x39a   :  { %v971_v4 = vmul.f32 1.442695, %v964_v3  ;;  %v1746_v3 = vmul.f32 %v11667_v33, %v11584_v41 }
 0x39b   :  { %v11053_v6 = vpop.eup %11052 }
 0x39c   :  { %11064 = vpow2.f32 %v971_v4  ;;  %v1190_v7 = vsel %vm948_vm5, %v11053_v6, 0.0 }
 0x39d   :  { %v11055_v8 = vpop.eup %11054  ;;  %1191 = vadd.xlane.f32.xlu1 %v1190_v7  ;;  %v1745_v7 = vmul.f32 %v11687_v44, %v11584_v41 }
 0x39e   :  { %v1187_v10 = vsel %vm948_vm5, %v11055_v8, 0.0 }
 0x39f   :  { %1188 = vadd.xlane.f32.xlu0 %v1187_v10  ;;  %v1538_v10 = vmul.f32 %v11645_v26, %v11584_v41 }
 0x3a1   :  { %v11057_v11 = vpop.eup %11056 }
 0x3a2   :  { %v11059_v16 = vpop.eup %11058  ;;  %v976_v18 = vsel %vm948_vm5, %v11057_v11, 0.0 }
 0x3a3   :  { %v1193_v23 = vsel %vm948_vm5, %v11059_v16, 0.0  ;;  %977 = vadd.xlane.f32.xlu0 %v976_v18 }
 0x3a4   :  { %1194 = vadd.xlane.f32.xlu1 %v1193_v23 }
 0x3a5   :  { %v11061_v20 = vpop.eup %11060 }
 0x3a6   :  { %v11063_v24 = vpop.eup %11062  ;;  %v1196_v13 = vsel %vm948_vm5, %v11061_v20, 0.0 }
 0x3a7   :  { %v979_v25 = vsel %vm948_vm5, %v11063_v24, 0.0 }
 0x3a8   :  { %1197 = vadd.xlane.f32.xlu1 %v1196_v13  ;;  %980 = vadd.xlane.f32.xlu0 %v979_v25 }
 0x3a9   :  { %v11065_v21 = vpop.eup %11064 }
 0x3aa   :  { %v982_v28 = vsel %vm948_vm5, %v11065_v21, 0.0 }
 0x3ac   :  { %983 = vadd.xlane.f32.xlu1 %v982_v28 }
 0x420   :  { %v975_v30 = vpop.xlane.xlu0 %974 }
 0x421   :  { %11066 = vrcp.f32 %v975_v30 }
 0x426   :  { %v1192_v31 = vpop.xlane.xlu1 %1191 }
 0x427   :  { %11068 = vrcp.f32 %v1192_v31 }
 0x428   :  { %v1189_v32 = vpop.xlane.xlu0 %1188 }
 0x429   :  { %11070 = vrcp.f32 %v1189_v32 }
 0x42c   :  { %v978_v34 = vpop.xlane.xlu0 %977 }
 0x42d   :  { %v1195_v35 = vpop.xlane.xlu1 %1194  ;;  %11072 = vrcp.f32 %v978_v34 }
 0x42e   :  { %11074 = vrcp.f32 %v1195_v35  ;;  %v11067_v38 = vpop.eup %11066 }
 0x42f   :  { %v989_v48 = vmul.f32 %v11067_v38, %v11051_v60 }
 0x431   :  { %v1198_v36 = vpop.xlane.xlu1 %1197  ;;  %v981_v37 = vpop.xlane.xlu0 %980 }
 0x432   :  { %11076 = vrcp.f32 %v1198_v36 }
 0x433   :  { %11078 = vrcp.f32 %v981_v37 }
 0x434   :  { %v11069_v39 = vpop.eup %11068 }
 0x435   :  { %v984_v43 = vpop.xlane.xlu1 %983  ;;  %v1204_v47 = vmul.f32 %v11069_v39, %v11053_v6  ;;  %v1536_v6 = vmul.f32 %v11622_v17, %v11584_v41 }
 0x436   :  { %v11071_v45 = vpop.eup %11070  ;;  %11080 = vrcp.f32 %v984_v43 }
 0x437   :  { %v1203_v46 = vmul.f32 %v11071_v45, %v11055_v8  ;;  %v1748_v8 = vmul.f32 %v11680_v40, %v11584_v41 }
 0x439   :  { %10394 = vmatprep.mubr.msk.f32.mxu0 %vm948_vm5, %v1203_v46 }
 0x43a   :  { %v11073_v49 = vpop.eup %11072  ;;  %10395 = vmatmul.mubr.msk.f32.vlgmr.msra.gmra.mxu0 %vm948_vm5, %v1204_v47 }
 0x43b   :  { %v11075_v53 = vpop.eup %11074  ;;  %10405 = vmatpush3.msra.mxu0 %v11715_v54  ;;  %10408 = vmatprep.mubr.msk.f32.mxu0 %vm948_vm5, %v989_v48  ;;  %v990_v55 = vmul.f32 %v11073_v49, %v11057_v11  ;;  %v1747_v11 = vmul.f32 %v11707_v52, %v11584_v41 }
 0x43c   :  { %10406 = vmatprep.subr.mxu0 %v993_v50  ;;  %v1205_v57 = vmul.f32 %v11075_v53, %v11059_v16 }
 0x43d   :  { %10407 = vmatpush3.msra.mxu0 %v993_v50 }
 0x43e   :  { %10401 = vmatprep.mubr.msk.f32.mxu1 %vm948_vm5, %v1205_v57  ;;  %10418 = vmatprep.subr.msk.mxu0 %vm75_vm0, %v11613_v9 }
 0x43f   :  { %v11077_v60 = vpop.eup %11076  ;;  %10409 = vmatmul.mubr.msk.f32.vlgmr.msra.gmra.mxu0 %vm948_vm5, %v990_v55 }
 0x440   :  { %v11079_v61 = vpop.eup %11078  ;;  %10419 = vmatpush3.xpose.msk.msra.mxu0 %vm75_vm0, %v11613_v9  ;;  %10422 = vmatprep.mubr.msk.f32.mxu0 %vm75_vm0, %v1535_v59  ;;  %v1206_v54 = vmul.f32 %v11077_v60, %v11061_v20 }
 0x441   :  { %10420 = vmatprep.subr.msk.mxu0 %vm75_vm0, %v11628_v19  ;;  %v991_v62 = vmul.f32 %v11079_v61, %v11063_v24 }
 0x442   :  { %10402 = vmatmul.mubr.msk.f32.vlgmr.msra.gmra.mxu1 %vm948_vm5, %v1206_v54 }
 0x443   :  { %v11081_v1 = vpop.eup %11080  ;;  %10412 = vmatpush3.msra.mxu1 %v11723_v56  ;;  %10415 = vmatprep.mubr.msk.f32.mxu1 %vm948_vm5, %v991_v62  ;;  %v1537_v56 = vmul.f32 %v11617_v15, %v11584_v41 }
 0x444   :  { %10413 = vmatprep.subr.mxu1 %v995_v0  ;;  %10421 = vmatpush3.xpose.msk.msra.mxu0 %vm75_vm0, %v11628_v19  ;;  %v992_v4 = vmul.f32 %v11081_v1, %v11065_v21 }
 0x445   :  { %10414 = vmatpush3.msra.mxu1 %v995_v0  ;;  %10432 = vmatprep.subr.mxu0 %v1746_v3 }
 0x446   :  { %10425 = vmatprep.subr.msk.mxu1 %vm75_vm0, %v11630_v22  ;;  %10416 = vmatmul.mubr.msk.f32.vlgmr.msra.gmra.mxu1 %vm948_vm5, %v992_v4 }
 0x447   :  { %10423 = vmatmul.mubr.msk.f32.vlgmr.msra.gmra.mxu0 %vm75_vm0, %v1536_v6  ;;  %10426 = vmatpush3.xpose.msk.msra.mxu1 %vm75_vm0, %v11630_v22 }
 0x448   :  { %10427 = vmatprep.subr.msk.mxu1 %vm75_vm0, %v11649_v27  ;;  %10429 = vmatprep.mubr.msk.f32.mxu1 %vm75_vm0, %v1537_v56 }
 0x449   :  { %10433 = vmatpush3.msra.mxu0 %v1746_v3 }
 0x44a   :  { %10434 = vmatprep.subr.mxu0 %v1745_v7 }
 0x44b   :  { %10435 = vmatpush3.msra.mxu0 %v1745_v7  ;;  %10428 = vmatpush3.xpose.msk.msra.mxu1 %vm75_vm0, %v11649_v27 }
 0x44c   :  { %10446 = vmatprep.subr.msk.mxu0 %vm75_vm0, %v11613_v9  ;;  %10439 = vmatprep.subr.mxu1 %v1748_v8 }
 0x44e   :  { %10430 = vmatmul.mubr.msk.f32.vlgmr.msra.gmra.mxu1 %vm75_vm0, %v1538_v10 }
 0x44f   :  { %10440 = vmatpush3.msra.mxu1 %v1748_v8 }
 0x450   :  { %10441 = vmatprep.subr.mxu1 %v1747_v11 }
 0x451   :  { %10442 = vmatpush3.msra.mxu1 %v1747_v11 }
 0x452   :  { %10453 = vmatprep.subr.msk.mxu1 %vm75_vm0, %v11630_v22 }
 0x4fa   :  { %v10396_v16 = vpop.f32.mrf.mxu0 }
 0x4fc   :  { %v1283_v18 = vpop.f32.mrf.mxu0 }
 0x4ff   :  { %v10410_v23 = vpop.f32.mrf.mxu0 }
 0x500   :  { %v11824_v20 = vadd.f32 %v10410_v23, %v10396_v16 }
 0x501   :  { %v1445_v24 = vpop.f32.mrf.mxu0 }
 0x502   :  { %v11826_v13 = vadd.f32 %v1445_v24, %v1283_v18  ;;  %v10403_v25 = vpop.f32.mrf.mxu1 }
 0x504   :  { %v1364_v21 = vpop.f32.mrf.mxu1 }
 0x506   :  { %v10417_v28 = vpop.f32.mrf.mxu1 }
 0x507   :  { %v11828_v30 = vadd.f32 %v10417_v28, %v10403_v25  ;;  %v10424_v31 = vpop.f32.mrf.mxu0 }
 0x508   :  { %v1617_v32 = vadd.f32 %v10424_v31, %v11736_v63  ;;  %v1526_v34 = vpop.f32.mrf.mxu1 }
 0x509   :  { %v11831_v35 = vadd.f32 %v1526_v34, %v1364_v21  ;;  %v1611_v36 = vpop.f32.mrf.mxu0  ;;  %v1915_v34 = vmul.f32 %v11603_v2, %v11587_v42 }
 0x50a   :  { %v1612_v37 = vadd.f32 %v1611_v36, %v11729_v58  ;;  %v1704_v38 = vsel %vm948_vm5, %v1617_v32, -inf }
 0x50b   :  { %1705 = vmax.xlane.f32.xlu1 %v1704_v38  ;;  %v2126_v38 = vmul.f32 %v11667_v33, %v11587_v42 }
 0x50c   :  { %v1701_v39 = vsel %vm948_vm5, %v1612_v37, -inf }
 0x50d   :  { %1702 = vmax.xlane.f32.xlu0 %v1701_v39 }
 0x50e   :  { %v10431_v43 = vpop.f32.mrf.mxu1 }
 0x50f   :  { %v1698_v45 = vadd.f32 %v10431_v43, %v11752_v12  ;;  %v1916_v43 = vmul.f32 %v11622_v17, %v11587_v42  ;;  %v2125_v17 = vmul.f32 %v11687_v44, %v11587_v42 }
 0x510   :  { %v1692_v46 = vpop.f32.mrf.mxu1 }
 0x511   :  { %v1693_v47 = vadd.f32 %v1692_v46, %v11746_v14  ;;  %v1710_v48 = vsel %vm948_vm5, %v1698_v45, -inf }
 0x512   :  { %1711 = vmax.xlane.f32.xlu1 %v1710_v48 }
 0x513   :  { %v1707_v49 = vsel %vm948_vm5, %v1693_v47, -inf }
 0x514   :  { %1708 = vmax.xlane.f32.xlu0 %v1707_v49 }
 0x594   :  { %v1706_v50 = vpop.xlane.xlu1 %1705 }
 0x595   :  { %v1714_v53 = vsub.f32 %v1617_v32, %v1706_v50 }
 0x596   :  { %v1703_v55 = vpop.xlane.xlu0 %1702 }
 0x597   :  { %v1719_v57 = vmul.f32 1.442695, %v1714_v53  ;;  %v1713_v59 = vsub.f32 %v1612_v37, %v1703_v55 }
 0x599   :  { %11082 = vpow2.f32 %v1719_v57  ;;  %v1717_v60 = vmul.f32 1.442695, %v1713_v59 }
 0x59b   :  { %11084 = vpow2.f32 %v1717_v60  ;;  %v1712_v61 = vpop.xlane.xlu1 %1711 }
 0x59c   :  { %v1716_v54 = vsub.f32 %v1698_v45, %v1712_v61 }
 0x59d   :  { %v1709_v62 = vpop.xlane.xlu0 %1708 }
 0x59e   :  { %v1723_v0 = vmul.f32 1.442695, %v1716_v54  ;;  %v1715_v1 = vsub.f32 %v1693_v47, %v1709_v62 }
 0x5a0   :  { %11086 = vpow2.f32 %v1723_v0  ;;  %v1721_v3 = vmul.f32 1.442695, %v1715_v1 }
 0x5a2   :  { %11088 = vpow2.f32 %v1721_v3 }
 0x5a6   :  { %v11083_v4 = vpop.eup %11082 }
 0x5a7   :  { %v1728_v6 = vsel %vm948_vm5, %v11083_v4, 0.0 }
 0x5a8   :  { %v11085_v56 = vpop.eup %11084  ;;  %1729 = vadd.xlane.f32.xlu1 %v1728_v6 }
 0x5a9   :  { %v1725_v7 = vsel %vm948_vm5, %v11085_v56, 0.0 }
 0x5aa   :  { %1726 = vadd.xlane.f32.xlu0 %v1725_v7 }
 0x5ad   :  { %v11087_v8 = vpop.eup %11086 }
 0x5ae   :  { %v1734_v10 = vsel %vm948_vm5, %v11087_v8, 0.0 }
 0x5af   :  { %v11089_v11 = vpop.eup %11088  ;;  %1735 = vadd.xlane.f32.xlu1 %v1734_v10 }
 0x5b0   :  { %v1731_v16 = vsel %vm948_vm5, %v11089_v11, 0.0 }
 0x5b1   :  { %1732 = vadd.xlane.f32.xlu0 %v1731_v16 }
 0x631   :  { %v1730_v18 = vpop.xlane.xlu1 %1729 }
 0x632   :  { %11090 = vrcp.f32 %v1730_v18 }
 0x633   :  { %v1727_v23 = vpop.xlane.xlu0 %1726 }
 0x634   :  { %11092 = vrcp.f32 %v1727_v23  ;;  %v2298_v23 = vld [vmem:[#allocation2 + $0x168] sm:$0xff] }
 0x638   :  { %v1736_v24 = vpop.xlane.xlu1 %1735 }
 0x639   :  { %11094 = vrcp.f32 %v1736_v24 }
 0x63a   :  { %v1733_v25 = vpop.xlane.xlu0 %1732 }
 0x63b   :  { %11096 = vrcp.f32 %v1733_v25 }
 0x63f   :  { %v11091_v21 = vpop.eup %11090 }
 0x640   :  { %v1742_v32 = vmul.f32 %v11091_v21, %v11083_v4 }
 0x641   :  { %v11093_v28 = vpop.eup %11092 }
 0x642   :  { %v1741_v31 = vmul.f32 %v11093_v28, %v11085_v56 }
 0x644   :  { %10436 = vmatprep.mubr.msk.f32.mxu0 %vm948_vm5, %v1741_v31 }
 0x645   :  { %10437 = vmatmul.mubr.msk.f32.vlgmr.msra.gmra.mxu0 %vm948_vm5, %v1742_v32 }
 0x646   :  { %10447 = vmatpush3.xpose.msk.msra.mxu0 %vm75_vm0, %v11613_v9  ;;  %10450 = vmatprep.mubr.msk.f32.mxu0 %vm75_vm0, %v1915_v34  ;;  %v11095_v36 = vpop.eup %11094  ;;  %v1917_v9 = vmul.f32 %v11617_v15, %v11587_v42  ;;  %v1918_v15 = vmul.f32 %v11645_v26, %v11587_v42 }
 0x647   :  { %10448 = vmatprep.subr.msk.mxu0 %vm75_vm0, %v11628_v19  ;;  %v1744_v2 = vmul.f32 %v11095_v36, %v11087_v8 }
 0x648   :  { %v11097_v37 = vpop.eup %11096 }
 0x649   :  { %v1743_v39 = vmul.f32 %v11097_v37, %v11089_v11 }
 0x64a   :  { %10449 = vmatpush3.xpose.msk.msra.mxu0 %vm75_vm0, %v11628_v19  ;;  %v2128_v19 = vmul.f32 %v11680_v40, %v11587_v42 }
 0x64b   :  { %10460 = vmatprep.subr.mxu0 %v2126_v38  ;;  %10443 = vmatprep.mubr.msk.f32.mxu1 %vm948_vm5, %v1743_v39 }
 0x64c   :  { %10444 = vmatmul.mubr.msk.f32.vlgmr.msra.gmra.mxu1 %vm948_vm5, %v1744_v2 }
 0x64d   :  { %10451 = vmatmul.mubr.msk.f32.vlgmr.msra.gmra.mxu0 %vm75_vm0, %v1916_v43  ;;  %10454 = vmatpush3.xpose.msk.msra.mxu1 %vm75_vm0, %v11630_v22  ;;  %v2127_v22 = vmul.f32 %v11707_v52, %v11587_v42  ;;  %v2297_v43 = vld [vmem:[#allocation2 + $0x100] sm:$0xff] }
 0x64e   :  { %10455 = vmatprep.subr.msk.mxu1 %vm75_vm0, %v11649_v27  ;;  %10457 = vmatprep.mubr.msk.f32.mxu1 %vm75_vm0, %v1917_v9  ;;  %v2296_v9 = vld [vmem:[#allocation2 + $0x98] sm:$0xff] }
 0x64f   :  { %10461 = vmatpush3.msra.mxu0 %v2126_v38 }
 0x650   :  { %10462 = vmatprep.subr.mxu0 %v2125_v17 }
 0x651   :  { %10463 = vmatpush3.msra.mxu0 %v2125_v17  ;;  %10456 = vmatpush3.xpose.msk.msra.mxu1 %vm75_vm0, %v11649_v27  ;;  %v2295_v17 = vld [vmem:[#allocation2 + $0x30] sm:$0xff] }
 0x652   :  { %10467 = vmatprep.subr.mxu1 %v2128_v19  ;;  %10474 = vmatprep.subr.mxu0 %v2298_v23 }
 0x654   :  { %10458 = vmatmul.mubr.msk.f32.vlgmr.msra.gmra.mxu1 %vm75_vm0, %v1918_v15 }
 0x655   :  { %10468 = vmatpush3.msra.mxu1 %v2128_v19 }
 0x656   :  { %10469 = vmatprep.subr.mxu1 %v2127_v22 }
 0x657   :  { %10470 = vmatpush3.msra.mxu1 %v2127_v22 }
 0x705   :  { %v10438_v33 = vpop.f32.mrf.mxu0 }
 0x706   :  { %v11881_v44 = vadd.f32 %v10438_v33, %v11824_v20 }
 0x707   :  { %v1821_v40 = vpop.f32.mrf.mxu0 }
 0x708   :  { %v11884_v45 = vadd.f32 %v1821_v40, %v11826_v13 }
 0x70c   :  { %v10445_v27 = vpop.f32.mrf.mxu1 }
 0x70d   :  { %v11887_v26 = vadd.f32 %v10445_v27, %v11828_v30  ;;  %v10452_v46 = vpop.f32.mrf.mxu0 }
 0x70e   :  { %v1997_v47 = vadd.f32 %v10452_v46, %v11736_v63  ;;  %v1902_v48 = vpop.f32.mrf.mxu1 }
 0x70f   :  { %v11891_v52 = vadd.f32 %v1902_v48, %v11831_v35  ;;  %v1991_v49 = vpop.f32.mrf.mxu0 }
 0x710   :  { %v1992_v50 = vadd.f32 %v1991_v49, %v11729_v58  ;;  %v2084_v20 = vsel %vm948_vm5, %v1997_v47, -inf }
 0x711   :  { %2085 = vmax.xlane.f32.xlu1 %v2084_v20 }
 0x712   :  { %v2081_v13 = vsel %vm948_vm5, %v1992_v50, -inf }
 0x713   :  { %2082 = vmax.xlane.f32.xlu0 %v2081_v13 }
 0x714   :  { %v10459_v53 = vpop.f32.mrf.mxu1 }
 0x715   :  { %v2078_v30 = vadd.f32 %v10459_v53, %v11752_v12 }
 0x716   :  { %v2072_v55 = vpop.f32.mrf.mxu1 }
 0x717   :  { %v2073_v57 = vadd.f32 %v2072_v55, %v11746_v14  ;;  %v2090_v63 = vsel %vm948_vm5, %v2078_v30, -inf }
 0x718   :  { %2091 = vmax.xlane.f32.xlu1 %v2090_v63 }
 0x719   :  { %v2087_v35 = vsel %vm948_vm5, %v2073_v57, -inf }
 0x71a   :  { %2088 = vmax.xlane.f32.xlu0 %v2087_v35  ;;  %v11404_v35 = vld [vmem:[%s13116_s0 + $0x18] sm:$0xff] }
 0x79a   :  { %v2086_v59 = vpop.xlane.xlu1 %2085 }
 0x79b   :  { %v2094_v58 = vsub.f32 %v1997_v47, %v2086_v59 }
 0x79c   :  { %v2083_v60 = vpop.xlane.xlu0 %2082 }
 0x79d   :  { %v2099_v61 = vmul.f32 1.442695, %v2094_v58  ;;  %v2093_v54 = vsub.f32 %v1992_v50, %v2083_v60  ;;  %v11402_v50 = vld [vmem:[%s13116_s0 + $0x8] sm:$0xff]  ;;  %v11405_v60 = vld [vmem:[%s13116_s0 + $0x10] sm:$0xff] }
 0x79f   :  { %11098 = vpow2.f32 %v2099_v61  ;;  %v2097_v62 = vmul.f32 1.442695, %v2093_v54 }
 0x7a1   :  { %11100 = vpow2.f32 %v2097_v62  ;;  %v2092_v0 = vpop.xlane.xlu1 %2091 }
 0x7a2   :  { %v2096_v1 = vsub.f32 %v2078_v30, %v2092_v0 }
 0x7a3   :  { %v2089_v12 = vpop.xlane.xlu0 %2088 }
 0x7a4   :  { %v2103_v3 = vmul.f32 1.442695, %v2096_v1  ;;  %v2095_v4 = vsub.f32 %v2073_v57, %v2089_v12 }
 0x7a6   :  { %11102 = vpow2.f32 %v2103_v3  ;;  %v2101_v14 = vmul.f32 1.442695, %v2095_v4 }
 0x7a8   :  { %11104 = vpow2.f32 %v2101_v14 }
 0x7ac   :  { %v11099_v6 = vpop.eup %11098 }
 0x7ad   :  { %v2108_v56 = vsel %vm948_vm5, %v11099_v6, 0.0 }
 0x7ae   :  { %v11101_v7 = vpop.eup %11100  ;;  %2109 = vadd.xlane.f32.xlu1 %v2108_v56 }
 0x7af   :  { %v2105_v8 = vsel %vm948_vm5, %v11101_v7, 0.0 }
 0x7b0   :  { %2106 = vadd.xlane.f32.xlu0 %v2105_v8 }
 0x7b3   :  { %v11103_v10 = vpop.eup %11102 }
 0x7b4   :  { %v2114_v11 = vsel %vm948_vm5, %v11103_v10, 0.0 }
 0x7b5   :  { %v11105_v16 = vpop.eup %11104  ;;  %2115 = vadd.xlane.f32.xlu1 %v2114_v11 }
 0x7b6   :  { %v2111_v18 = vsel %vm948_vm5, %v11105_v16, 0.0 }
 0x7b7   :  { %2112 = vadd.xlane.f32.xlu0 %v2111_v18 }
 0x837   :  { %v2110_v24 = vpop.xlane.xlu1 %2109 }
 0x838   :  { %11106 = vrcp.f32 %v2110_v24 }
 0x839   :  { %v2107_v25 = vpop.xlane.xlu0 %2106 }
 0x83a   :  { %11108 = vrcp.f32 %v2107_v25 }
 0x83e   :  { %v2116_v21 = vpop.xlane.xlu1 %2115 }
 0x83f   :  { %11110 = vrcp.f32 %v2116_v21 }
 0x840   :  { %v2113_v28 = vpop.xlane.xlu0 %2112 }
 0x841   :  { %11112 = vrcp.f32 %v2113_v28 }
 0x845   :  { %v11107_v31 = vpop.eup %11106 }
 0x846   :  { %v2122_v36 = vmul.f32 %v11107_v31, %v11099_v6 }
 0x847   :  { %v11109_v32 = vpop.eup %11108 }
 0x848   :  { %v2121_v34 = vmul.f32 %v11109_v32, %v11101_v7  ;;  %v2511_v32 = vld [vmem:[#allocation2 + $0x170] sm:$0xff] }
 0x849   :  { %10488 = vmatprep.subr.mxu1 %v2511_v32 }
 0x84a   :  { %10464 = vmatprep.mubr.msk.f32.mxu0 %vm948_vm5, %v2121_v34  ;;  %v2617_v34 = vld [vmem:[#allocation2 + $0x178] sm:$0xff] }
 0x84b   :  { %10465 = vmatmul.mubr.msk.f32.vlgmr.msra.gmra.mxu0 %vm948_vm5, %v2122_v36  ;;  %v2510_v36 = vld [vmem:[#allocation2 + $0x108] sm:$0xff] }
 0x84c   :  { %10475 = vmatpush3.msra.mxu0 %v2298_v23  ;;  %v11111_v37 = vpop.eup %11110 }
 0x84d   :  { %v2124_v2 = vmul.f32 %v11111_v37, %v11103_v10  ;;  %10476 = vmatprep.subr.mxu0 %v2297_v43  ;;  %v2616_v37 = vld [vmem:[#allocation2 + $0x110] sm:$0xff] }
 0x84e   :  { %v11113_v38 = vpop.eup %11112  ;;  %10477 = vmatpush3.msra.mxu0 %v2297_v43  ;;  %v2614_v43 = vld [vmem:[#allocation2 + $0x40] sm:$0xff] }
 0x84f   :  { %v2123_v39 = vmul.f32 %v11113_v38, %v11105_v16  ;;  %10478 = vmatprep.subr.mxu0 %v2296_v9  ;;  %v2509_v38 = vld [vmem:[#allocation2 + $0xa0] sm:$0xff] }
 0x850   :  { %10479 = vmatpush3.msra.mxu0 %v2296_v9  ;;  %v11974_v9 = vld [vmem:[%s13117_s1] sm:$0xff] }
 0x851   :  { %10471 = vmatprep.mubr.msk.f32.mxu1 %vm948_vm5, %v2123_v39  ;;  %10480 = vmatprep.subr.mxu0 %v2295_v17  ;;  %v2615_v39 = vld [vmem:[#allocation2 + $0xa8] sm:$0xff] }
 0x852   :  { %10472 = vmatmul.mubr.msk.f32.vlgmr.msra.gmra.mxu1 %vm948_vm5, %v2124_v2  ;;  %10481 = vmatpush3.msra.mxu0 %v2295_v17  ;;  %v2508_v2 = vld [vmem:[#allocation2 + $0x38] sm:$0xff]  ;;  %v11981_v17 = vld [vmem:[%s13117_s1 + $0x8] sm:$0xff] }
 0x853   :  { %10502 = vmatprep.subr.mxu0 %v2617_v34  ;;  %10489 = vmatpush3.msra.mxu1 %v2511_v32 }
 0x854   :  { %10490 = vmatprep.subr.mxu1 %v2510_v36 }
 0x855   :  { %10491 = vmatpush3.msra.mxu1 %v2510_v36 }
 0x856   :  { %10492 = vmatprep.subr.mxu1 %v2509_v38 }
 0x857   :  { %10493 = vmatpush3.msra.mxu1 %v2509_v38 }
 0x858   :  { %10494 = vmatprep.subr.mxu1 %v2508_v2 }
 0x859   :  { %10495 = vmatpush3.msra.mxu1 %v2508_v2 }
 0x90b   :  { %v10466_v19 = vpop.f32.mrf.mxu0 }
 0x90c   :  { %v2292_v33 = vadd.f32 %v10466_v19, %v11881_v44  ;;  %v11985_v19 = vld [vmem:[#allocation2 + $0x180] sm:$0xff] }
 0x90d   :  { %v2201_v15 = vpop.f32.mrf.mxu0  ;;  %10513 = vmatprep.subr.mxu1 %v11985_v19 }
 0x90e   :  { %v2291_v22 = vadd.f32 %v2201_v15, %v11884_v45  ;;  %v9591_v45 = vld [vmem:[%s13120_s4 + $0x6] ss:$0 sm:$0xff] }
 0x910   :  { %10482 = vmatprep.mubr.msk.f32.mxu0 %vm75_vm0, %v2291_v22 }
 0x911   :  { %10483 = vmatmul.mubr.msk.f32.vlgmr.msra.gmra.mxu0 %vm75_vm0, %v2292_v33 }
 0x912   :  { %v10473_v40 = vpop.f32.mrf.mxu1  ;;  %10503 = vmatpush3.msra.mxu0 %v2617_v34 }
 0x913   :  { %v2294_v47 = vadd.f32 %v10473_v40, %v11887_v26  ;;  %v11403_v26 = vld [vmem:[%s13116_s0] sm:$0xff]  ;;  %10504 = vmatprep.subr.mxu0 %v2616_v37 }
 0x914   :  { %v2282_v27 = vpop.f32.mrf.mxu1  ;;  %10505 = vmatpush3.msra.mxu0 %v2616_v37 }
 0x915   :  { %v2293_v46 = vadd.f32 %v2282_v27, %v11891_v52  ;;  %10506 = vmatprep.subr.mxu0 %v2615_v39 }
 0x916   :  { %10507 = vmatpush3.msra.mxu0 %v2615_v39 }
 0x917   :  { %10485 = vmatprep.mubr.msk.f32.mxu0 %vm75_vm0, %v2293_v46  ;;  %10508 = vmatprep.subr.mxu0 %v2614_v43 }
 0x918   :  { %10486 = vmatmul.mubr.msk.f32.gmra.mxu0 %vm75_vm0, %v2294_v47 }
 0x919   :  { %10509 = vmatpush3.msra.mxu0 %v2614_v43  ;;  %10510 = vmatprep.mubr.msk.f32.mxu0 %vm75_vm0, %v11974_v9 }
 0x91c   :  { %10511 = vmatmul.mubr.msk.f32.vlgmr.msra.gmra.mxu0 %vm75_vm0, %v11981_v17 }
 0x9d1   :  { %v10484_v48 = vpop.f32.mrf.mxu0 }
 0x9d2   :  { %v2388_v44 = vadd.f32 %v10484_v48, %v9591_v45 }
 0x9d3   :  { %v2382_v49 = vpop.f32.mrf.mxu0 }
 0x9d4   :  { %v11922_v20 = vadd.f32 %v11402_v50, %v2388_v44  ;;  %v2383_v52 = vadd.f32 %v9591_v45, %v2382_v49 }
 0x9d6   :  { %v11927_v13 = vadd.f32 %v11403_v26, %v2383_v52  ;;  %v2411_v53 = vsel %vm75_vm0, %v11922_v20, 0.0 }
 0x9d7   :  { %2412 = vadd.xlane.f32.xlu1 %v2411_v53 }
 0x9d8   :  { %v10487_v30 = vpop.f32.mrf.mxu0  ;;  %v2408_v55 = vsel %vm75_vm0, %v11927_v13, 0.0 }
 0x9d9   :  { %v2398_v57 = vadd.f32 %v10487_v30, %v9591_v45  ;;  %2409 = vadd.xlane.f32.xlu0 %v2408_v55 }
 0x9da   :  { %v2392_v63 = vpop.f32.mrf.mxu0 }
 0x9db   :  { %v11936_v59 = vadd.f32 %v11404_v35, %v2398_v57  ;;  %v2393_v58 = vadd.f32 %v9591_v45, %v2392_v63 }
 0x9dd   :  { %v11941_v61 = vadd.f32 %v11405_v60, %v2393_v58  ;;  %v2417_v54 = vsel %vm75_vm0, %v11936_v59, 0.0 }
 0x9de   :  { %2418 = vadd.xlane.f32.xlu1 %v2417_v54 }
 0x9df   :  { %v2414_v62 = vsel %vm75_vm0, %v11941_v61, 0.0 }
 0x9e0   :  { %2415 = vadd.xlane.f32.xlu0 %v2414_v62 }
 0xa60   :  { %v2413_v0 = vpop.xlane.xlu1 %2412 }
 0xa61   :  { %v2421_v1 = vmul.f32 0.03125, %v2413_v0 }
 0xa62   :  { %v2410_v12 = vpop.xlane.xlu0 %2409 }
 0xa63   :  { %v11948_v3 = vsub.f32 %v11922_v20, %v2421_v1  ;;  %v2420_v4 = vmul.f32 0.03125, %v2410_v12 }
 0xa65   :  { %v11951_v14 = vsub.f32 %v11927_v13, %v2420_v4  ;;  %v2429_v6 = vmul.f32 %v11948_v3, %v11948_v3 }
 0xa67   :  { %v2419_v56 = vpop.xlane.xlu1 %2418  ;;  %v2435_v7 = vsel %vm75_vm0, %v2429_v6, 0.0  ;;  %v2428_v8 = vmul.f32 %v11951_v14, %v11951_v14 }
 0xa68   :  { %v2423_v10 = vmul.f32 0.03125, %v2419_v56  ;;  %2436 = vadd.xlane.f32.xlu1 %v2435_v7 }
 0xa69   :  { %v2416_v11 = vpop.xlane.xlu0 %2415  ;;  %v2432_v16 = vsel %vm75_vm0, %v2428_v8, 0.0 }
 0xa6a   :  { %v11960_v18 = vsub.f32 %v11936_v59, %v2423_v10  ;;  %v2422_v23 = vmul.f32 0.03125, %v2416_v11  ;;  %2433 = vadd.xlane.f32.xlu0 %v2432_v16  ;;  %v9598_v10 = vld [vmem:[%s13121_s5 + $0x2] ss:$0 sm:$0xff] }
 0xa6b   :  { %v2493_v16 = vmul.f32 %v9598_v10, %v11948_v3 }
 0xa6c   :  { %v11963_v24 = vsub.f32 %v11941_v61, %v2422_v23  ;;  %v2431_v25 = vmul.f32 %v11960_v18, %v11960_v18  ;;  %v2492_v23 = vmul.f32 %v9598_v10, %v11951_v14  ;;  %v2495_v37 = vmul.f32 %v9598_v10, %v11960_v18  ;;  %v10512_v18 = vpop.f32.mrf.mxu0 }
 0xa6e   :  { %v2441_v21 = vsel %vm75_vm0, %v2431_v25, 0.0  ;;  %v2430_v28 = vmul.f32 %v11963_v24, %v11963_v24  ;;  %v2494_v38 = vmul.f32 %v9598_v10, %v11963_v24  ;;  %v9605_v24 = vld [vmem:[%s13120_s4 + $0x8] ss:$0 sm:$0xff] }
 0xa6f   :  { %2442 = vadd.xlane.f32.xlu1 %v2441_v21 }
 0xa70   :  { %v2438_v31 = vsel %vm75_vm0, %v2430_v28, 0.0  ;;  %v9599_v28 = vld [vmem:[%s13121_s5 + $0x3] ss:$0 sm:$0xff] }
 0xa71   :  { %2439 = vadd.xlane.f32.xlu0 %v2438_v31 }
 0xaf1   :  { %v2437_v15 = vpop.xlane.xlu1 %2436 }
 0xaf2   :  { %v2445_v22 = vmul.f32 0.032258064, %v2437_v15  ;;  %v2706_v15 = vld [vmem:[#allocation2 + $0x118] sm:$0xff] }
 0xaf3   :  { %v2434_v33 = vpop.xlane.xlu0 %2433 }
 0xaf4   :  { %11114 = vrsqrt.f32 %v2445_v22  ;;  %v2444_v40 = vmul.f32 0.032258064, %v2434_v33  ;;  %vm2457_vm6 = vcmp.eq.f32.partialorder %v2445_v22, inf  ;;  %v2460_v49 = vand.u32 2147483648, %v2445_v22 }
 0xaf5   :  { %vm2459_vm7 = vcmp.eq.f32.partialorder %v2445_v22, 0.0 }
 0xaf6   :  { %11116 = vrsqrt.f32 %v2444_v40  ;;  %vm2450_vm8 = vcmp.eq.f32.partialorder %v2444_v40, inf  ;;  %v2453_v55 = vand.u32 2147483648, %v2444_v40  ;;  %vm2452_vm9 = vcmp.eq.f32.partialorder %v2444_v40, 0.0 }
 0xaf8   :  { %v2443_v27 = vpop.xlane.xlu1 %2442 }
 0xaf9   :  { %v2447_v46 = vmul.f32 0.032258064, %v2443_v27  ;;  %v2704_v27 = vld [vmem:[#allocation2 + $0x48] sm:$0xff] }
 0xafa   :  { %v2440_v47 = vpop.xlane.xlu0 %2439 }
 0xafb   :  { %11118 = vrsqrt.f32 %v2447_v46  ;;  %v2446_v45 = vmul.f32 0.032258064, %v2440_v47  ;;  %vm2471_vm10 = vcmp.eq.f32.partialorder %v2447_v46, inf  ;;  %v2474_v54 = vand.u32 2147483648, %v2447_v46 }
 0xafc   :  { %vm2473_vm11 = vcmp.eq.f32.partialorder %v2447_v46, 0.0 }
 0xafd   :  { %11120 = vrsqrt.f32 %v2446_v45  ;;  %vm2464_vm12 = vcmp.eq.f32.partialorder %v2446_v45, inf  ;;  %v2467_v6 = vand.u32 2147483648, %v2446_v45  ;;  %vm2466_vm13 = vcmp.eq.f32.partialorder %v2446_v45, 0.0 }
 0xb01   :  { %v11115_v48 = vpop.eup %11114 }
 0xb02   :  { %v2456_v44 = vmul.f32 %v11115_v48, %v2445_v22 }
 0xb03   :  { %v11117_v50 = vpop.eup %11116 }
 0xb04   :  { %v2458_v52 = vsel %vm2457_vm6, %v2445_v22, %v2456_v44  ;;  %v2449_v53 = vmul.f32 %v11117_v50, %v2444_v40  ;;  %v2695_v22 = vpop.f32.mrf.mxu0 }
 0xb05   :  { %v2461_v26 = vsel %vm2459_vm7, %v2460_v49, %v2458_v52  ;;  %v12008_v33 = vadd.f32 %v9605_v24, %v2695_v22 }
 0xb06   :  { %v2477_v30 = vadd.f32 1e-06, %v2461_v26  ;;  %v2451_v57 = vsel %vm2450_vm8, %v2444_v40, %v2449_v53  ;;  %v12010_v40 = vadd.f32 %v10512_v18, %v9605_v24 }
 0xb07   :  { %v2454_v35 = vsel %vm2452_vm9, %v2453_v55, %v2451_v57  ;;  %10524 = vmatprep.subr.msk.mxu0 %vm75_vm0, %v12008_v33 }
 0xb08   :  { %v11119_v63 = vpop.eup %11118  ;;  %11122 = vrcp.f32 %v2477_v30  ;;  %v2476_v58 = vadd.f32 1e-06, %v2454_v35  ;;  %10525 = vmatpush3.xpose.msk.msra.mxu0 %vm75_vm0, %v12008_v33 }
 0xb09   :  { %v2470_v60 = vmul.f32 %v11119_v63, %v2447_v46  ;;  %10534 = vmatprep.subr.msk.mxu0 %vm75_vm0, %v12008_v33 }
 0xb0a   :  { %v11121_v62 = vpop.eup %11120  ;;  %11124 = vrcp.f32 %v2476_v58 }
 0xb0b   :  { %v2472_v0 = vsel %vm2471_vm10, %v2447_v46, %v2470_v60  ;;  %v2463_v12 = vmul.f32 %v11121_v62, %v2446_v45  ;;  %vm4639_vm10 = vcmask 523264  }
 0xb0c   :  { %v2475_v1 = vsel %vm2473_vm11, %v2474_v54, %v2472_v0 }
 0xb0d   :  { %v2479_v4 = vadd.f32 1e-06, %v2475_v1  ;;  %v2465_v56 = vsel %vm2464_vm12, %v2446_v45, %v2463_v12  ;;  %v9608_v1 = vld [vmem:[%s13120_s4 + $0x9] ss:$0 sm:$0xff] }
 0xb0e   :  { %v2468_v7 = vsel %vm2466_vm13, %v2467_v6, %v2465_v56 }
 0xb0f   :  { %11126 = vrcp.f32 %v2479_v4  ;;  %v2478_v8 = vadd.f32 1e-06, %v2468_v7 }
 0xb11   :  { %11128 = vrcp.f32 %v2478_v8 }
 0xb15   :  { %v11123_v11 = vpop.eup %11122 }
 0xb16   :  { %v2497_v21 = vmul.f32 %v11123_v11, %v2493_v16 }
 0xb17   :  { %v11125_v25 = vpop.eup %11124 }
 0xb18   :  { %v2496_v31 = vmul.f32 %v11125_v25, %v2492_v23  ;;  %v2505_v36 = vadd.f32 %v9599_v28, %v2497_v21 }
 0xb1a   :  { %v2504_v32 = vadd.f32 %v9599_v28, %v2496_v31 }
 0xb1c   :  { %v11127_v34 = vpop.eup %11126  ;;  %10496 = vmatprep.mubr.msk.f32.mxu1 %vm75_vm0, %v2504_v32 }
 0xb1d   :  { %10497 = vmatmul.mubr.msk.f32.vlgmr.msra.gmra.mxu1 %vm75_vm0, %v2505_v36  ;;  %v2499_v14 = vmul.f32 %v11127_v34, %v2495_v37 }
 0xb1e   :  { %v11129_v3 = vpop.eup %11128  ;;  %10514 = vmatpush3.msra.mxu1 %v11985_v19  ;;  %v2705_v19 = vld [vmem:[#allocation2 + $0xb0] sm:$0xff] }
 0xb1f   :  { %v2498_v39 = vmul.f32 %v11129_v3, %v2494_v38  ;;  %v2507_v43 = vadd.f32 %v9599_v28, %v2499_v14  ;;  %10515 = vmatprep.subr.mxu1 %v2706_v15 }
 0xb20   :  { %10516 = vmatpush3.msra.mxu1 %v2706_v15 }
 0xb21   :  { %v2506_v2 = vadd.f32 %v9599_v28, %v2498_v39  ;;  %10517 = vmatprep.subr.mxu1 %v2705_v19 }
 0xb22   :  { %10518 = vmatpush3.msra.mxu1 %v2705_v19 }
 0xb23   :  { %10499 = vmatprep.mubr.msk.f32.mxu1 %vm75_vm0, %v2506_v2  ;;  %10519 = vmatprep.subr.mxu1 %v2704_v27 }
 0xb24   :  { %10500 = vmatmul.mubr.msk.f32.gmra.mxu1 %vm75_vm0, %v2507_v43 }
 0xb25   :  { %10521 = vmatprep.mubr.msk.f32.mxu1 %vm75_vm0, %v11974_v9  ;;  %10520 = vmatpush3.msra.mxu1 %v2704_v27  ;;  %v9600_v9 = vld [vmem:[%s13120_s4 + $0x7] ss:$0 sm:$0xff] }
 0xb26   :  { %10529 = vmatprep.subr.msk.mxu1 %vm75_vm0, %v12010_v40 }
 0xb28   :  { %10522 = vmatmul.mubr.msk.f32.vlgmr.msra.gmra.mxu1 %vm75_vm0, %v11981_v17 }
 0xb29   :  { %10530 = vmatpush3.xpose.msk.msra.mxu1 %vm75_vm0, %v12010_v40 }
 0xb2a   :  { %10539 = vmatprep.subr.msk.mxu1 %vm75_vm0, %v12010_v40 }
 0xbdd   :  { %v10498_v46 = vpop.f32.mrf.mxu1 }
 0xbde   :  { %v2601_v47 = vadd.f32 %v10498_v46, %v9600_v9 }
 0xbdf   :  { %v2595_v45 = vpop.f32.mrf.mxu1 }
 0xbe0   :  { %v2596_v48 = vadd.f32 %v9600_v9, %v2595_v45  ;;  %v12029_v44 = vmul.f32 0.35355338, %v2601_v47 }
 0xbe2   :  { %v12031_v17 = vmul.f32 0.35355338, %v2596_v48  ;;  %v2793_v26 = vmul.f32 %v12029_v44, %v11609_v5  ;;  %v3012_v63 = vmul.f32 %v12029_v44, %v11657_v29 }
 0xbe4   :  { %v10501_v49 = vpop.f32.mrf.mxu1  ;;  %v2792_v52 = vmul.f32 %v12031_v17, %v11609_v5  ;;  %v3011_v55 = vmul.f32 %v12031_v17, %v11657_v29 }
 0xbe5   :  { %v2611_v50 = vadd.f32 %v10501_v49, %v9600_v9 }
 0xbe6   :  { %v2605_v53 = vpop.f32.mrf.mxu1  ;;  %10526 = vmatprep.mubr.msk.f32.mxu0 %vm75_vm0, %v2792_v52 }
 0xbe7   :  { %v2606_v30 = vadd.f32 %v9600_v9, %v2605_v53  ;;  %10527 = vmatmul.mubr.msk.f32.vlgmr.msra.gmra.mxu0 %vm75_vm0, %v2793_v26  ;;  %v12041_v57 = vmul.f32 0.35355338, %v2611_v50 }
 0xbe8   :  { %10535 = vmatpush3.xpose.msk.msra.mxu0 %vm75_vm0, %v12008_v33  ;;  %10536 = vmatprep.mubr.msk.f32.mxu0 %vm75_vm0, %v3011_v55  ;;  %v10523_v0 = vpop.f32.mrf.mxu1 }
 0xbe9   :  { %v12047_v35 = vmul.f32 0.35355338, %v2606_v30  ;;  %v2795_v60 = vmul.f32 %v12041_v57, %v11609_v5  ;;  %v3014_v62 = vmul.f32 %v12041_v57, %v11657_v29  ;;  %v12068_v4 = vadd.f32 %v10523_v0, %v9608_v1 }
 0xbea   :  { %v2779_v12 = vpop.f32.mrf.mxu1 }
 0xbeb   :  { %10537 = vmatmul.mubr.msk.f32.vlgmr.msra.gmra.mxu0 %vm75_vm0, %v3012_v63  ;;  %v2794_v58 = vmul.f32 %v12047_v35, %v11609_v5  ;;  %v3013_v54 = vmul.f32 %v12047_v35, %v11657_v29  ;;  %v12070_v6 = vadd.f32 %v9608_v1, %v2779_v12  ;;  %v3222_v7 = vmul.f32 %v12068_v4, %v11657_v29 }
 0xbec   :  { %v12082_v10 = vmul.f32 %v12068_v4, %v11609_v5 }
 0xbed   :  { %10531 = vmatprep.mubr.msk.f32.mxu1 %vm75_vm0, %v2794_v58  ;;  %v3221_v56 = vmul.f32 %v12070_v6, %v11657_v29  ;;  %v12078_v8 = vmul.f32 %v12070_v6, %v11609_v5 }
 0xbee   :  { %10532 = vmatmul.mubr.msk.f32.vlgmr.msra.gmra.mxu1 %vm75_vm0, %v2795_v60 }
 0xbef   :  { %10540 = vmatpush3.xpose.msk.msra.mxu1 %vm75_vm0, %v12010_v40  ;;  %10541 = vmatprep.mubr.msk.f32.mxu1 %vm75_vm0, %v3013_v54 }
 0xbf0   :  { %10544 = vmatprep.subr.mxu0 %v3221_v56  ;;  %10549 = vmatprep.subr.mxu1 %v3222_v7 }
 0xbf1   :  { %10545 = vmatpush3.msra.mxu0 %v3221_v56 }
 0xbf2   :  { %10542 = vmatmul.mubr.msk.f32.vlgmr.msra.gmra.mxu1 %vm75_vm0, %v3014_v62  ;;  %10554 = vmatprep.subr.mxu0 %v12078_v8 }
 0xbf3   :  { %10550 = vmatpush3.msra.mxu1 %v3222_v7 }
 0xbf4   :  { %10559 = vmatprep.subr.mxu1 %v12082_v10 }
 0xca7   :  { %v10528_v11 = vpop.f32.mrf.mxu0 }
 0xca8   :  { %v2968_v37 = vsel %vm2964_vm14, %v10528_v11, -inf }
 0xca9   :  { %v2871_v16 = vpop.f32.mrf.mxu0 }
 0xcaa   :  { %v2965_v23 = vsel %vm2964_vm14, %v2871_v16, -inf }
 0xcab   :  { %v10538_v25 = vpop.f32.mrf.mxu0  ;;  %2966 = vmax.xlane.f32.xlu0 %v2965_v23 }
 0xcac   :  { %v3180_v21 = vsel %vm2964_vm14, %v10538_v25, -inf }
 0xcad   :  { %3181 = vmax.xlane.f32.xlu1 %v3180_v21  ;;  %v3087_v28 = vpop.f32.mrf.mxu0 }
 0xcae   :  { %v10533_v31 = vpop.f32.mrf.mxu1  ;;  %v3177_v32 = vsel %vm2964_vm14, %v3087_v28, -inf }
 0xcaf   :  { %3178 = vmax.xlane.f32.xlu0 %v3177_v32  ;;  %v2974_v2 = vsel %vm2964_vm14, %v10533_v31, -inf }
 0xcb0   :  { %v2955_v34 = vpop.f32.mrf.mxu1 }
 0xcb1   :  { %v2971_v14 = vsel %vm2964_vm14, %v2955_v34, -inf }
 0xcb2   :  { %v10543_v36 = vpop.f32.mrf.mxu1 }
 0xcb3   :  { %2969 = vmax.xlane.f32.xlu0 %v2968_v37  ;;  %v3186_v39 = vsel %vm2964_vm14, %v10543_v36, -inf }
 0xcb4   :  { %v3168_v38 = vpop.f32.mrf.mxu1 }
 0xcb5   :  { %v3183_v3 = vsel %vm2964_vm14, %v3168_v38, -inf }
 0xcb6   :  { %3184 = vmax.xlane.f32.xlu1 %v3183_v3 }
 0xcb7   :  { %2972 = vmax.xlane.f32.xlu0 %v2971_v14 }
 0xcba   :  { %3187 = vmax.xlane.f32.xlu1 %v3186_v39 }
 0xcbe   :  { %2975 = vmax.xlane.f32.xlu1 %v2974_v2 }
 0xd34   :  { %v2967_v43 = vpop.xlane.xlu0 %2966 }
 0xd35   :  { %v2977_v18 = vsub.f32 %v2871_v16, %v2967_v43 }
 0xd36   :  { %v3182_v15 = vpop.xlane.xlu1 %3181 }
 0xd37   :  { %v2981_v24 = vmul.f32 1.442695, %v2977_v18  ;;  %v3190_v22 = vsub.f32 %v10538_v25, %v3182_v15 }
 0xd38   :  { %v3179_v19 = vpop.xlane.xlu0 %3178 }
 0xd39   :  { %11130 = vpow2.f32 %v2981_v24  ;;  %v3195_v27 = vmul.f32 1.442695, %v3190_v22  ;;  %v3189_v9 = vsub.f32 %v3087_v28, %v3179_v19 }
 0xd3b   :  { %11132 = vpow2.f32 %v3195_v27  ;;  %v3193_v46 = vmul.f32 1.442695, %v3189_v9 }
 0xd3c   :  { %v2970_v47 = vpop.xlane.xlu0 %2969 }
 0xd3d   :  { %11134 = vpow2.f32 %v3193_v46  ;;  %v2978_v45 = vsub.f32 %v10528_v11, %v2970_v47 }
 0xd3f   :  { %v2983_v48 = vmul.f32 1.442695, %v2978_v45  ;;  %v3185_v49 = vpop.xlane.xlu1 %3184 }
 0xd40   :  { %v3191_v50 = vsub.f32 %v3168_v38, %v3185_v49  ;;  %v2973_v52 = vpop.xlane.xlu0 %2972  ;;  %v3547_v49 = vmul.f32 %v12031_v17, %v11584_v41 }
 0xd41   :  { %11136 = vpow2.f32 %v2983_v48  ;;  %v2979_v26 = vsub.f32 %v2955_v34, %v2973_v52 }
 0xd42   :  { %v3197_v53 = vmul.f32 1.442695, %v3191_v50  ;;  %v3757_v50 = vmul.f32 %v12070_v6, %v11584_v41 }
 0xd43   :  { %v2985_v30 = vmul.f32 1.442695, %v2979_v26  ;;  %v3188_v55 = vpop.xlane.xlu1 %3187  ;;  %v3548_v26 = vmul.f32 %v12029_v44, %v11584_v41 }
 0xd44   :  { %11138 = vpow2.f32 %v3197_v53  ;;  %v3192_v63 = vsub.f32 %v10543_v36, %v3188_v55 }
 0xd45   :  { %11140 = vpow2.f32 %v2985_v30 }
 0xd46   :  { %v11131_v58 = vpop.eup %11130  ;;  %v3199_v60 = vmul.f32 1.442695, %v3192_v63 }
 0xd47   :  { %v2976_v54 = vpop.xlane.xlu1 %2975  ;;  %v2989_v62 = vsel %vm2964_vm14, %v11131_v58, 0.0 }
 0xd48   :  { %v11133_v0 = vpop.eup %11132  ;;  %11142 = vpow2.f32 %v3199_v60  ;;  %v2980_v1 = vsub.f32 %v10533_v31, %v2976_v54  ;;  %2990 = vadd.xlane.f32.xlu0 %v2989_v62  ;;  %v3549_v60 = vmul.f32 %v12047_v35, %v11584_v41  ;;  %v3758_v54 = vmul.f32 %v12068_v4, %v11584_v41 }
 0xd49   :  { %v3204_v12 = vsel %vm2964_vm14, %v11133_v0, 0.0 }
 0xd4a   :  { %v11135_v56 = vpop.eup %11134  ;;  %v2987_v7 = vmul.f32 1.442695, %v2980_v1  ;;  %3205 = vadd.xlane.f32.xlu1 %v3204_v12 }
 0xd4b   :  { %v3201_v11 = vsel %vm2964_vm14, %v11135_v56, 0.0 }
 0xd4c   :  { %11144 = vpow2.f32 %v2987_v7  ;;  %3202 = vadd.xlane.f32.xlu0 %v3201_v11 }
 0xd4e   :  { %v11137_v16 = vpop.eup %11136 }
 0xd4f   :  { %v2992_v23 = vsel %vm2964_vm14, %v11137_v16, 0.0 }
 0xd50   :  { %2993 = vadd.xlane.f32.xlu0 %v2992_v23 }
 0xd51   :  { %v11139_v25 = vpop.eup %11138 }
 0xd52   :  { %v11141_v21 = vpop.eup %11140  ;;  %v3207_v28 = vsel %vm2964_vm14, %v11139_v25, 0.0 }
 0xd53   :  { %3208 = vadd.xlane.f32.xlu1 %v3207_v28  ;;  %v2995_v31 = vsel %vm2964_vm14, %v11141_v21, 0.0 }
 0xd54   :  { %2996 = vadd.xlane.f32.xlu0 %v2995_v31 }
 0xd55   :  { %v11143_v32 = vpop.eup %11142 }
 0xd56   :  { %v3210_v34 = vsel %vm2964_vm14, %v11143_v32, 0.0 }
 0xd57   :  { %3211 = vadd.xlane.f32.xlu1 %v3210_v34 }
 0xd59   :  { %v11145_v36 = vpop.eup %11144 }
 0xd5a   :  { %v2998_v37 = vsel %vm2964_vm14, %v11145_v36, 0.0 }
 0xd5b   :  { %2999 = vadd.xlane.f32.xlu1 %v2998_v37 }
 0xdd1   :  { %v2991_v38 = vpop.xlane.xlu0 %2990 }
 0xdd2   :  { %11146 = vrcp.f32 %v2991_v38 }
 0xdd3   :  { %v3206_v3 = vpop.xlane.xlu1 %3205 }
 0xdd4   :  { %11148 = vrcp.f32 %v3206_v3 }
 0xdd5   :  { %v3203_v14 = vpop.xlane.xlu0 %3202 }
 0xdd6   :  { %11150 = vrcp.f32 %v3203_v14 }
 0xdd9   :  { %v2994_v39 = vpop.xlane.xlu0 %2993 }
 0xdda   :  { %11152 = vrcp.f32 %v2994_v39 }
 0xddc   :  { %v3209_v2 = vpop.xlane.xlu1 %3208 }
 0xddd   :  { %11154 = vrcp.f32 %v3209_v2  ;;  %v2997_v43 = vpop.xlane.xlu0 %2996 }
 0xdde   :  { %11156 = vrcp.f32 %v2997_v43 }
 0xddf   :  { %v11147_v15 = vpop.eup %11146 }
 0xde0   :  { %v3212_v18 = vpop.xlane.xlu1 %3211  ;;  %v3005_v46 = vmul.f32 %v11147_v15, %v11131_v58 }
 0xde1   :  { %11158 = vrcp.f32 %v3212_v18  ;;  %v11149_v24 = vpop.eup %11148 }
 0xde2   :  { %v3218_v9 = vmul.f32 %v11149_v24, %v11133_v0 }
 0xde3   :  { %v11151_v22 = vpop.eup %11150 }
 0xde4   :  { %v3000_v19 = vpop.xlane.xlu1 %2999  ;;  %v3217_v27 = vmul.f32 %v11151_v22, %v11135_v56 }
 0xde5   :  { %11160 = vrcp.f32 %v3000_v19 }
 0xde6   :  { %10546 = vmatprep.mubr.msk.f32.mxu0 %vm2964_vm14, %v3217_v27 }
 0xde7   :  { %v11153_v47 = vpop.eup %11152  ;;  %10547 = vmatmul.mubr.msk.f32.vlgmr.msra.gmra.mxu0 %vm2964_vm14, %v3218_v9 }
 0xde8   :  { %10555 = vmatpush3.msra.mxu0 %v12078_v8  ;;  %10556 = vmatprep.mubr.msk.f32.mxu0 %vm2964_vm14, %v3005_v46  ;;  %v3006_v45 = vmul.f32 %v11153_v47, %v11137_v16 }
 0xde9   :  { %10564 = vmatprep.subr.msk.mxu0 %vm75_vm0, %v12008_v33 }
 0xdea   :  { %v11155_v48 = vpop.eup %11154 }
 0xdeb   :  { %10557 = vmatmul.mubr.msk.f32.vlgmr.msra.gmra.mxu0 %vm2964_vm14, %v3006_v45  ;;  %v3219_v52 = vmul.f32 %v11155_v48, %v11139_v25  ;;  %v11157_v8 = vpop.eup %11156 }
 0xdec   :  { %10565 = vmatpush3.xpose.msk.msra.mxu0 %vm75_vm0, %v12008_v33  ;;  %10566 = vmatprep.mubr.msk.f32.mxu0 %vm75_vm0, %v3547_v49  ;;  %v3007_v55 = vmul.f32 %v11157_v8, %v11141_v21 }
 0xded   :  { %10574 = vmatprep.subr.mxu0 %v3757_v50  ;;  %10551 = vmatprep.mubr.msk.f32.mxu1 %vm2964_vm14, %v3219_v52 }
 0xdee   :  { %v11159_v53 = vpop.eup %11158 }
 0xdef   :  { %10567 = vmatmul.mubr.msk.f32.vlgmr.msra.gmra.mxu0 %vm75_vm0, %v3548_v26  ;;  %v3220_v30 = vmul.f32 %v11159_v53, %v11143_v32 }
 0xdf0   :  { %10575 = vmatpush3.msra.mxu0 %v3757_v50 }
 0xdf1   :  { %10584 = vmatprep.subr.msk.mxu0 %vm75_vm0, %v12008_v33  ;;  %10552 = vmatmul.mubr.msk.f32.vlgmr.msra.gmra.mxu1 %vm2964_vm14, %v3220_v30 }
 0xdf2   :  { %v11161_v63 = vpop.eup %11160  ;;  %10560 = vmatpush3.msra.mxu1 %v12082_v10  ;;  %10561 = vmatprep.mubr.msk.f32.mxu1 %vm2964_vm14, %v3007_v55  ;;  %v3550_v10 = vmul.f32 %v12041_v57, %v11584_v41 }
 0xdf3   :  { %10569 = vmatprep.subr.msk.mxu1 %vm75_vm0, %v12010_v40  ;;  %v3008_v58 = vmul.f32 %v11161_v63, %v11145_v36 }
 0xdf5   :  { %10562 = vmatmul.mubr.msk.f32.vlgmr.msra.gmra.mxu1 %vm2964_vm14, %v3008_v58 }
 0xdf6   :  { %10570 = vmatpush3.xpose.msk.msra.mxu1 %vm75_vm0, %v12010_v40  ;;  %10571 = vmatprep.mubr.msk.f32.mxu1 %vm75_vm0, %v3549_v60 }
 0xdf7   :  { %10579 = vmatprep.subr.mxu1 %v3758_v54 }
 0xdf9   :  { %10572 = vmatmul.mubr.msk.f32.vlgmr.msra.gmra.mxu1 %vm75_vm0, %v3550_v10 }
 0xdfa   :  { %10580 = vmatpush3.msra.mxu1 %v3758_v54 }
 0xdfb   :  { %10589 = vmatprep.subr.msk.mxu1 %vm75_vm0, %v12010_v40 }
 0xea7   :  { %v10548_v62 = vpop.f32.mrf.mxu0 }
 0xea9   :  { %v3295_v0 = vpop.f32.mrf.mxu0 }
 0xeab   :  { %v10558_v1 = vpop.f32.mrf.mxu0 }
 0xeac   :  { %v12140_v12 = vadd.f32 %v10558_v1, %v10548_v62  ;;  %v4135_v1 = vmul.f32 %v12070_v6, %v11587_v42  ;;  %v3927_v6 = vmul.f32 %v12047_v35, %v11587_v42 }
 0xead   :  { %v3457_v56 = vpop.f32.mrf.mxu0 }
 0xeae   :  { %v12142_v7 = vadd.f32 %v3457_v56, %v3295_v0  ;;  %v3925_v0 = vmul.f32 %v12031_v17, %v11587_v42  ;;  %v3926_v56 = vmul.f32 %v12029_v44, %v11587_v42  ;;  %v3928_v44 = vmul.f32 %v12041_v57, %v11587_v42 }
 0xeaf   :  { %v10568_v11 = vpop.f32.mrf.mxu0 }
 0xeb0   :  { %v3716_v16 = vsel %vm2964_vm14, %v10568_v11, -inf }
 0xeb1   :  { %v10553_v23 = vpop.f32.mrf.mxu1  ;;  %3717 = vmax.xlane.f32.xlu1 %v3716_v16  ;;  %v3623_v25 = vpop.f32.mrf.mxu0 }
 0xeb2   :  { %v3713_v21 = vsel %vm2964_vm14, %v3623_v25, -inf }
 0xeb3   :  { %v3376_v28 = vpop.f32.mrf.mxu1  ;;  %3714 = vmax.xlane.f32.xlu0 %v3713_v21 }
 0xeb5   :  { %v10563_v31 = vpop.f32.mrf.mxu1 }
 0xeb6   :  { %v12146_v32 = vadd.f32 %v10563_v31, %v10553_v23 }
 0xeb7   :  { %v3538_v34 = vpop.f32.mrf.mxu1 }
 0xeb8   :  { %v12148_v36 = vadd.f32 %v3538_v34, %v3376_v28 }
 0xeb9   :  { %v10573_v37 = vpop.f32.mrf.mxu1 }
 0xeba   :  { %v3722_v38 = vsel %vm2964_vm14, %v10573_v37, -inf }
 0xebb   :  { %3723 = vmax.xlane.f32.xlu1 %v3722_v38  ;;  %v3704_v3 = vpop.f32.mrf.mxu1 }
 0xebc   :  { %v3719_v14 = vsel %vm2964_vm14, %v3704_v3, -inf }
 0xebd   :  { %3720 = vmax.xlane.f32.xlu0 %v3719_v14 }
 0xf3a   :  { %v3718_v39 = vpop.xlane.xlu1 %3717 }
 0xf3b   :  { %v3726_v2 = vsub.f32 %v10568_v11, %v3718_v39 }
 0xf3c   :  { %v3715_v43 = vpop.xlane.xlu0 %3714 }
 0xf3d   :  { %v3731_v18 = vmul.f32 1.442695, %v3726_v2  ;;  %v3725_v15 = vsub.f32 %v3623_v25, %v3715_v43 }
 0xf3f   :  { %11162 = vpow2.f32 %v3731_v18  ;;  %v3729_v24 = vmul.f32 1.442695, %v3725_v15 }
 0xf41   :  { %11164 = vpow2.f32 %v3729_v24 }
 0xf44   :  { %v3724_v22 = vpop.xlane.xlu1 %3723 }
 0xf45   :  { %v3728_v19 = vsub.f32 %v10573_v37, %v3724_v22 }
 0xf46   :  { %v3721_v27 = vpop.xlane.xlu0 %3720 }
 0xf47   :  { %v3735_v9 = vmul.f32 1.442695, %v3728_v19  ;;  %v3727_v46 = vsub.f32 %v3704_v3, %v3721_v27 }
 0xf49   :  { %11166 = vpow2.f32 %v3735_v9  ;;  %v3733_v47 = vmul.f32 1.442695, %v3727_v46 }
 0xf4b   :  { %11168 = vpow2.f32 %v3733_v47 }
 0xf4c   :  { %v11163_v45 = vpop.eup %11162 }
 0xf4d   :  { %v3740_v48 = vsel %vm2964_vm14, %v11163_v45, 0.0 }
 0xf4e   :  { %v11165_v49 = vpop.eup %11164  ;;  %3741 = vadd.xlane.f32.xlu1 %v3740_v48 }
 0xf4f   :  { %v3737_v50 = vsel %vm2964_vm14, %v11165_v49, 0.0 }
 0xf50   :  { %3738 = vadd.xlane.f32.xlu0 %v3737_v50 }
 0xf56   :  { %v11167_v52 = vpop.eup %11166 }
 0xf57   :  { %v3746_v8 = vsel %vm2964_vm14, %v11167_v52, 0.0 }
 0xf58   :  { %v11169_v26 = vpop.eup %11168  ;;  %3747 = vadd.xlane.f32.xlu1 %v3746_v8 }
 0xf59   :  { %v3743_v53 = vsel %vm2964_vm14, %v11169_v26, 0.0 }
 0xf5a   :  { %3744 = vadd.xlane.f32.xlu0 %v3743_v53  ;;  %v4306_v53 = vld [vmem:[#allocation2 + $0x188] sm:$0xff] }
 0xfd7   :  { %v3742_v30 = vpop.xlane.xlu1 %3741 }
 0xfd8   :  { %11170 = vrcp.f32 %v3742_v30 }
 0xfd9   :  { %v3739_v55 = vpop.xlane.xlu0 %3738 }
 0xfda   :  { %11172 = vrcp.f32 %v3739_v55 }
 0xfe1   :  { %v3748_v63 = vpop.xlane.xlu1 %3747 }
 0xfe2   :  { %11174 = vrcp.f32 %v3748_v63 }
 0xfe3   :  { %v3745_v58 = vpop.xlane.xlu0 %3744 }
 0xfe4   :  { %11176 = vrcp.f32 %v3745_v58 }
 0xfe5   :  { %v11171_v60 = vpop.eup %11170 }
 0xfe6   :  { %v3754_v62 = vmul.f32 %v11171_v60, %v11163_v45 }
 0xfe7   :  { %v11173_v54 = vpop.eup %11172 }
 0xfe8   :  { %v3753_v10 = vmul.f32 %v11173_v54, %v11165_v49 }
 0xfea   :  { %10576 = vmatprep.mubr.msk.f32.mxu0 %vm2964_vm14, %v3753_v10 }
 0xfeb   :  { %10577 = vmatmul.mubr.msk.f32.vlgmr.msra.gmra.mxu0 %vm2964_vm14, %v3754_v62 }
 0xfec   :  { %10585 = vmatpush3.xpose.msk.msra.mxu0 %vm75_vm0, %v12008_v33  ;;  %10586 = vmatprep.mubr.msk.f32.mxu0 %vm75_vm0, %v3925_v0  ;;  %v4136_v33 = vmul.f32 %v12068_v4, %v11587_v42 }
 0xfed   :  { %10594 = vmatprep.subr.mxu0 %v4135_v1 }
 0xfef   :  { %10587 = vmatmul.mubr.msk.f32.vlgmr.msra.gmra.mxu0 %vm75_vm0, %v3926_v56  ;;  %v11175_v11 = vpop.eup %11174 }
 0xff0   :  { %10595 = vmatpush3.msra.mxu0 %v4135_v1  ;;  %v3756_v23 = vmul.f32 %v11175_v11, %v11167_v52 }
 0xff1   :  { %v11177_v16 = vpop.eup %11176  ;;  %10604 = vmatprep.subr.mxu0 %v4306_v53 }
 0xff2   :  { %v3755_v17 = vmul.f32 %v11177_v16, %v11169_v26  ;;  %v4305_v16 = vld [vmem:[#allocation2 + $0x120] sm:$0xff] }
 0xff4   :  { %10581 = vmatprep.mubr.msk.f32.mxu1 %vm2964_vm14, %v3755_v17  ;;  %v4304_v17 = vld [vmem:[#allocation2 + $0xb8] sm:$0xff] }
 0xff5   :  { %10582 = vmatmul.mubr.msk.f32.vlgmr.msra.gmra.mxu1 %vm2964_vm14, %v3756_v23  ;;  %v4303_v23 = vld [vmem:[#allocation2 + $0x50] sm:$0xff] }
 0xff6   :  { %10590 = vmatpush3.xpose.msk.msra.mxu1 %vm75_vm0, %v12010_v40  ;;  %10591 = vmatprep.mubr.msk.f32.mxu1 %vm75_vm0, %v3927_v6 }
 0xff7   :  { %10599 = vmatprep.subr.mxu1 %v4136_v33 }
 0xff9   :  { %10592 = vmatmul.mubr.msk.f32.vlgmr.msra.gmra.mxu1 %vm75_vm0, %v3928_v44 }
 0xffa   :  { %10600 = vmatpush3.msra.mxu1 %v4136_v33 }
0x10ab   :  { %v10578_v25 = vpop.f32.mrf.mxu0 }
0x10ac   :  { %v12181_v35 = vadd.f32 %v10578_v25, %v12140_v12 }
0x10ad   :  { %v3831_v21 = vpop.f32.mrf.mxu0 }
0x10ae   :  { %v12184_v28 = vadd.f32 %v3831_v21, %v12142_v7 }
0x10af   :  { %v10588_v4 = vpop.f32.mrf.mxu0 }
0x10b0   :  { %v4094_v40 = vsel %vm2964_vm14, %v10588_v4, -inf }
0x10b1   :  { %4095 = vmax.xlane.f32.xlu1 %v4094_v40  ;;  %v4001_v31 = vpop.f32.mrf.mxu0 }
0x10b2   :  { %v4091_v34 = vsel %vm2964_vm14, %v4001_v31, -inf }
0x10b3   :  { %4092 = vmax.xlane.f32.xlu0 %v4091_v34 }
0x10b5   :  { %v10583_v57 = vpop.f32.mrf.mxu1 }
0x10b6   :  { %v12189_v37 = vadd.f32 %v10583_v57, %v12146_v32 }
0x10b7   :  { %v3912_v38 = vpop.f32.mrf.mxu1 }
0x10b8   :  { %v12192_v12 = vadd.f32 %v3912_v38, %v12148_v36 }
0x10b9   :  { %v10593_v3 = vpop.f32.mrf.mxu1 }
0x10ba   :  { %v4100_v7 = vsel %vm2964_vm14, %v10593_v3, -inf }
0x10bb   :  { %4101 = vmax.xlane.f32.xlu1 %v4100_v7  ;;  %v4082_v14 = vpop.f32.mrf.mxu1 }
0x10bc   :  { %v4097_v39 = vsel %vm2964_vm14, %v4082_v14, -inf }
0x10bd   :  { %4098 = vmax.xlane.f32.xlu0 %v4097_v39 }
0x113a   :  { %v4096_v2 = vpop.xlane.xlu1 %4095 }
0x113b   :  { %v4104_v43 = vsub.f32 %v10588_v4, %v4096_v2 }
0x113c   :  { %v4093_v18 = vpop.xlane.xlu0 %4092 }
0x113d   :  { %v4109_v15 = vmul.f32 1.442695, %v4104_v43  ;;  %v4103_v24 = vsub.f32 %v4001_v31, %v4093_v18 }
0x113f   :  { %11178 = vpow2.f32 %v4109_v15  ;;  %v4107_v32 = vmul.f32 1.442695, %v4103_v24 }
0x1141   :  { %11180 = vpow2.f32 %v4107_v32 }
0x1144   :  { %v4102_v22 = vpop.xlane.xlu1 %4101 }
0x1145   :  { %v4106_v19 = vsub.f32 %v10593_v3, %v4102_v22 }
0x1146   :  { %v4099_v36 = vpop.xlane.xlu0 %4098 }
0x1147   :  { %v4113_v27 = vmul.f32 1.442695, %v4106_v19  ;;  %v4105_v9 = vsub.f32 %v4082_v14, %v4099_v36 }
0x1149   :  { %11182 = vpow2.f32 %v4113_v27  ;;  %v4111_v46 = vmul.f32 1.442695, %v4105_v9 }
0x114b   :  { %11184 = vpow2.f32 %v4111_v46 }
0x114c   :  { %v11179_v47 = vpop.eup %11178 }
0x114d   :  { %v4118_v45 = vsel %vm2964_vm14, %v11179_v47, 0.0 }
0x114e   :  { %v11181_v48 = vpop.eup %11180  ;;  %4119 = vadd.xlane.f32.xlu1 %v4118_v45 }
0x114f   :  { %v4115_v49 = vsel %vm2964_vm14, %v11181_v48, 0.0 }
0x1150   :  { %4116 = vadd.xlane.f32.xlu0 %v4115_v49 }
0x1156   :  { %v11183_v50 = vpop.eup %11182 }
0x1157   :  { %v4124_v52 = vsel %vm2964_vm14, %v11183_v50, 0.0 }
0x1158   :  { %v11185_v8 = vpop.eup %11184  ;;  %4125 = vadd.xlane.f32.xlu1 %v4124_v52 }
0x1159   :  { %v4121_v26 = vsel %vm2964_vm14, %v11185_v8, 0.0 }
0x115a   :  { %4122 = vadd.xlane.f32.xlu0 %v4121_v26 }
0x11d7   :  { %v4120_v30 = vpop.xlane.xlu1 %4119 }
0x11d8   :  { %11186 = vrcp.f32 %v4120_v30 }
0x11d9   :  { %v4117_v55 = vpop.xlane.xlu0 %4116 }
0x11da   :  { %11188 = vrcp.f32 %v4117_v55  ;;  %v4519_v55 = vld [vmem:[#allocation2 + $0x190] sm:$0xff] }
0x11db   :  { %10618 = vmatprep.subr.mxu1 %v4519_v55 }
0x11e1   :  { %v4126_v63 = vpop.xlane.xlu1 %4125 }
0x11e2   :  { %11190 = vrcp.f32 %v4126_v63  ;;  %v4518_v63 = vld [vmem:[#allocation2 + $0x128] sm:$0xff] }
0x11e3   :  { %v4123_v58 = vpop.xlane.xlu0 %4122 }
0x11e4   :  { %11192 = vrcp.f32 %v4123_v58  ;;  %v4517_v58 = vld [vmem:[#allocation2 + $0xc0] sm:$0xff] }
0x11e5   :  { %v11187_v60 = vpop.eup %11186 }
0x11e6   :  { %v4132_v62 = vmul.f32 %v11187_v60, %v11179_v47  ;;  %v4516_v60 = vld [vmem:[#allocation2 + $0x58] sm:$0xff] }
0x11e7   :  { %v11189_v54 = vpop.eup %11188 }
0x11e8   :  { %v4131_v10 = vmul.f32 %v11189_v54, %v11181_v48  ;;  %v4633_v54 = vld [vmem:[#allocation2 + $0x338] sm:$0xff] }
0x11ea   :  { %10596 = vmatprep.mubr.msk.f32.mxu0 %vm2964_vm14, %v4131_v10  ;;  %v4632_v10 = vld [vmem:[#allocation2 + $0x2d0] sm:$0xff] }
0x11eb   :  { %10597 = vmatmul.mubr.msk.f32.vlgmr.msra.gmra.mxu0 %vm2964_vm14, %v4132_v62  ;;  %v4631_v62 = vld [vmem:[#allocation2 + $0x268] sm:$0xff] }
0x11ec   :  { %10605 = vmatpush3.msra.mxu0 %v4306_v53 }
0x11ed   :  { %10606 = vmatprep.subr.mxu0 %v4305_v16 }
0x11ee   :  { %10607 = vmatpush3.msra.mxu0 %v4305_v16 }
0x11ef   :  { %v11191_v0 = vpop.eup %11190  ;;  %10608 = vmatprep.subr.mxu0 %v4304_v17 }
0x11f0   :  { %v4134_v11 = vmul.f32 %v11191_v0, %v11183_v50  ;;  %10609 = vmatpush3.msra.mxu0 %v4304_v17  ;;  %v4630_v0 = vld [vmem:[#allocation2 + $0x200] sm:$0xff] }
0x11f1   :  { %v11193_v1 = vpop.eup %11192  ;;  %10610 = vmatprep.subr.mxu0 %v4303_v23 }
0x11f2   :  { %v4133_v56 = vmul.f32 %v11193_v1, %v11185_v8  ;;  %10611 = vmatpush3.msra.mxu0 %v4303_v23 }
0x11f3   :  { %10632 = vmatprep.subr.mxu0 %v4633_v54 }
0x11f4   :  { %10601 = vmatprep.mubr.msk.f32.mxu1 %vm2964_vm14, %v4133_v56 }
0x11f5   :  { %10602 = vmatmul.mubr.msk.f32.vlgmr.msra.gmra.mxu1 %vm2964_vm14, %v4134_v11 }
0x11f6   :  { %10619 = vmatpush3.msra.mxu1 %v4519_v55 }
0x11f7   :  { %10620 = vmatprep.subr.mxu1 %v4518_v63 }
0x11f8   :  { %10621 = vmatpush3.msra.mxu1 %v4518_v63 }
0x11f9   :  { %10622 = vmatprep.subr.mxu1 %v4517_v58 }
0x11fa   :  { %10623 = vmatpush3.msra.mxu1 %v4517_v58 }
0x11fb   :  { %10624 = vmatprep.subr.mxu1 %v4516_v60 }
0x11fc   :  { %10625 = vmatpush3.msra.mxu1 %v4516_v60 }
0x12ab   :  { %v10598_v6 = vpop.f32.mrf.mxu0 }
0x12ac   :  { %v4300_v25 = vadd.f32 %v10598_v6, %v12181_v35 }
0x12ad   :  { %v4209_v33 = vpop.f32.mrf.mxu0 }
0x12ae   :  { %v4299_v44 = vadd.f32 %v4209_v33, %v12184_v28  ;;  %v9651_v28 = vld [vmem:[%s13120_s4 + $0xa] ss:$0 sm:$0xff] }
0x12b0   :  { %10612 = vmatprep.mubr.msk.f32.mxu0 %vm75_vm0, %v4299_v44 }
0x12b1   :  { %10613 = vmatmul.mubr.msk.f32.vlgmr.msra.gmra.mxu0 %vm75_vm0, %v4300_v25 }
0x12b2   :  { %10633 = vmatpush3.msra.mxu0 %v4633_v54 }
0x12b3   :  { %10634 = vmatprep.subr.mxu0 %v4632_v10 }
0x12b4   :  { %10635 = vmatpush3.msra.mxu0 %v4632_v10  ;;  %v4629_v10 = vld [vmem:[#allocation2 + $0x198] sm:$0xff] }
0x12b5   :  { %v10603_v21 = vpop.f32.mrf.mxu1  ;;  %10636 = vmatprep.subr.mxu0 %v4631_v62 }
0x12b6   :  { %v4302_v31 = vadd.f32 %v10603_v21, %v12189_v37  ;;  %10637 = vmatpush3.msra.mxu0 %v4631_v62  ;;  %v4628_v62 = vld [vmem:[#allocation2 + $0x130] sm:$0xff] }
0x12b7   :  { %v4290_v4 = vpop.f32.mrf.mxu1  ;;  %10638 = vmatprep.subr.mxu0 %v4630_v0 }
0x12b8   :  { %v4301_v40 = vadd.f32 %v4290_v4, %v12192_v12  ;;  %10639 = vmatpush3.msra.mxu0 %v4630_v0  ;;  %v4627_v0 = vld [vmem:[#allocation2 + $0xc8] sm:$0xff] }
0x12b9   :  { %10640 = vmatprep.subr.mxu0 %v4629_v10 }
0x12ba   :  { %10615 = vmatprep.mubr.msk.f32.mxu0 %vm75_vm0, %v4301_v40  ;;  %10641 = vmatpush3.msra.mxu0 %v4629_v10  ;;  %v5051_v10 = vld [vmem:[#allocation2 + $0x3b0] sm:$0xff] }
0x12bb   :  { %10616 = vmatmul.mubr.msk.f32.gmra.mxu0 %vm75_vm0, %v4302_v31  ;;  %10642 = vmatprep.subr.mxu0 %v4628_v62 }
0x12bc   :  { %10643 = vmatpush3.msra.mxu0 %v4628_v62  ;;  %v4845_v62 = vld [vmem:[#allocation2 + $0x340] sm:$0xff] }
0x12bd   :  { %10644 = vmatprep.subr.mxu0 %v4627_v0 }
0x12be   :  { %10645 = vmatpush3.msra.mxu0 %v4627_v0  ;;  %v5050_v0 = vld [vmem:[#allocation2 + $0x348] sm:$0xff] }
0x1371   :  { %v10614_v34 = vpop.f32.mrf.mxu0 }
0x1372   :  { %v4396_v35 = vadd.f32 %v10614_v34, %v9651_v28 }
0x1373   :  { %v4390_v57 = vpop.f32.mrf.mxu0 }
0x1374   :  { %v12216_v38 = vadd.f32 %v4396_v35, %v11922_v20  ;;  %v4391_v3 = vadd.f32 %v9651_v28, %v4390_v57 }
0x1376   :  { %v12219_v7 = vadd.f32 %v4391_v3, %v11927_v13  ;;  %v4419_v37 = vsel %vm75_vm0, %v12216_v38, 0.0 }
0x1377   :  { %4420 = vadd.xlane.f32.xlu1 %v4419_v37 }
0x1378   :  { %v4416_v12 = vsel %vm75_vm0, %v12219_v7, 0.0 }
0x1379   :  { %4417 = vadd.xlane.f32.xlu0 %v4416_v12 }
0x137b   :  { %v10617_v14 = vpop.f32.mrf.mxu0 }
0x137c   :  { %v4406_v39 = vadd.f32 %v10617_v14, %v9651_v28 }
0x137d   :  { %v4400_v2 = vpop.f32.mrf.mxu0 }
0x137e   :  { %v12226_v43 = vadd.f32 %v4406_v39, %v11936_v59  ;;  %v4401_v20 = vadd.f32 %v9651_v28, %v4400_v2 }
0x1380   :  { %v12229_v18 = vadd.f32 %v4401_v20, %v11941_v61  ;;  %v4425_v13 = vsel %vm75_vm0, %v12226_v43, 0.0 }
0x1381   :  { %4426 = vadd.xlane.f32.xlu1 %v4425_v13 }
0x1382   :  { %v4422_v15 = vsel %vm75_vm0, %v12229_v18, 0.0 }
0x1383   :  { %4423 = vadd.xlane.f32.xlu0 %v4422_v15 }
0x1400   :  { %v4421_v24 = vpop.xlane.xlu1 %4420 }
0x1401   :  { %v4429_v32 = vmul.f32 0.03125, %v4421_v24 }
0x1402   :  { %v4418_v22 = vpop.xlane.xlu0 %4417 }
0x1403   :  { %v12236_v19 = vsub.f32 %v12216_v38, %v4429_v32  ;;  %v4428_v59 = vmul.f32 0.03125, %v4418_v22 }
0x1405   :  { %v12239_v36 = vsub.f32 %v12219_v7, %v4428_v59  ;;  %v4437_v61 = vmul.f32 %v12236_v19, %v12236_v19 }
0x1407   :  { %v4443_v27 = vsel %vm75_vm0, %v4437_v61, 0.0  ;;  %v4436_v9 = vmul.f32 %v12239_v36, %v12239_v36  ;;  %v9658_v61 = vld [vmem:[%s13121_s5 + $0x4] ss:$0 sm:$0xff] }
0x1408   :  { %4444 = vadd.xlane.f32.xlu1 %v4443_v27 }
0x1409   :  { %v4440_v46 = vsel %vm75_vm0, %v4436_v9, 0.0 }
0x140a   :  { %v4427_v47 = vpop.xlane.xlu1 %4426  ;;  %4441 = vadd.xlane.f32.xlu0 %v4440_v46  ;;  %v4501_v46 = vmul.f32 %v9658_v61, %v12236_v19 }
0x140b   :  { %v4431_v45 = vmul.f32 0.03125, %v4427_v47  ;;  %v4500_v47 = vmul.f32 %v9658_v61, %v12239_v36 }
0x140c   :  { %v4424_v48 = vpop.xlane.xlu0 %4423 }
0x140d   :  { %v12248_v49 = vsub.f32 %v12226_v43, %v4431_v45  ;;  %v4430_v50 = vmul.f32 0.03125, %v4424_v48 }
0x140f   :  { %v12251_v52 = vsub.f32 %v12229_v18, %v4430_v50  ;;  %v4439_v8 = vmul.f32 %v12248_v49, %v12248_v49  ;;  %v9659_v50 = vld [vmem:[%s13121_s5 + $0x5] ss:$0 sm:$0xff]  ;;  %v4503_v55 = vmul.f32 %v9658_v61, %v12248_v49 }
0x1410   :  { %v4626_v49 = vld [vmem:[#allocation2 + $0x60] sm:$0xff] }
0x1411   :  { %v4449_v26 = vsel %vm75_vm0, %v4439_v8, 0.0  ;;  %v4438_v53 = vmul.f32 %v12251_v52, %v12251_v52  ;;  %v4502_v19 = vmul.f32 %v9658_v61, %v12251_v52  ;;  %10646 = vmatprep.subr.mxu0 %v4626_v49  ;;  %v9660_v52 = vld [vmem:[%s13120_s4 + $0xb] ss:$0 sm:$0xff] }
0x1412   :  { %4450 = vadd.xlane.f32.xlu1 %v4449_v26  ;;  %10647 = vmatpush3.msra.mxu0 %v4626_v49  ;;  %v12327_v49 = vld [vmem:[#allocation2 + $0x490] sm:$0xff] }
0x1413   :  { %v4446_v30 = vsel %vm75_vm0, %v4438_v53, 0.0 }
0x1414   :  { %4447 = vadd.xlane.f32.xlu0 %v4446_v30 }
0x1491   :  { %v4445_v1 = vpop.xlane.xlu1 %4444 }
0x1492   :  { %v4453_v56 = vmul.f32 0.032258064, %v4445_v1 }
0x1493   :  { %v4442_v11 = vpop.xlane.xlu0 %4441 }
0x1494   :  { %11194 = vrsqrt.f32 %v4453_v56  ;;  %v4452_v16 = vmul.f32 0.032258064, %v4442_v11  ;;  %vm4465_vm1 = vcmp.eq.f32.partialorder %v4453_v56, inf  ;;  %v4468_v21 = vand.u32 2147483648, %v4453_v56 }
0x1495   :  { %vm4467_vm2 = vcmp.eq.f32.partialorder %v4453_v56, 0.0 }
0x1496   :  { %11196 = vrsqrt.f32 %v4452_v16  ;;  %vm4458_vm3 = vcmp.eq.f32.partialorder %v4452_v16, inf  ;;  %v4461_v35 = vand.u32 2147483648, %v4452_v16  ;;  %vm4460_vm4 = vcmp.eq.f32.partialorder %v4452_v16, 0.0 }
0x149b   :  { %v4451_v17 = vpop.xlane.xlu1 %4450 }
0x149c   :  { %v4455_v23 = vmul.f32 0.032258064, %v4451_v17 }
0x149d   :  { %v4448_v6 = vpop.xlane.xlu0 %4447 }
0x149e   :  { %11198 = vrsqrt.f32 %v4455_v23  ;;  %v4454_v33 = vmul.f32 0.032258064, %v4448_v6  ;;  %vm4479_vm6 = vcmp.eq.f32.partialorder %v4455_v23, inf  ;;  %v4482_v39 = vand.u32 2147483648, %v4455_v23 }
0x149f   :  { %vm4481_vm7 = vcmp.eq.f32.partialorder %v4455_v23, 0.0 }
0x14a0   :  { %11200 = vrsqrt.f32 %v4454_v33  ;;  %vm4472_vm8 = vcmp.eq.f32.partialorder %v4454_v33, inf  ;;  %v4475_v32 = vand.u32 2147483648, %v4454_v33  ;;  %vm4474_vm9 = vcmp.eq.f32.partialorder %v4454_v33, 0.0 }
0x14a1   :  { %v11195_v44 = vpop.eup %11194 }
0x14a2   :  { %v4464_v25 = vmul.f32 %v11195_v44, %v4453_v56 }
0x14a3   :  { %v11197_v4 = vpop.eup %11196 }
0x14a4   :  { %v4466_v40 = vsel %vm4465_vm1, %v4453_v56, %v4464_v25  ;;  %v4457_v28 = vmul.f32 %v11197_v4, %v4452_v16 }
0x14a5   :  { %v4469_v31 = vsel %vm4467_vm2, %v4468_v21, %v4466_v40  ;;  %v9665_v40 = vld [vmem:[%s13120_s4 + $0xc] ss:$0 sm:$0xff] }
0x14a6   :  { %v4485_v34 = vadd.f32 1e-06, %v4469_v31  ;;  %v4459_v57 = vsel %vm4458_vm3, %v4452_v16, %v4457_v28 }
0x14a7   :  { %v4462_v3 = vsel %vm4460_vm4, %v4461_v35, %v4459_v57 }
0x14a8   :  { %11202 = vrcp.f32 %v4485_v34  ;;  %v4484_v37 = vadd.f32 1e-06, %v4462_v3 }
0x14aa   :  { %11204 = vrcp.f32 %v4484_v37 }
0x14ab   :  { %v11199_v12 = vpop.eup %11198 }
0x14ac   :  { %v4478_v14 = vmul.f32 %v11199_v12, %v4455_v23 }
0x14ad   :  { %v11201_v2 = vpop.eup %11200 }
0x14ae   :  { %v4480_v20 = vsel %vm4479_vm6, %v4455_v23, %v4478_v14  ;;  %v4471_v15 = vmul.f32 %v11201_v2, %v4454_v33 }
0x14af   :  { %v4483_v13 = vsel %vm4481_vm7, %v4482_v39, %v4480_v20 }
0x14b0   :  { %v4487_v24 = vadd.f32 1e-06, %v4483_v13  ;;  %v4473_v22 = vsel %vm4472_vm8, %v4454_v33, %v4471_v15 }
0x14b1   :  { %v4476_v59 = vsel %vm4474_vm9, %v4475_v32, %v4473_v22 }
0x14b2   :  { %11206 = vrcp.f32 %v4487_v24  ;;  %v4486_v27 = vadd.f32 1e-06, %v4476_v59 }
0x14b4   :  { %11208 = vrcp.f32 %v4486_v27 }
0x14b5   :  { %v11203_v9 = vpop.eup %11202 }
0x14b6   :  { %v4505_v48 = vmul.f32 %v11203_v9, %v4501_v46 }
0x14b7   :  { %v11205_v45 = vpop.eup %11204 }
0x14b8   :  { %v4504_v8 = vmul.f32 %v11205_v45, %v4500_v47  ;;  %v4513_v53 = vadd.f32 %v9659_v50, %v4505_v48 }
0x14ba   :  { %v4512_v26 = vadd.f32 %v9659_v50, %v4504_v8 }
0x14bc   :  { %10626 = vmatprep.mubr.msk.f32.mxu1 %vm75_vm0, %v4512_v26 }
0x14bd   :  { %10627 = vmatmul.mubr.msk.f32.vlgmr.msra.gmra.mxu1 %vm75_vm0, %v4513_v53 }
0x14bf   :  { %v11207_v30 = vpop.eup %11206 }
0x14c0   :  { %v4507_v36 = vmul.f32 %v11207_v30, %v4503_v55 }
0x14c1   :  { %v11209_v63 = vpop.eup %11208 }
0x14c2   :  { %v4506_v58 = vmul.f32 %v11209_v63, %v4502_v19  ;;  %v4515_v54 = vadd.f32 %v9659_v50, %v4507_v36  ;;  %v4848_v63 = vld [vmem:[#allocation2 + $0x478] sm:$0xff]  ;;  %v5053_v36 = vld [vmem:[#allocation2 + $0x480] sm:$0xff] }
0x14c3   :  { %10654 = vmatprep.subr.mxu1 %v4848_v63  ;;  %10682 = vmatprep.subr.mxu0 %v5053_v36 }
0x14c4   :  { %v4514_v60 = vadd.f32 %v9659_v50, %v4506_v58  ;;  %v4847_v58 = vld [vmem:[#allocation2 + $0x410] sm:$0xff]  ;;  %10655 = vmatpush3.msra.mxu1 %v4848_v63 }
0x14c5   :  { %10656 = vmatprep.subr.mxu1 %v4847_v58 }
0x14c6   :  { %10629 = vmatprep.mubr.msk.f32.mxu1 %vm75_vm0, %v4514_v60  ;;  %v5052_v60 = vld [vmem:[#allocation2 + $0x418] sm:$0xff]  ;;  %10657 = vmatpush3.msra.mxu1 %v4847_v58  ;;  %v4953_v58 = vld [vmem:[#allocation2 + $0x3c0] sm:$0xff] }
0x14c7   :  { %10630 = vmatmul.mubr.msk.f32.gmra.mxu1 %vm75_vm0, %v4515_v54  ;;  %v4846_v54 = vld [vmem:[#allocation2 + $0x3a8] sm:$0xff] }
0x14c8   :  { %10658 = vmatprep.subr.mxu1 %v4846_v54 }
0x14c9   :  { %10659 = vmatpush3.msra.mxu1 %v4846_v54 }
0x14ca   :  { %10660 = vmatprep.subr.mxu1 %v4845_v62 }
0x14cb   :  { %10661 = vmatpush3.msra.mxu1 %v4845_v62  ;;  %v4952_v62 = vld [vmem:[#allocation2 + $0x358] sm:$0xff] }
0x14cc   :  { %10668 = vmatprep.subr.mxu1 %v12327_v49 }
0x157d   :  { %v10628_v1 = vpop.f32.mrf.mxu1 }
0x157e   :  { %v4609_v56 = vadd.f32 %v10628_v1, %v9660_v52 }
0x157f   :  { %v4603_v11 = vpop.f32.mrf.mxu1 }
0x1580   :  { %v4604_v16 = vadd.f32 %v9660_v52, %v4603_v11  ;;  %v4623_v23 = vmax.f32 %v4609_v56, 0.0 }
0x1582   :  { %v4622_v17 = vmax.f32 %v4604_v16, 0.0 }
0x1584   :  { %10648 = vmatprep.mubr.msk.f32.mxu0 %vm4639_vm10, %v4622_v17 }
0x1585   :  { %10649 = vmatmul.mubr.msk.f32.vlgmr.msra.gmra.mxu0 %vm4639_vm10, %v4623_v23 }
0x1586   :  { %10683 = vmatpush3.msra.mxu0 %v5053_v36  ;;  %v5244_v36 = vld [vmem:[#allocation2 + $0x420] sm:$0xff] }
0x1587   :  { %v10631_v6 = vpop.f32.mrf.mxu1  ;;  %10684 = vmatprep.subr.mxu0 %v5052_v60 }
0x1588   :  { %v4619_v33 = vadd.f32 %v10631_v6, %v9660_v52  ;;  %10685 = vmatpush3.msra.mxu0 %v5052_v60  ;;  %v5243_v60 = vld [vmem:[#allocation2 + $0x3b8] sm:$0xff] }
0x1589   :  { %v4613_v44 = vpop.f32.mrf.mxu1  ;;  %10686 = vmatprep.subr.mxu0 %v5051_v10 }
0x158a   :  { %v4614_v25 = vadd.f32 %v9660_v52, %v4613_v44  ;;  %v4625_v4 = vmax.f32 %v4619_v33, 0.0  ;;  %10687 = vmatpush3.msra.mxu0 %v5051_v10  ;;  %v12330_v52 = vld [vmem:[#allocation2 + $0x488] sm:$0xff] }
0x158b   :  { %10688 = vmatprep.subr.mxu0 %v5050_v0 }
0x158c   :  { %v4624_v21 = vmax.f32 %v4614_v25, 0.0  ;;  %10689 = vmatpush3.msra.mxu0 %v5050_v0  ;;  %v5242_v0 = vld [vmem:[#allocation2 + $0x350] sm:$0xff] }
0x158d   :  { %10710 = vmatprep.subr.mxu0 %v12330_v52 }
0x158e   :  { %10651 = vmatprep.mubr.msk.f32.mxu0 %vm4639_vm10, %v4624_v21 }
0x158f   :  { %10652 = vmatmul.mubr.msk.f32.gmra.mxu0 %vm4639_vm10, %v4625_v4 }
0x1645   :  { %v10650_v31 = vpop.f32.mrf.mxu0 }
0x1646   :  { %v4724_v28 = vadd.f32 %v10650_v31, %v9665_v40 }
0x1647   :  { %v4718_v34 = vpop.f32.mrf.mxu0 }
0x1648   :  { %v12284_v35 = vadd.f32 %v4724_v28, %v12216_v38  ;;  %v4719_v57 = vadd.f32 %v9665_v40, %v4718_v34 }
0x164a   :  { %v12287_v3 = vadd.f32 %v4719_v57, %v12219_v7  ;;  %v4747_v37 = vsel %vm75_vm0, %v12284_v35, 0.0 }
0x164b   :  { %4748 = vadd.xlane.f32.xlu1 %v4747_v37 }
0x164c   :  { %v4744_v12 = vsel %vm75_vm0, %v12287_v3, 0.0 }
0x164d   :  { %4745 = vadd.xlane.f32.xlu0 %v4744_v12 }
0x164f   :  { %v10653_v14 = vpop.f32.mrf.mxu0 }
0x1650   :  { %v4734_v39 = vadd.f32 %v10653_v14, %v9665_v40 }
0x1651   :  { %v4728_v2 = vpop.f32.mrf.mxu0 }
0x1652   :  { %v12294_v20 = vadd.f32 %v4734_v39, %v12226_v43  ;;  %v4729_v38 = vadd.f32 %v9665_v40, %v4728_v2 }
0x1654   :  { %v12297_v13 = vadd.f32 %v4729_v38, %v12229_v18  ;;  %v4753_v7 = vsel %vm75_vm0, %v12294_v20, 0.0 }
0x1655   :  { %4754 = vadd.xlane.f32.xlu1 %v4753_v7 }
0x1656   :  { %v4750_v15 = vsel %vm75_vm0, %v12297_v13, 0.0 }
0x1657   :  { %4751 = vadd.xlane.f32.xlu0 %v4750_v15 }
0x16d4   :  { %v4749_v24 = vpop.xlane.xlu1 %4748 }
0x16d5   :  { %v4757_v32 = vmul.f32 0.03125, %v4749_v24 }
0x16d6   :  { %v4746_v22 = vpop.xlane.xlu0 %4745 }
0x16d7   :  { %v12304_v59 = vsub.f32 %v12284_v35, %v4757_v32  ;;  %v4756_v43 = vmul.f32 0.03125, %v4746_v22 }
0x16d9   :  { %v12307_v61 = vsub.f32 %v12287_v3, %v4756_v43  ;;  %v4765_v18 = vmul.f32 %v12304_v59, %v12304_v59 }
0x16db   :  { %v4771_v27 = vsel %vm75_vm0, %v4765_v18, 0.0  ;;  %v4764_v9 = vmul.f32 %v12307_v61, %v12307_v61 }
0x16dc   :  { %4772 = vadd.xlane.f32.xlu1 %v4771_v27 }
0x16dd   :  { %v4768_v46 = vsel %vm75_vm0, %v4764_v9, 0.0  ;;  %v9672_v9 = vld [vmem:[%s13121_s5 + $0x6] ss:$0 sm:$0xff] }
0x16de   :  { %v4755_v47 = vpop.xlane.xlu1 %4754  ;;  %4769 = vadd.xlane.f32.xlu0 %v4768_v46 }
0x16df   :  { %v4759_v45 = vmul.f32 0.03125, %v4755_v47 }
0x16e0   :  { %v4752_v48 = vpop.xlane.xlu0 %4751 }
0x16e1   :  { %v12316_v50 = vsub.f32 %v12294_v20, %v4759_v45  ;;  %v4758_v8 = vmul.f32 0.03125, %v4752_v48  ;;  %v4829_v45 = vmul.f32 %v9672_v9, %v12304_v59  ;;  %v4828_v48 = vmul.f32 %v9672_v9, %v12307_v61  ;;  %v4954_v59 = vld [vmem:[#allocation2 + $0x428] sm:$0xff] }
0x16e3   :  { %v12319_v26 = vsub.f32 %v12297_v13, %v4758_v8  ;;  %v4767_v53 = vmul.f32 %v12316_v50, %v12316_v50  ;;  %v4831_v54 = vmul.f32 %v9672_v9, %v12316_v50 }
0x16e5   :  { %v4777_v30 = vsel %vm75_vm0, %v4767_v53, 0.0  ;;  %v4766_v55 = vmul.f32 %v12319_v26, %v12319_v26  ;;  %v4830_v10 = vmul.f32 %v9672_v9, %v12319_v26  ;;  %v5146_v26 = vld [vmem:[#allocation2 + $0x430] sm:$0xff] }
0x16e6   :  { %4778 = vadd.xlane.f32.xlu1 %v4777_v30  ;;  %v9673_v30 = vld [vmem:[%s13121_s5 + $0x7] ss:$0 sm:$0xff] }
0x16e7   :  { %v4774_v19 = vsel %vm75_vm0, %v4766_v55, 0.0 }
0x16e8   :  { %4775 = vadd.xlane.f32.xlu0 %v4774_v19 }
0x1765   :  { %v4773_v1 = vpop.xlane.xlu1 %4772 }
0x1766   :  { %v4781_v56 = vmul.f32 0.032258064, %v4773_v1 }
0x1767   :  { %v4770_v11 = vpop.xlane.xlu0 %4769 }
0x1768   :  { %11210 = vrsqrt.f32 %v4781_v56  ;;  %v4780_v16 = vmul.f32 0.032258064, %v4770_v11  ;;  %vm4793_vm11 = vcmp.eq.f32.partialorder %v4781_v56, inf  ;;  %v4796_v21 = vand.u32 2147483648, %v4781_v56 }
0x1769   :  { %vm4795_vm12 = vcmp.eq.f32.partialorder %v4781_v56, 0.0 }
0x176a   :  { %11212 = vrsqrt.f32 %v4780_v16  ;;  %vm4786_vm13 = vcmp.eq.f32.partialorder %v4780_v16, inf  ;;  %v4789_v57 = vand.u32 2147483648, %v4780_v16  ;;  %vm4788_vm1 = vcmp.eq.f32.partialorder %v4780_v16, 0.0 }
0x176f   :  { %v4779_v17 = vpop.xlane.xlu1 %4778 }
0x1770   :  { %v4783_v23 = vmul.f32 0.032258064, %v4779_v17  ;;  %v5144_v17 = vld [vmem:[#allocation2 + $0x360] sm:$0xff] }
0x1771   :  { %v4776_v6 = vpop.xlane.xlu0 %4775 }
0x1772   :  { %11214 = vrsqrt.f32 %v4783_v23  ;;  %v4782_v33 = vmul.f32 0.032258064, %v4776_v6  ;;  %vm4807_vm2 = vcmp.eq.f32.partialorder %v4783_v23, inf  ;;  %v4810_v38 = vand.u32 2147483648, %v4783_v23  ;;  %v5338_v6 = vld [vmem:[#allocation2 + $0x438] sm:$0xff] }
0x1773   :  { %vm4809_vm3 = vcmp.eq.f32.partialorder %v4783_v23, 0.0 }
0x1774   :  { %11216 = vrsqrt.f32 %v4782_v33  ;;  %vm4800_vm4 = vcmp.eq.f32.partialorder %v4782_v33, inf  ;;  %v4803_v43 = vand.u32 2147483648, %v4782_v33  ;;  %vm4802_vm6 = vcmp.eq.f32.partialorder %v4782_v33, 0.0 }
0x1775   :  { %v11211_v44 = vpop.eup %11210 }
0x1776   :  { %v4792_v25 = vmul.f32 %v11211_v44, %v4781_v56  ;;  %v5336_v44 = vld [vmem:[#allocation2 + $0x368] sm:$0xff] }
0x1777   :  { %v11213_v4 = vpop.eup %11212 }
0x1778   :  { %v4794_v40 = vsel %vm4793_vm11, %v4781_v56, %v4792_v25  ;;  %v4785_v28 = vmul.f32 %v11213_v4, %v4780_v16 }
0x1779   :  { %v4797_v31 = vsel %vm4795_vm12, %v4796_v21, %v4794_v40 }
0x177a   :  { %v4813_v34 = vadd.f32 1e-06, %v4797_v31  ;;  %v4787_v37 = vsel %vm4786_vm13, %v4780_v16, %v4785_v28  ;;  %v5145_v16 = vld [vmem:[#allocation2 + $0x3c8] sm:$0xff] }
0x177b   :  { %v4790_v12 = vsel %vm4788_vm1, %v4789_v57, %v4787_v37 }
0x177c   :  { %11218 = vrcp.f32 %v4813_v34  ;;  %v4812_v14 = vadd.f32 1e-06, %v4790_v12 }
0x177e   :  { %11220 = vrcp.f32 %v4812_v14  ;;  %v9675_v14 = vld [vmem:[%s13120_s4 + $0x10] ss:$0 sm:$0xff] }
0x177f   :  { %v11215_v39 = vpop.eup %11214 }
0x1780   :  { %v4806_v2 = vmul.f32 %v11215_v39, %v4783_v23  ;;  %v9681_v39 = vld [vmem:[%s13120_s4 + $0x13] ss:$0 sm:$0xff] }
0x1781   :  { %v11217_v7 = vpop.eup %11216 }
0x1782   :  { %v4808_v15 = vsel %vm4807_vm2, %v4783_v23, %v4806_v2  ;;  %v4799_v32 = vmul.f32 %v11217_v7, %v4782_v33  ;;  %v5339_v23 = vld [vmem:[#allocation2 + $0x4a0] sm:$0xff] }
0x1783   :  { %v4811_v24 = vsel %vm4809_vm3, %v4810_v38, %v4808_v15 }
0x1784   :  { %v4815_v22 = vadd.f32 1e-06, %v4811_v24  ;;  %v4801_v18 = vsel %vm4800_vm4, %v4782_v33, %v4799_v32  ;;  %v5337_v33 = vld [vmem:[#allocation2 + $0x3d0] sm:$0xff] }
0x1785   :  { %v4804_v27 = vsel %vm4802_vm6, %v4803_v43, %v4801_v18  ;;  %v9693_v18 = vld [vmem:[%s13120_s4 + $0x14] ss:$0 sm:$0xff] }
0x1786   :  { %11222 = vrcp.f32 %v4815_v22  ;;  %v4814_v46 = vadd.f32 1e-06, %v4804_v27 }
0x1788   :  { %11224 = vrcp.f32 %v4814_v46 }
0x1789   :  { %v11219_v47 = vpop.eup %11218 }
0x178a   :  { %v4833_v53 = vmul.f32 %v11219_v47, %v4829_v45  ;;  %v9687_v47 = vld [vmem:[%s13120_s4 + $0x11] ss:$0 sm:$0xff] }
0x178b   :  { %v11221_v8 = vpop.eup %11220 }
0x178c   :  { %v4832_v55 = vmul.f32 %v11221_v8, %v4828_v48  ;;  %v12343_v63 = vadd.f32 %v9673_v30, %v4833_v53 }
0x178e   :  { %v12341_v19 = vadd.f32 %v9673_v30, %v4832_v55 }
0x1790   :  { %10662 = vmatprep.mubr.msk.f32.mxu1 %vm75_vm0, %v12341_v19  ;;  %10690 = vmatprep.mubr.msk.f32.mxu0 %vm75_vm0, %v12341_v19 }
0x1791   :  { %10663 = vmatmul.mubr.msk.f32.vlgmr.msra.gmra.mxu1 %vm75_vm0, %v12343_v63  ;;  %10691 = vmatmul.mubr.msk.f32.vlgmr.msra.gmra.mxu0 %vm75_vm0, %v12343_v63 }
0x1792   :  { %10669 = vmatpush3.msra.mxu1 %v12327_v49  ;;  %10711 = vmatpush3.msra.mxu0 %v12330_v52  ;;  %v5147_v49 = vld [vmem:[#allocation2 + $0x498] sm:$0xff] }
0x1793   :  { %v11223_v61 = vpop.eup %11222  ;;  %10670 = vmatprep.subr.mxu1 %v4954_v59  ;;  %10712 = vmatprep.subr.mxu0 %v5244_v36 }
0x1794   :  { %10671 = vmatpush3.msra.mxu1 %v4954_v59  ;;  %10713 = vmatpush3.msra.mxu0 %v5244_v36  ;;  %v4835_v56 = vmul.f32 %v11223_v61, %v4831_v54 }
0x1795   :  { %v11225_v1 = vpop.eup %11224  ;;  %10672 = vmatprep.subr.mxu1 %v4953_v58  ;;  %10714 = vmatprep.subr.mxu0 %v5243_v60 }
0x1796   :  { %v4834_v11 = vmul.f32 %v11225_v1, %v4830_v10  ;;  %10673 = vmatpush3.msra.mxu1 %v4953_v58  ;;  %10715 = vmatpush3.msra.mxu0 %v5243_v60  ;;  %v4843_v50 = vadd.f32 %v9673_v30, %v4835_v56 }
0x1797   :  { %10674 = vmatprep.subr.mxu1 %v4952_v62  ;;  %10716 = vmatprep.subr.mxu0 %v5242_v0 }
0x1798   :  { %v4842_v52 = vadd.f32 %v9673_v30, %v4834_v11  ;;  %10675 = vmatpush3.msra.mxu1 %v4952_v62  ;;  %10717 = vmatpush3.msra.mxu0 %v5242_v0 }
0x1799   :  { %10696 = vmatprep.subr.mxu1 %v5147_v49 }
0x179a   :  { %10665 = vmatprep.mubr.msk.f32.mxu1 %vm75_vm0, %v4842_v52  ;;  %10693 = vmatprep.mubr.msk.f32.mxu0 %vm75_vm0, %v4842_v52 }
0x179b   :  { %10666 = vmatmul.mubr.msk.f32.gmra.mxu1 %vm75_vm0, %v4843_v50  ;;  %10694 = vmatmul.mubr.msk.f32.gmra.mxu0 %vm75_vm0, %v4843_v50 }
0x179c   :  { %10676 = vmatprep.mubr.msk.f32.mxu1 %vm75_vm0, %v12341_v19  ;;  %10718 = vmatprep.mubr.msk.f32.mxu0 %vm75_vm0, %v12341_v19 }
0x179f   :  { %10677 = vmatmul.mubr.msk.f32.vlgmr.msra.gmra.mxu1 %vm75_vm0, %v12343_v63  ;;  %10719 = vmatmul.mubr.msk.f32.vlgmr.msra.gmra.mxu0 %vm75_vm0, %v12343_v63 }
0x17a0   :  { %10697 = vmatpush3.msra.mxu1 %v5147_v49  ;;  %10679 = vmatprep.mubr.msk.f32.mxu1 %vm75_vm0, %v4842_v52 }
0x17a1   :  { %10698 = vmatprep.subr.mxu1 %v5146_v26  ;;  %10721 = vmatprep.mubr.msk.f32.mxu0 %vm75_vm0, %v4842_v52 }
0x17a2   :  { %10699 = vmatpush3.msra.mxu1 %v5146_v26 }
0x17a3   :  { %10700 = vmatprep.subr.mxu1 %v5145_v16  ;;  %10680 = vmatmul.mubr.msk.f32.gmra.mxu1 %vm75_vm0, %v4843_v50 }
0x17a4   :  { %10701 = vmatpush3.msra.mxu1 %v5145_v16  ;;  %10722 = vmatmul.mubr.msk.f32.gmra.mxu0 %vm75_vm0, %v4843_v50  ;;  %v9699_v16 = vld [vmem:[%s13120_s4 + $0x12] ss:$0 sm:$0xff] }
0x17a5   :  { %10702 = vmatprep.subr.mxu1 %v5144_v17  ;;  %10704 = vmatprep.mubr.msk.f32.mxu1 %vm75_vm0, %v12341_v19 }
0x17a6   :  { %10703 = vmatpush3.msra.mxu1 %v5144_v17 }
0x17a7   :  { %10705 = vmatmul.mubr.msk.f32.vlgmr.msra.gmra.mxu1 %vm75_vm0, %v12343_v63  ;;  %10724 = vmatprep.subr.mxu1 %v5339_v23 }
0x17a8   :  { %10707 = vmatprep.mubr.msk.f32.mxu1 %vm75_vm0, %v4842_v52  ;;  %10725 = vmatpush3.msra.mxu1 %v5339_v23 }
0x17a9   :  { %10726 = vmatprep.subr.mxu1 %v5338_v6 }
0x17aa   :  { %10727 = vmatpush3.msra.mxu1 %v5338_v6 }
0x17ab   :  { %10708 = vmatmul.mubr.msk.f32.gmra.mxu1 %vm75_vm0, %v4843_v50  ;;  %10728 = vmatprep.subr.mxu1 %v5337_v33 }
0x17ac   :  { %10729 = vmatpush3.msra.mxu1 %v5337_v33  ;;  %10732 = vmatprep.mubr.msk.f32.mxu1 %vm75_vm0, %v12341_v19 }
0x17ad   :  { %10730 = vmatprep.subr.mxu1 %v5336_v44 }
0x17ae   :  { %10731 = vmatpush3.msra.mxu1 %v5336_v44 }
0x17af   :  { %10733 = vmatmul.mubr.msk.f32.vlgmr.msra.gmra.mxu1 %vm75_vm0, %v12343_v63 }
0x17b0   :  { %10735 = vmatprep.mubr.msk.f32.mxu1 %vm75_vm0, %v4842_v52 }
0x17b3   :  { %10736 = vmatmul.mubr.msk.f32.gmra.mxu1 %vm75_vm0, %v4843_v50  ;;  %v9705_v50 = vld [vmem:[%s13120_s4 + $0x15] ss:$0 sm:$0xff] }
0x1851   :  { %v10664_v25 = vpop.f32.mrf.mxu1  ;;  %v10692_v21 = vpop.f32.mrf.mxu0 }
0x1853   :  { %v4933_v4 = vpop.f32.mrf.mxu1  ;;  %v5125_v40 = vpop.f32.mrf.mxu0 }
0x1854   :  { %v4934_v15 = vadd.f32 %v9675_v14, %v4933_v4  ;;  %v5126_v19 = vadd.f32 %v9687_v47, %v5125_v40 }
0x185b   :  { %v10667_v31 = vpop.f32.mrf.mxu1  ;;  %v10695_v28 = vpop.f32.mrf.mxu0 }
0x185d   :  { %v4943_v34 = vpop.f32.mrf.mxu1  ;;  %v5135_v57 = vpop.f32.mrf.mxu0 }
0x185e   :  { %v4944_v27 = vadd.f32 %v9675_v14, %v4943_v34  ;;  %v5136_v0 = vadd.f32 %v9687_v47, %v5135_v57  ;;  %v12523_v47 = vld [vmem:[%s13118_s2 + $0x8] sm:$0xff] }
0x185f   :  { %v10678_v37 = vpop.f32.mrf.mxu1  ;;  %v10720_v12 = vpop.f32.mrf.mxu0 }
0x1860   :  { %v5033_v45 = vadd.f32 %v10678_v37, %v9681_v39 }
0x1861   :  { %v5027_v2 = vpop.f32.mrf.mxu1  ;;  %v5317_v38 = vpop.f32.mrf.mxu0 }
0x1862   :  { %v5028_v7 = vadd.f32 %v9681_v39, %v5027_v2  ;;  %v12412_v36 = vmul.f32 0.35355338, %v5033_v45  ;;  %v5318_v25 = vadd.f32 %v9699_v16, %v5317_v38 }
0x1863   :  { %v10681_v24 = vpop.f32.mrf.mxu1 }
0x1864   :  { %v10723_v32 = vpop.f32.mrf.mxu0  ;;  %v5046_v22 = vsel %vm43_vm15, %v4934_v15, %v5028_v7  ;;  %v5043_v58 = vadd.f32 %v10681_v24, %v9681_v39  ;;  %v5439_v11 = vmul.f32 %v12412_v36, %v11609_v5  ;;  %v5665_v37 = vmul.f32 %v12412_v36, %v11657_v29 }
0x1865   :  { %v5037_v43 = vpop.f32.mrf.mxu1  ;;  %v12396_v9 = vmul.f32 0.35355338, %v5046_v22  ;;  %v12516_v22 = vld [vmem:[%s13118_s2] sm:$0xff] }
0x1866   :  { %v5038_v46 = vadd.f32 %v9681_v39, %v5037_v43  ;;  %v12435_v49 = vmul.f32 0.35355338, %v5043_v58  ;;  %v5327_v4 = vpop.f32.mrf.mxu0 }
0x1867   :  { %v10706_v48 = vpop.f32.mrf.mxu1  ;;  %v5438_v30 = vmul.f32 %v12396_v9, %v11609_v5  ;;  %v5664_v17 = vmul.f32 %v12396_v9, %v11657_v29  ;;  %v5328_v12 = vadd.f32 %v9699_v16, %v5327_v4 }
0x1868   :  { %v5048_v8 = vsel %vm43_vm15, %v4944_v27, %v5038_v46  ;;  %v12403_v53 = vadd.f32 %v10706_v48, %v9693_v18  ;;  %v5441_v44 = vmul.f32 %v12435_v49, %v11609_v5  ;;  %v5667_v38 = vmul.f32 %v12435_v49, %v11657_v29 }
0x1869   :  { %v5219_v55 = vpop.f32.mrf.mxu1  ;;  %v12407_v63 = vmul.f32 0.35355338, %v5048_v8  ;;  %10742 = vmatprep.mubr.msk.f32.mxu0 %vm75_vm0, %v5438_v30 }
0x186a   :  { %v5220_v59 = vadd.f32 %v9693_v18, %v5219_v55  ;;  %10738 = vmatprep.subr.msk.mxu0 %vm75_vm0, %v12403_v53 }
0x186b   :  { %v10709_v61 = vpop.f32.mrf.mxu1  ;;  %10739 = vmatpush3.xpose.msk.msra.mxu0 %vm75_vm0, %v12403_v53  ;;  %v5440_v10 = vmul.f32 %v12407_v63, %v11609_v5  ;;  %v5666_v31 = vmul.f32 %v12407_v63, %v11657_v29 }
0x186c   :  { %v12418_v60 = vsel %vm43_vm15, %v5126_v19, %v5220_v59  ;;  %v12420_v54 = vadd.f32 %v10709_v61, %v9693_v18 }
0x186d   :  { %v5229_v62 = vpop.f32.mrf.mxu1  ;;  %10740 = vmatprep.subr.msk.mxu0 %vm75_vm0, %v12418_v60  ;;  %10749 = vmatprep.mubr.msk.f32.mxu1 %vm75_vm0, %v5440_v10  ;;  %v12533_v10 = vld [vmem:[%s13118_s2 + $0x10] sm:$0xff] }
0x186e   :  { %v5230_v1 = vadd.f32 %v9693_v18, %v5229_v62  ;;  %10745 = vmatprep.subr.msk.mxu1 %vm75_vm0, %v12420_v54 }
0x186f   :  { %v10734_v56 = vpop.f32.mrf.mxu1  ;;  %10741 = vmatpush3.xpose.msk.msra.mxu0 %vm75_vm0, %v12418_v60  ;;  %10746 = vmatpush3.xpose.msk.msra.mxu1 %vm75_vm0, %v12420_v54 }
0x1870   :  { %v12439_v52 = vsel %vm43_vm15, %v5136_v0, %v5230_v1  ;;  %10752 = vmatprep.subr.msk.mxu0 %vm75_vm0, %v12403_v53  ;;  %v12454_v23 = vadd.f32 %v10734_v56, %v9705_v50  ;;  %v12540_v1 = vld [vmem:[%s13118_s2 + $0x18] sm:$0xff] }
0x1871   :  { %v5411_v26 = vpop.f32.mrf.mxu1  ;;  %10747 = vmatprep.subr.msk.mxu1 %vm75_vm0, %v12439_v52 }
0x1872   :  { %10743 = vmatmul.mubr.msk.f32.vlgmr.msra.gmra.mxu0 %vm75_vm0, %v5439_v11  ;;  %v5412_v6 = vadd.f32 %v9705_v50, %v5411_v26  ;;  %v5875_v57 = vmul.f32 %v12454_v23, %v11657_v29  ;;  %v12502_v7 = vmul.f32 %v12454_v23, %v11609_v5 }
0x1873   :  { %v10737_v33 = vpop.f32.mrf.mxu1  ;;  %10748 = vmatpush3.xpose.msk.msra.mxu1 %vm75_vm0, %v12439_v52  ;;  %10753 = vmatpush3.xpose.msk.msra.mxu0 %vm75_vm0, %v12403_v53 }
0x1874   :  { %10756 = vmatprep.mubr.msk.f32.mxu0 %vm75_vm0, %v5664_v17  ;;  %10754 = vmatprep.subr.msk.mxu0 %vm75_vm0, %v12418_v60  ;;  %v12467_v40 = vadd.f32 %v10737_v33, %v9705_v50  ;;  %v12474_v28 = vsel %vm43_vm15, %v5318_v25, %v5412_v6 }
0x1875   :  { %10759 = vmatprep.subr.msk.mxu1 %vm75_vm0, %v12420_v54  ;;  %v5421_v21 = vpop.f32.mrf.mxu1  ;;  %v5874_v14 = vmul.f32 %v12474_v28, %v11657_v29 }
0x1876   :  { %10750 = vmatmul.mubr.msk.f32.vlgmr.msra.gmra.mxu1 %vm75_vm0, %v5441_v44  ;;  %v5422_v34 = vadd.f32 %v9705_v50, %v5421_v21  ;;  %v5877_v39 = vmul.f32 %v12467_v40, %v11657_v29  ;;  %v12510_v15 = vmul.f32 %v12467_v40, %v11609_v5 }
0x1877   :  { %10755 = vmatpush3.xpose.msk.msra.mxu0 %vm75_vm0, %v12418_v60  ;;  %10760 = vmatpush3.xpose.msk.msra.mxu1 %vm75_vm0, %v12420_v54 }
0x1878   :  { %10763 = vmatprep.mubr.msk.f32.mxu1 %vm75_vm0, %v5666_v31  ;;  %10761 = vmatprep.subr.msk.mxu1 %vm75_vm0, %v12439_v52  ;;  %v12494_v2 = vsel %vm43_vm15, %v5328_v12, %v5422_v34 }
0x1879   :  { %10766 = vmatprep.subr.mxu0 %v5875_v57  ;;  %v5876_v51 = vmul.f32 %v12494_v2, %v11657_v29 }
0x187a   :  { %10757 = vmatmul.mubr.msk.f32.vlgmr.msra.gmra.mxu0 %vm75_vm0, %v5665_v37 }
0x187b   :  { %10762 = vmatpush3.xpose.msk.msra.mxu1 %vm75_vm0, %v12439_v52  ;;  %10767 = vmatpush3.msra.mxu0 %v5875_v57 }
0x187c   :  { %10768 = vmatprep.subr.mxu0 %v5874_v14  ;;  %10773 = vmatprep.subr.mxu1 %v5877_v39 }
0x187d   :  { %10769 = vmatpush3.msra.mxu0 %v5874_v14 }
0x187e   :  { %10764 = vmatmul.mubr.msk.f32.vlgmr.msra.gmra.mxu1 %vm75_vm0, %v5667_v38  ;;  %10780 = vmatprep.subr.mxu0 %v12502_v7 }
0x187f   :  { %10774 = vmatpush3.msra.mxu1 %v5877_v39 }
0x1880   :  { %10775 = vmatprep.subr.mxu1 %v5876_v51 }
0x1881   :  { %10776 = vmatpush3.msra.mxu1 %v5876_v51 }
0x1882   :  { %10787 = vmatprep.subr.mxu1 %v12510_v15 }
0x1932   :  { %v10744_v24 = vpop.f32.mrf.mxu0 }
0x1933   :  { %v5526_v59 = vadd.f32 %v12523_v47, %v10744_v24 }
0x1934   :  { %v5520_v32 = vpop.f32.mrf.mxu0 }
0x1935   :  { %v5521_v43 = vadd.f32 %v12516_v22, %v5520_v32  ;;  %v5619_v11 = vsel %vm948_vm5, %v5526_v59, -inf }
0x1936   :  { %v10751_v27 = vpop.f32.mrf.mxu1 }
0x1937   :  { %v5616_v18 = vsel %vm948_vm5, %v5521_v43, -inf  ;;  %v5613_v26 = vadd.f32 %v12540_v1, %v10751_v27 }
0x1938   :  { %5617 = vmax.xlane.f32.xlu0 %v5616_v18  ;;  %v5607_v48 = vpop.f32.mrf.mxu1 }
0x1939   :  { %v5608_v0 = vadd.f32 %v12533_v10, %v5607_v48  ;;  %v5625_v6 = vsel %vm948_vm5, %v5613_v26, -inf }
0x193a   :  { %v10758_v46 = vpop.f32.mrf.mxu0 }
0x193b   :  { %v5746_v45 = vadd.f32 %v12523_v47, %v10758_v46  ;;  %v5622_v17 = vsel %vm948_vm5, %v5608_v0, -inf }
0x193c   :  { %v5740_v8 = vpop.f32.mrf.mxu0 }
0x193d   :  { %v5741_v30 = vadd.f32 %v12516_v22, %v5740_v8  ;;  %v5833_v55 = vsel %vm948_vm5, %v5746_v45, -inf }
0x193e   :  { %5834 = vmax.xlane.f32.xlu1 %v5833_v55  ;;  %v10765_v19 = vpop.f32.mrf.mxu1 }
0x193f   :  { %v5830_v61 = vsel %vm948_vm5, %v5741_v30, -inf  ;;  %v5827_v56 = vadd.f32 %v12540_v1, %v10765_v19 }
0x1940   :  { %5831 = vmax.xlane.f32.xlu0 %v5830_v61  ;;  %v5821_v58 = vpop.f32.mrf.mxu1 }
0x1941   :  { %v5822_v62 = vadd.f32 %v12533_v10, %v5821_v58  ;;  %v5839_v16 = vsel %vm948_vm5, %v5827_v56, -inf }
0x1943   :  { %v5836_v50 = vsel %vm948_vm5, %v5822_v62, -inf }
0x1944   :  { %5620 = vmax.xlane.f32.xlu0 %v5619_v11  ;;  %5837 = vmax.xlane.f32.xlu1 %v5836_v50 }
0x1948   :  { %5840 = vmax.xlane.f32.xlu1 %v5839_v16  ;;  %5623 = vmax.xlane.f32.xlu0 %v5622_v17 }
0x194c   :  { %5626 = vmax.xlane.f32.xlu1 %v5625_v6 }
0x19c1   :  { %v5618_v33 = vpop.xlane.xlu0 %5617 }
0x19c2   :  { %v5628_v44 = vsub.f32 %v5521_v43, %v5618_v33 }
0x19c4   :  { %v5632_v25 = vmul.f32 1.442695, %v5628_v44 }
0x19c6   :  { %11226 = vpow2.f32 %v5632_v25 }
0x19c7   :  { %v5835_v21 = vpop.xlane.xlu1 %5834 }
0x19c8   :  { %v5843_v4 = vsub.f32 %v5746_v45, %v5835_v21 }
0x19c9   :  { %v5832_v31 = vpop.xlane.xlu0 %5831 }
0x19ca   :  { %v5848_v34 = vmul.f32 1.442695, %v5843_v4  ;;  %v5842_v57 = vsub.f32 %v5741_v30, %v5832_v31 }
0x19cc   :  { %11228 = vpow2.f32 %v5848_v34  ;;  %v5846_v37 = vmul.f32 1.442695, %v5842_v57 }
0x19cd   :  { %v5621_v12 = vpop.xlane.xlu0 %5620  ;;  %v5838_v14 = vpop.xlane.xlu1 %5837 }
0x19ce   :  { %11230 = vpow2.f32 %v5846_v37  ;;  %v5629_v39 = vsub.f32 %v5526_v59, %v5621_v12  ;;  %v5844_v38 = vsub.f32 %v5822_v62, %v5838_v14 }
0x19d0   :  { %v5634_v51 = vmul.f32 1.442695, %v5629_v39  ;;  %v5850_v24 = vmul.f32 1.442695, %v5844_v38 }
0x19d1   :  { %v5841_v32 = vpop.xlane.xlu1 %5840  ;;  %v5624_v18 = vpop.xlane.xlu0 %5623 }
0x19d2   :  { %11232 = vpow2.f32 %v5634_v51  ;;  %v5845_v43 = vsub.f32 %v5827_v56, %v5841_v32  ;;  %v5630_v27 = vsub.f32 %v5608_v0, %v5624_v18 }
0x19d3   :  { %v11227_v46 = vpop.eup %11226  ;;  %11234 = vpow2.f32 %v5850_v24 }
0x19d4   :  { %v5852_v45 = vmul.f32 1.442695, %v5845_v43  ;;  %v5636_v48 = vmul.f32 1.442695, %v5630_v27  ;;  %v5640_v8 = vsel %vm948_vm5, %v11227_v46, 0.0  ;;  %v5660_v43 = vmul.f32 %v12474_v28, %v11609_v5 }
0x19d5   :  { %v5627_v30 = vpop.xlane.xlu1 %5626  ;;  %5641 = vadd.xlane.f32.xlu0 %v5640_v8 }
0x19d6   :  { %11236 = vpow2.f32 %v5852_v45  ;;  %v5631_v55 = vsub.f32 %v5613_v26, %v5627_v30 }
0x19d7   :  { %11238 = vpow2.f32 %v5636_v48 }
0x19d8   :  { %v5638_v19 = vmul.f32 1.442695, %v5631_v55 }
0x19d9   :  { %v11229_v59 = vpop.eup %11228 }
0x19da   :  { %11240 = vpow2.f32 %v5638_v19  ;;  %v5857_v61 = vsel %vm948_vm5, %v11229_v59, 0.0  ;;  %v5662_v19 = vmul.f32 %v12494_v2, %v11609_v5 }
0x19db   :  { %v11231_v58 = vpop.eup %11230  ;;  %5858 = vadd.xlane.f32.xlu1 %v5857_v61  ;;  %v6413_v61 = vmul.f32 %v12454_v23, %v11584_v41 }
0x19dc   :  { %v5854_v62 = vsel %vm948_vm5, %v11231_v58, 0.0 }
0x19dd   :  { %5855 = vadd.xlane.f32.xlu0 %v5854_v62  ;;  %v6203_v62 = vmul.f32 %v12412_v36, %v11584_v41 }
0x19df   :  { %v11233_v0 = vpop.eup %11232 }
0x19e0   :  { %v11235_v56 = vpop.eup %11234  ;;  %v5643_v11 = vsel %vm948_vm5, %v11233_v0, 0.0 }
0x19e1   :  { %v5860_v50 = vsel %vm948_vm5, %v11235_v56, 0.0  ;;  %5644 = vadd.xlane.f32.xlu0 %v5643_v11  ;;  %v6205_v11 = vmul.f32 %v12435_v49, %v11584_v41 }
0x19e2   :  { %5861 = vadd.xlane.f32.xlu1 %v5860_v50  ;;  %v6414_v50 = vmul.f32 %v12494_v2, %v11584_v41 }
0x19e3   :  { %v11237_v26 = vpop.eup %11236 }
0x19e4   :  { %v11239_v16 = vpop.eup %11238  ;;  %v5863_v17 = vsel %vm948_vm5, %v11237_v26, 0.0 }
0x19e5   :  { %v5646_v6 = vsel %vm948_vm5, %v11239_v16, 0.0 }
0x19e6   :  { %5864 = vadd.xlane.f32.xlu1 %v5863_v17  ;;  %5647 = vadd.xlane.f32.xlu0 %v5646_v6 }
0x19e7   :  { %v11241_v33 = vpop.eup %11240 }
0x19e8   :  { %v5649_v44 = vsel %vm948_vm5, %v11241_v33, 0.0 }
0x19ea   :  { %5650 = vadd.xlane.f32.xlu1 %v5649_v44 }
0x1a5e   :  { %v5642_v25 = vpop.xlane.xlu0 %5641 }
0x1a5f   :  { %11242 = vrcp.f32 %v5642_v25 }
0x1a64   :  { %v5859_v21 = vpop.xlane.xlu1 %5858 }
0x1a65   :  { %11244 = vrcp.f32 %v5859_v21 }
0x1a66   :  { %v5856_v4 = vpop.xlane.xlu0 %5855 }
0x1a67   :  { %11246 = vrcp.f32 %v5856_v4 }
0x1a6a   :  { %v5645_v31 = vpop.xlane.xlu0 %5644 }
0x1a6b   :  { %v5862_v34 = vpop.xlane.xlu1 %5861  ;;  %11248 = vrcp.f32 %v5645_v31 }
0x1a6c   :  { %11250 = vrcp.f32 %v5862_v34  ;;  %v11243_v12 = vpop.eup %11242 }
0x1a6d   :  { %v5656_v32 = vmul.f32 %v11243_v12, %v11227_v46  ;;  %v6202_v46 = vmul.f32 %v12396_v9, %v11584_v41 }
0x1a6f   :  { %v5865_v57 = vpop.xlane.xlu1 %5864  ;;  %v5648_v37 = vpop.xlane.xlu0 %5647 }
0x1a70   :  { %11252 = vrcp.f32 %v5865_v57 }
0x1a71   :  { %11254 = vrcp.f32 %v5648_v37 }
0x1a72   :  { %v11245_v14 = vpop.eup %11244 }
0x1a73   :  { %v5651_v39 = vpop.xlane.xlu1 %5650  ;;  %v5871_v24 = vmul.f32 %v11245_v14, %v11229_v59 }
0x1a74   :  { %v11247_v38 = vpop.eup %11246  ;;  %11256 = vrcp.f32 %v5651_v39 }
0x1a75   :  { %v5870_v51 = vmul.f32 %v11247_v38, %v11231_v58 }
0x1a77   :  { %10770 = vmatprep.mubr.msk.f32.mxu0 %vm948_vm5, %v5870_v51 }
0x1a78   :  { %v11249_v18 = vpop.eup %11248  ;;  %10771 = vmatmul.mubr.msk.f32.vlgmr.msra.gmra.mxu0 %vm948_vm5, %v5871_v24 }
0x1a79   :  { %v11251_v27 = vpop.eup %11250  ;;  %10781 = vmatpush3.msra.mxu0 %v12502_v7  ;;  %10784 = vmatprep.mubr.msk.f32.mxu0 %vm948_vm5, %v5656_v32  ;;  %v5657_v45 = vmul.f32 %v11249_v18, %v11233_v0  ;;  %v6412_v0 = vmul.f32 %v12474_v28, %v11584_v41 }
0x1a7a   :  { %10782 = vmatprep.subr.mxu0 %v5660_v43  ;;  %v5872_v48 = vmul.f32 %v11251_v27, %v11235_v56  ;;  %v6415_v56 = vmul.f32 %v12467_v40, %v11584_v41 }
0x1a7b   :  { %10783 = vmatpush3.msra.mxu0 %v5660_v43 }
0x1a7c   :  { %10777 = vmatprep.mubr.msk.f32.mxu1 %vm948_vm5, %v5872_v48  ;;  %10794 = vmatprep.subr.msk.mxu0 %vm75_vm0, %v12403_v53 }
0x1a7d   :  { %v11253_v8 = vpop.eup %11252  ;;  %10785 = vmatmul.mubr.msk.f32.vlgmr.msra.gmra.mxu0 %vm948_vm5, %v5657_v45 }
0x1a7e   :  { %v11255_v30 = vpop.eup %11254  ;;  %10795 = vmatpush3.xpose.msk.msra.mxu0 %vm75_vm0, %v12403_v53  ;;  %10798 = vmatprep.mubr.msk.f32.mxu0 %vm75_vm0, %v6202_v46  ;;  %v5873_v7 = vmul.f32 %v11253_v8, %v11237_v26 }
0x1a7f   :  { %10796 = vmatprep.subr.msk.mxu0 %vm75_vm0, %v12418_v60  ;;  %v5658_v55 = vmul.f32 %v11255_v30, %v11239_v16 }
0x1a80   :  { %10778 = vmatmul.mubr.msk.f32.vlgmr.msra.gmra.mxu1 %vm948_vm5, %v5873_v7 }
0x1a81   :  { %v11257_v59 = vpop.eup %11256  ;;  %10788 = vmatpush3.msra.mxu1 %v12510_v15  ;;  %10791 = vmatprep.mubr.msk.f32.mxu1 %vm948_vm5, %v5658_v55  ;;  %v6204_v15 = vmul.f32 %v12407_v63, %v11584_v41 }
0x1a82   :  { %10789 = vmatprep.subr.mxu1 %v5662_v19  ;;  %10797 = vmatpush3.xpose.msk.msra.mxu0 %vm75_vm0, %v12418_v60  ;;  %v5659_v58 = vmul.f32 %v11257_v59, %v11241_v33 }
0x1a83   :  { %10790 = vmatpush3.msra.mxu1 %v5662_v19  ;;  %10808 = vmatprep.subr.mxu0 %v6413_v61 }
0x1a84   :  { %10801 = vmatprep.subr.msk.mxu1 %vm75_vm0, %v12420_v54  ;;  %10792 = vmatmul.mubr.msk.f32.vlgmr.msra.gmra.mxu1 %vm948_vm5, %v5659_v58 }
0x1a85   :  { %10799 = vmatmul.mubr.msk.f32.vlgmr.msra.gmra.mxu0 %vm75_vm0, %v6203_v62  ;;  %10802 = vmatpush3.xpose.msk.msra.mxu1 %vm75_vm0, %v12420_v54 }
0x1a86   :  { %10803 = vmatprep.subr.msk.mxu1 %vm75_vm0, %v12439_v52  ;;  %10805 = vmatprep.mubr.msk.f32.mxu1 %vm75_vm0, %v6204_v15 }
0x1a87   :  { %10809 = vmatpush3.msra.mxu0 %v6413_v61 }
0x1a88   :  { %10810 = vmatprep.subr.mxu0 %v6412_v0 }
0x1a89   :  { %10811 = vmatpush3.msra.mxu0 %v6412_v0  ;;  %10804 = vmatpush3.xpose.msk.msra.mxu1 %vm75_vm0, %v12439_v52 }
0x1a8a   :  { %10822 = vmatprep.subr.msk.mxu0 %vm75_vm0, %v12403_v53  ;;  %10815 = vmatprep.subr.mxu1 %v6415_v56 }
0x1a8c   :  { %10806 = vmatmul.mubr.msk.f32.vlgmr.msra.gmra.mxu1 %vm75_vm0, %v6205_v11 }
0x1a8d   :  { %10816 = vmatpush3.msra.mxu1 %v6415_v56 }
0x1a8e   :  { %10817 = vmatprep.subr.mxu1 %v6414_v50 }
0x1a8f   :  { %10818 = vmatpush3.msra.mxu1 %v6414_v50 }
0x1a90   :  { %10829 = vmatprep.subr.msk.mxu1 %vm75_vm0, %v12420_v54 }
0x1b38   :  { %v10772_v26 = vpop.f32.mrf.mxu0 }
0x1b3a   :  { %v5950_v16 = vpop.f32.mrf.mxu0 }
0x1b3d   :  { %v10786_v17 = vpop.f32.mrf.mxu0 }
0x1b3e   :  { %v12611_v6 = vadd.f32 %v10786_v17, %v10772_v26 }
0x1b3f   :  { %v6112_v33 = vpop.f32.mrf.mxu0 }
0x1b40   :  { %v12613_v44 = vadd.f32 %v6112_v33, %v5950_v16  ;;  %v10779_v25 = vpop.f32.mrf.mxu1 }
0x1b42   :  { %v6031_v21 = vpop.f32.mrf.mxu1 }
0x1b44   :  { %v10793_v4 = vpop.f32.mrf.mxu1 }
0x1b45   :  { %v12615_v31 = vadd.f32 %v10793_v4, %v10779_v25  ;;  %v10800_v34 = vpop.f32.mrf.mxu0 }
0x1b46   :  { %v6284_v57 = vadd.f32 %v12523_v47, %v10800_v34  ;;  %v6193_v37 = vpop.f32.mrf.mxu1 }
0x1b47   :  { %v12618_v12 = vadd.f32 %v6193_v37, %v6031_v21  ;;  %v6278_v14 = vpop.f32.mrf.mxu0 }
0x1b48   :  { %v6279_v39 = vadd.f32 %v12516_v22, %v6278_v14  ;;  %v6371_v38 = vsel %vm948_vm5, %v6284_v57, -inf }
0x1b49   :  { %6372 = vmax.xlane.f32.xlu1 %v6371_v38  ;;  %v6582_v38 = vmul.f32 %v12396_v9, %v11587_v42 }
0x1b4a   :  { %v6368_v51 = vsel %vm948_vm5, %v6279_v39, -inf }
0x1b4b   :  { %6369 = vmax.xlane.f32.xlu0 %v6368_v51 }
0x1b4c   :  { %v10807_v24 = vpop.f32.mrf.mxu1 }
0x1b4d   :  { %v6365_v32 = vadd.f32 %v12540_v1, %v10807_v24 }
0x1b4e   :  { %v6359_v18 = vpop.f32.mrf.mxu1 }
0x1b4f   :  { %v6360_v43 = vadd.f32 %v12533_v10, %v6359_v18  ;;  %v6377_v27 = vsel %vm948_vm5, %v6365_v32, -inf }
0x1b50   :  { %6378 = vmax.xlane.f32.xlu1 %v6377_v27 }
0x1b51   :  { %v6374_v45 = vsel %vm948_vm5, %v6360_v43, -inf }
0x1b52   :  { %6375 = vmax.xlane.f32.xlu0 %v6374_v45 }
0x1bd2   :  { %v6373_v48 = vpop.xlane.xlu1 %6372 }
0x1bd3   :  { %v6381_v46 = vsub.f32 %v6284_v57, %v6373_v48 }
0x1bd4   :  { %v6370_v8 = vpop.xlane.xlu0 %6369 }
0x1bd5   :  { %v6386_v30 = vmul.f32 1.442695, %v6381_v46  ;;  %v6380_v7 = vsub.f32 %v6279_v39, %v6370_v8 }
0x1bd7   :  { %11258 = vpow2.f32 %v6386_v30  ;;  %v6384_v55 = vmul.f32 1.442695, %v6380_v7 }
0x1bd9   :  { %11260 = vpow2.f32 %v6384_v55  ;;  %v6379_v19 = vpop.xlane.xlu1 %6378 }
0x1bda   :  { %v6383_v59 = vsub.f32 %v6365_v32, %v6379_v19  ;;  %v6793_v32 = vmul.f32 %v12454_v23, %v11587_v42 }
0x1bdb   :  { %v6376_v61 = vpop.xlane.xlu0 %6375 }
0x1bdc   :  { %v6390_v58 = vmul.f32 1.442695, %v6383_v59  ;;  %v6382_v62 = vsub.f32 %v6360_v43, %v6376_v61  ;;  %v6583_v43 = vmul.f32 %v12412_v36, %v11587_v42  ;;  %v6792_v36 = vmul.f32 %v12474_v28, %v11587_v42 }
0x1bde   :  { %11262 = vpow2.f32 %v6390_v58  ;;  %v6388_v15 = vmul.f32 1.442695, %v6382_v62 }
0x1be0   :  { %11264 = vpow2.f32 %v6388_v15 }
0x1be4   :  { %v11259_v0 = vpop.eup %11258 }
0x1be5   :  { %v6395_v56 = vsel %vm948_vm5, %v11259_v0, 0.0 }
0x1be6   :  { %v11261_v11 = vpop.eup %11260  ;;  %6396 = vadd.xlane.f32.xlu1 %v6395_v56 }
0x1be7   :  { %v6392_v50 = vsel %vm948_vm5, %v11261_v11, 0.0 }
0x1be8   :  { %6393 = vadd.xlane.f32.xlu0 %v6392_v50 }
0x1beb   :  { %v11263_v26 = vpop.eup %11262 }
0x1bec   :  { %v6401_v16 = vsel %vm948_vm5, %v11263_v26, 0.0 }
0x1bed   :  { %v11265_v17 = vpop.eup %11264  ;;  %6402 = vadd.xlane.f32.xlu1 %v6401_v16 }
0x1bee   :  { %v6398_v33 = vsel %vm948_vm5, %v11265_v17, 0.0 }
0x1bef   :  { %6399 = vadd.xlane.f32.xlu0 %v6398_v33 }
0x1c6f   :  { %v6397_v25 = vpop.xlane.xlu1 %6396 }
0x1c70   :  { %11266 = vrcp.f32 %v6397_v25 }
0x1c71   :  { %v6394_v21 = vpop.xlane.xlu0 %6393 }
0x1c72   :  { %11268 = vrcp.f32 %v6394_v21 }
0x1c76   :  { %v6403_v4 = vpop.xlane.xlu1 %6402 }
0x1c77   :  { %11270 = vrcp.f32 %v6403_v4 }
0x1c78   :  { %v6400_v34 = vpop.xlane.xlu0 %6399 }
0x1c79   :  { %11272 = vrcp.f32 %v6400_v34 }
0x1c7d   :  { %v11267_v57 = vpop.eup %11266 }
0x1c7e   :  { %v6409_v39 = vmul.f32 %v11267_v57, %v11259_v0  ;;  %v6965_v57 = vld [vmem:[#allocation2 + $0x4a8] sm:$0xff] }
0x1c7f   :  { %v11269_v37 = vpop.eup %11268 }
0x1c80   :  { %v6408_v14 = vmul.f32 %v11269_v37, %v11261_v11 }
0x1c82   :  { %10812 = vmatprep.mubr.msk.f32.mxu0 %vm948_vm5, %v6408_v14 }
0x1c83   :  { %10813 = vmatmul.mubr.msk.f32.vlgmr.msra.gmra.mxu0 %vm948_vm5, %v6409_v39 }
0x1c84   :  { %10823 = vmatpush3.xpose.msk.msra.mxu0 %vm75_vm0, %v12403_v53  ;;  %10826 = vmatprep.mubr.msk.f32.mxu0 %vm75_vm0, %v6582_v38  ;;  %v11271_v51 = vpop.eup %11270  ;;  %v6584_v53 = vmul.f32 %v12407_v63, %v11587_v42  ;;  %v6585_v63 = vmul.f32 %v12435_v49, %v11587_v42 }
0x1c85   :  { %10824 = vmatprep.subr.msk.mxu0 %vm75_vm0, %v12418_v60  ;;  %v6411_v9 = vmul.f32 %v11271_v51, %v11263_v26 }
0x1c86   :  { %v11273_v24 = vpop.eup %11272 }
0x1c87   :  { %v6410_v18 = vmul.f32 %v11273_v24, %v11265_v17 }
0x1c88   :  { %10825 = vmatpush3.xpose.msk.msra.mxu0 %vm75_vm0, %v12418_v60  ;;  %v6795_v60 = vmul.f32 %v12467_v40, %v11587_v42 }
0x1c89   :  { %10836 = vmatprep.subr.mxu0 %v6793_v32  ;;  %10819 = vmatprep.mubr.msk.f32.mxu1 %vm948_vm5, %v6410_v18 }
0x1c8a   :  { %10820 = vmatmul.mubr.msk.f32.vlgmr.msra.gmra.mxu1 %vm948_vm5, %v6411_v9 }
0x1c8b   :  { %10827 = vmatmul.mubr.msk.f32.vlgmr.msra.gmra.mxu0 %vm75_vm0, %v6583_v43  ;;  %10830 = vmatpush3.xpose.msk.msra.mxu1 %vm75_vm0, %v12420_v54  ;;  %v6794_v54 = vmul.f32 %v12494_v2, %v11587_v42 }
0x1c8c   :  { %10831 = vmatprep.subr.msk.mxu1 %vm75_vm0, %v12439_v52  ;;  %10833 = vmatprep.mubr.msk.f32.mxu1 %vm75_vm0, %v6584_v53 }
0x1c8d   :  { %10837 = vmatpush3.msra.mxu0 %v6793_v32 }
0x1c8e   :  { %10838 = vmatprep.subr.mxu0 %v6792_v36 }
0x1c8f   :  { %10839 = vmatpush3.msra.mxu0 %v6792_v36  ;;  %10832 = vmatpush3.xpose.msk.msra.mxu1 %vm75_vm0, %v12439_v52 }
0x1c90   :  { %10843 = vmatprep.subr.mxu1 %v6795_v60  ;;  %10850 = vmatprep.subr.mxu0 %v6965_v57 }
0x1c92   :  { %10834 = vmatmul.mubr.msk.f32.vlgmr.msra.gmra.mxu1 %vm75_vm0, %v6585_v63  ;;  %v6963_v63 = vld [vmem:[#allocation2 + $0x3d8] sm:$0xff] }
0x1c93   :  { %10844 = vmatpush3.msra.mxu1 %v6795_v60  ;;  %v6964_v60 = vld [vmem:[#allocation2 + $0x440] sm:$0xff] }
0x1c94   :  { %10845 = vmatprep.subr.mxu1 %v6794_v54 }
0x1c95   :  { %10846 = vmatpush3.msra.mxu1 %v6794_v54  ;;  %v6962_v54 = vld [vmem:[#allocation2 + $0x370] sm:$0xff] }
0x1d43   :  { %v10814_v23 = vpop.f32.mrf.mxu0 }
0x1d44   :  { %v12668_v28 = vadd.f32 %v10814_v23, %v12611_v6 }
0x1d45   :  { %v6488_v40 = vpop.f32.mrf.mxu0 }
0x1d46   :  { %v12671_v27 = vadd.f32 %v6488_v40, %v12613_v44 }
0x1d4a   :  { %v10821_v52 = vpop.f32.mrf.mxu1 }
0x1d4b   :  { %v12674_v49 = vadd.f32 %v10821_v52, %v12615_v31  ;;  %v10828_v45 = vpop.f32.mrf.mxu0 }
0x1d4c   :  { %v6664_v48 = vadd.f32 %v12523_v47, %v10828_v45  ;;  %v6569_v46 = vpop.f32.mrf.mxu1 }
0x1d4d   :  { %v12678_v2 = vadd.f32 %v6569_v46, %v12618_v12  ;;  %v6658_v8 = vpop.f32.mrf.mxu0 }
0x1d4e   :  { %v6659_v30 = vadd.f32 %v12516_v22, %v6658_v8  ;;  %v6751_v6 = vsel %vm948_vm5, %v6664_v48, -inf }
0x1d4f   :  { %6752 = vmax.xlane.f32.xlu1 %v6751_v6 }
0x1d50   :  { %v6748_v44 = vsel %vm948_vm5, %v6659_v30, -inf }
0x1d51   :  { %6749 = vmax.xlane.f32.xlu0 %v6748_v44 }
0x1d52   :  { %v10835_v7 = vpop.f32.mrf.mxu1 }
0x1d53   :  { %v6745_v31 = vadd.f32 %v12540_v1, %v10835_v7 }
0x1d54   :  { %v6739_v55 = vpop.f32.mrf.mxu1 }
0x1d55   :  { %v6740_v19 = vadd.f32 %v12533_v10, %v6739_v55  ;;  %v6757_v47 = vsel %vm948_vm5, %v6745_v31, -inf }
0x1d56   :  { %6758 = vmax.xlane.f32.xlu1 %v6757_v47 }
0x1d57   :  { %v6754_v12 = vsel %vm948_vm5, %v6740_v19, -inf }
0x1d58   :  { %6755 = vmax.xlane.f32.xlu0 %v6754_v12 }
0x1dd8   :  { %v6753_v59 = vpop.xlane.xlu1 %6752 }
0x1dd9   :  { %v6761_v22 = vsub.f32 %v6664_v48, %v6753_v59 }
0x1dda   :  { %v6750_v61 = vpop.xlane.xlu0 %6749 }
0x1ddb   :  { %v6766_v58 = vmul.f32 1.442695, %v6761_v22  ;;  %v6760_v62 = vsub.f32 %v6659_v30, %v6750_v61 }
0x1ddd   :  { %11274 = vpow2.f32 %v6766_v58  ;;  %v6764_v15 = vmul.f32 1.442695, %v6760_v62 }
0x1ddf   :  { %11276 = vpow2.f32 %v6764_v15  ;;  %v6759_v0 = vpop.xlane.xlu1 %6758 }
0x1de0   :  { %v6763_v56 = vsub.f32 %v6745_v31, %v6759_v0 }
0x1de1   :  { %v6756_v1 = vpop.xlane.xlu0 %6755 }
0x1de2   :  { %v6770_v11 = vmul.f32 1.442695, %v6763_v56  ;;  %v6762_v50 = vsub.f32 %v6740_v19, %v6756_v1 }
0x1de4   :  { %11278 = vpow2.f32 %v6770_v11  ;;  %v6768_v10 = vmul.f32 1.442695, %v6762_v50 }
0x1de6   :  { %11280 = vpow2.f32 %v6768_v10 }
0x1dea   :  { %v11275_v26 = vpop.eup %11274 }
0x1deb   :  { %v6775_v16 = vsel %vm948_vm5, %v11275_v26, 0.0 }
0x1dec   :  { %v11277_v17 = vpop.eup %11276  ;;  %6776 = vadd.xlane.f32.xlu1 %v6775_v16 }
0x1ded   :  { %v6772_v33 = vsel %vm948_vm5, %v11277_v17, 0.0 }
0x1dee   :  { %6773 = vadd.xlane.f32.xlu0 %v6772_v33 }
0x1df1   :  { %v11279_v25 = vpop.eup %11278 }
0x1df2   :  { %v6781_v21 = vsel %vm948_vm5, %v11279_v25, 0.0 }
0x1df3   :  { %v11281_v4 = vpop.eup %11280  ;;  %6782 = vadd.xlane.f32.xlu1 %v6781_v21 }
0x1df4   :  { %v6778_v34 = vsel %vm948_vm5, %v11281_v4, 0.0 }
0x1df5   :  { %6779 = vadd.xlane.f32.xlu0 %v6778_v34 }
0x1e75   :  { %v6777_v37 = vpop.xlane.xlu1 %6776 }
0x1e76   :  { %11282 = vrcp.f32 %v6777_v37 }
0x1e77   :  { %v6774_v14 = vpop.xlane.xlu0 %6773 }
0x1e78   :  { %11284 = vrcp.f32 %v6774_v14  ;;  %v7178_v14 = vld [vmem:[#allocation2 + $0x4b0] sm:$0xff] }
0x1e79   :  { %10864 = vmatprep.subr.mxu1 %v7178_v14 }
0x1e7c   :  { %v6783_v39 = vpop.xlane.xlu1 %6782 }
0x1e7d   :  { %11286 = vrcp.f32 %v6783_v39  ;;  %v7284_v39 = vld [vmem:[#allocation2 + $0x4b8] sm:$0xff] }
0x1e7e   :  { %v6780_v38 = vpop.xlane.xlu0 %6779 }
0x1e7f   :  { %11288 = vrcp.f32 %v6780_v38  ;;  %v7177_v38 = vld [vmem:[#allocation2 + $0x448] sm:$0xff] }
0x1e83   :  { %v11283_v51 = vpop.eup %11282 }
0x1e84   :  { %v6789_v18 = vmul.f32 %v11283_v51, %v11275_v26  ;;  %v7283_v51 = vld [vmem:[#allocation2 + $0x450] sm:$0xff] }
0x1e85   :  { %v11285_v24 = vpop.eup %11284 }
0x1e86   :  { %v6788_v32 = vmul.f32 %v11285_v24, %v11277_v17  ;;  %v7176_v24 = vld [vmem:[#allocation2 + $0x3e0] sm:$0xff] }
0x1e88   :  { %10840 = vmatprep.mubr.msk.f32.mxu0 %vm948_vm5, %v6788_v32  ;;  %v7282_v32 = vld [vmem:[#allocation2 + $0x3e8] sm:$0xff] }
0x1e89   :  { %10841 = vmatmul.mubr.msk.f32.vlgmr.msra.gmra.mxu0 %vm948_vm5, %v6789_v18  ;;  %v7175_v18 = vld [vmem:[#allocation2 + $0x378] sm:$0xff] }
0x1e8a   :  { %10851 = vmatpush3.msra.mxu0 %v6965_v57  ;;  %v11287_v9 = vpop.eup %11286 }
0x1e8b   :  { %v6791_v36 = vmul.f32 %v11287_v9, %v11279_v25  ;;  %10852 = vmatprep.subr.mxu0 %v6964_v60  ;;  %v7281_v9 = vld [vmem:[#allocation2 + $0x380] sm:$0xff] }
0x1e8c   :  { %v11289_v43 = vpop.eup %11288  ;;  %10853 = vmatpush3.msra.mxu0 %v6964_v60 }
0x1e8d   :  { %v6790_v53 = vmul.f32 %v11289_v43, %v11281_v4  ;;  %10854 = vmatprep.subr.mxu0 %v6963_v63  ;;  %v12760_v43 = vld [vmem:[%s13117_s1 + $0x8] sm:$0xff] }
0x1e8e   :  { %10855 = vmatpush3.msra.mxu0 %v6963_v63 }
0x1e8f   :  { %10847 = vmatprep.mubr.msk.f32.mxu1 %vm948_vm5, %v6790_v53  ;;  %10856 = vmatprep.subr.mxu0 %v6962_v54  ;;  %v12764_v53 = vld [vmem:[#allocation2 + $0x4c0] sm:$0xff] }
0x1e90   :  { %10848 = vmatmul.mubr.msk.f32.vlgmr.msra.gmra.mxu1 %vm948_vm5, %v6791_v36  ;;  %10857 = vmatpush3.msra.mxu0 %v6962_v54 }
0x1e91   :  { %10878 = vmatprep.subr.mxu0 %v7284_v39  ;;  %10865 = vmatpush3.msra.mxu1 %v7178_v14 }
0x1e92   :  { %10866 = vmatprep.subr.mxu1 %v7177_v38 }
0x1e93   :  { %10867 = vmatpush3.msra.mxu1 %v7177_v38 }
0x1e94   :  { %10868 = vmatprep.subr.mxu1 %v7176_v24 }
0x1e95   :  { %10869 = vmatpush3.msra.mxu1 %v7176_v24 }
0x1e96   :  { %10870 = vmatprep.subr.mxu1 %v7175_v18 }
0x1e97   :  { %10871 = vmatpush3.msra.mxu1 %v7175_v18 }
0x1e98   :  { %10889 = vmatprep.subr.mxu1 %v12764_v53 }
0x1f49   :  { %v10842_v23 = vpop.f32.mrf.mxu0 }
0x1f4a   :  { %v6959_v45 = vadd.f32 %v10842_v23, %v12668_v28  ;;  %v9759_v28 = vld [vmem:[%s13120_s4 + $0x16] ss:$0 sm:$0xff] }
0x1f4b   :  { %v6868_v40 = vpop.f32.mrf.mxu0 }
0x1f4c   :  { %v6958_v52 = vadd.f32 %v6868_v40, %v12671_v27  ;;  %v12706_v27 = vld [vmem:[%s13117_s1] sm:$0xff] }
0x1f4e   :  { %10858 = vmatprep.mubr.msk.f32.mxu0 %vm75_vm0, %v6958_v52 }
0x1f4f   :  { %10859 = vmatmul.mubr.msk.f32.vlgmr.msra.gmra.mxu0 %vm75_vm0, %v6959_v45 }
0x1f50   :  { %v10849_v48 = vpop.f32.mrf.mxu1  ;;  %10879 = vmatpush3.msra.mxu0 %v7284_v39 }
0x1f51   :  { %v6961_v30 = vadd.f32 %v10849_v48, %v12674_v49  ;;  %10880 = vmatprep.subr.mxu0 %v7283_v51 }
0x1f52   :  { %v6949_v46 = vpop.f32.mrf.mxu1  ;;  %10881 = vmatpush3.msra.mxu0 %v7283_v51 }
0x1f53   :  { %v6960_v8 = vadd.f32 %v6949_v46, %v12678_v2  ;;  %10882 = vmatprep.subr.mxu0 %v7282_v32 }
0x1f54   :  { %10883 = vmatpush3.msra.mxu0 %v7282_v32 }
0x1f55   :  { %10861 = vmatprep.mubr.msk.f32.mxu0 %vm75_vm0, %v6960_v8  ;;  %10884 = vmatprep.subr.mxu0 %v7281_v9 }
0x1f56   :  { %10862 = vmatmul.mubr.msk.f32.gmra.mxu0 %vm75_vm0, %v6961_v30 }
0x1f57   :  { %10886 = vmatprep.mubr.msk.f32.mxu0 %vm75_vm0, %v12706_v27  ;;  %10885 = vmatpush3.msra.mxu0 %v7281_v9  ;;  %v7367_v9 = vld [vmem:[#allocation2 + $0x458] sm:$0xff] }
0x1f5a   :  { %10887 = vmatmul.mubr.msk.f32.vlgmr.msra.gmra.mxu0 %vm75_vm0, %v12760_v43 }
0x200f   :  { %v10860_v6 = vpop.f32.mrf.mxu0 }
0x2010   :  { %v7055_v2 = vadd.f32 %v10860_v6, %v9759_v28 }
0x2011   :  { %v7049_v44 = vpop.f32.mrf.mxu0 }
0x2012   :  { %v12714_v49 = vadd.f32 %v7055_v2, %v12284_v35  ;;  %v7050_v7 = vadd.f32 %v9759_v28, %v7049_v44 }
0x2014   :  { %v12717_v31 = vadd.f32 %v7050_v7, %v12287_v3  ;;  %v7078_v55 = vsel %vm75_vm0, %v12714_v49, 0.0 }
0x2015   :  { %7079 = vadd.xlane.f32.xlu1 %v7078_v55 }
0x2016   :  { %v10863_v19 = vpop.f32.mrf.mxu0  ;;  %v7075_v47 = vsel %vm75_vm0, %v12717_v31, 0.0 }
0x2017   :  { %v7065_v12 = vadd.f32 %v10863_v19, %v9759_v28  ;;  %7076 = vadd.xlane.f32.xlu0 %v7075_v47 }
0x2018   :  { %v7059_v59 = vpop.f32.mrf.mxu0 }
0x2019   :  { %v12724_v22 = vadd.f32 %v7065_v12, %v12294_v20  ;;  %v7060_v35 = vadd.f32 %v9759_v28, %v7059_v59 }
0x201b   :  { %v12727_v61 = vadd.f32 %v7060_v35, %v12297_v13  ;;  %v7084_v3 = vsel %vm75_vm0, %v12724_v22, 0.0 }
0x201c   :  { %7085 = vadd.xlane.f32.xlu1 %v7084_v3 }
0x201d   :  { %v7081_v58 = vsel %vm75_vm0, %v12727_v61, 0.0 }
0x201e   :  { %7082 = vadd.xlane.f32.xlu0 %v7081_v58 }
0x209e   :  { %v7080_v62 = vpop.xlane.xlu1 %7079 }
0x209f   :  { %v7088_v15 = vmul.f32 0.03125, %v7080_v62 }
0x20a0   :  { %v7077_v0 = vpop.xlane.xlu0 %7076 }
0x20a1   :  { %v12734_v56 = vsub.f32 %v12714_v49, %v7088_v15  ;;  %v7087_v20 = vmul.f32 0.03125, %v7077_v0 }
0x20a3   :  { %v12737_v1 = vsub.f32 %v12717_v31, %v7087_v20  ;;  %v7096_v13 = vmul.f32 %v12734_v56, %v12734_v56 }
0x20a5   :  { %v7086_v11 = vpop.xlane.xlu1 %7085  ;;  %v7102_v50 = vsel %vm75_vm0, %v7096_v13, 0.0  ;;  %v7095_v10 = vmul.f32 %v12737_v1, %v12737_v1 }
0x20a6   :  { %v7090_v26 = vmul.f32 0.03125, %v7086_v11  ;;  %7103 = vadd.xlane.f32.xlu1 %v7102_v50 }
0x20a7   :  { %v7083_v16 = vpop.xlane.xlu0 %7082  ;;  %v7099_v17 = vsel %vm75_vm0, %v7095_v10, 0.0  ;;  %v9766_v10 = vld [vmem:[%s13121_s5 + $0x8] ss:$0 sm:$0xff] }
0x20a8   :  { %v12746_v33 = vsub.f32 %v12724_v22, %v7090_v26  ;;  %v7089_v25 = vmul.f32 0.03125, %v7083_v16  ;;  %7100 = vadd.xlane.f32.xlu0 %v7099_v17  ;;  %v7160_v16 = vmul.f32 %v9766_v10, %v12734_v56  ;;  %v7159_v17 = vmul.f32 %v9766_v10, %v12737_v1 }
0x20aa   :  { %v12749_v21 = vsub.f32 %v12727_v61, %v7089_v25  ;;  %v7098_v4 = vmul.f32 %v12746_v33, %v12746_v33  ;;  %v7162_v38 = vmul.f32 %v9766_v10, %v12746_v33  ;;  %v10888_v33 = vpop.f32.mrf.mxu0 }
0x20ac   :  { %v7108_v34 = vsel %vm75_vm0, %v7098_v4, 0.0  ;;  %v7097_v57 = vmul.f32 %v12749_v21, %v12749_v21  ;;  %v7161_v51 = vmul.f32 %v9766_v10, %v12749_v21  ;;  %v9775_v21 = vld [vmem:[%s13120_s4 + $0x18] ss:$0 sm:$0xff] }
0x20ad   :  { %7109 = vadd.xlane.f32.xlu1 %v7108_v34  ;;  %v9767_v34 = vld [vmem:[%s13121_s5 + $0x9] ss:$0 sm:$0xff] }
0x20ae   :  { %v7105_v37 = vsel %vm75_vm0, %v7097_v57, 0.0 }
0x20af   :  { %7106 = vadd.xlane.f32.xlu0 %v7105_v37 }
0x212f   :  { %v7104_v36 = vpop.xlane.xlu1 %7103 }
0x2130   :  { %v7112_v60 = vmul.f32 0.032258064, %v7104_v36  ;;  %v7356_v36 = vpop.f32.mrf.mxu0 }
0x2131   :  { %v7101_v63 = vpop.xlane.xlu0 %7100 }
0x2132   :  { %11290 = vrsqrt.f32 %v7112_v60  ;;  %v7111_v54 = vmul.f32 0.032258064, %v7101_v63  ;;  %vm7124_vm15 = vcmp.eq.f32.partialorder %v7112_v60, inf  ;;  %v7127_v8 = vand.u32 2147483648, %v7112_v60 }
0x2133   :  { %vm7126_vm5 = vcmp.eq.f32.partialorder %v7112_v60, 0.0  ;;  %v12789_v63 = vadd.f32 %v10888_v33, %v9775_v21 }
0x2134   :  { %11292 = vrsqrt.f32 %v7111_v54  ;;  %vm7117_vm7 = vcmp.eq.f32.partialorder %v7111_v54, inf  ;;  %v7120_v7 = vand.u32 2147483648, %v7111_v54  ;;  %vm7119_vm8 = vcmp.eq.f32.partialorder %v7111_v54, 0.0 }
0x2136   :  { %v7110_v23 = vpop.xlane.xlu1 %7109 }
0x2137   :  { %v7114_v40 = vmul.f32 0.032258064, %v7110_v23 }
0x2138   :  { %v7107_v52 = vpop.xlane.xlu0 %7106 }
0x2139   :  { %11294 = vrsqrt.f32 %v7114_v40  ;;  %v7113_v45 = vmul.f32 0.032258064, %v7107_v52  ;;  %vm7138_vm9 = vcmp.eq.f32.partialorder %v7114_v40, inf  ;;  %v7141_v35 = vand.u32 2147483648, %v7114_v40 }
0x213a   :  { %vm7140_vm11 = vcmp.eq.f32.partialorder %v7114_v40, 0.0 }
0x213b   :  { %11296 = vrsqrt.f32 %v7113_v45  ;;  %vm7131_vm12 = vcmp.eq.f32.partialorder %v7113_v45, inf  ;;  %v7134_v20 = vand.u32 2147483648, %v7113_v45  ;;  %vm7133_vm13 = vcmp.eq.f32.partialorder %v7113_v45, 0.0 }
0x213f   :  { %v11291_v48 = vpop.eup %11290 }
0x2140   :  { %v7123_v46 = vmul.f32 %v11291_v48, %v7112_v60 }
0x2141   :  { %v11293_v30 = vpop.eup %11292 }
0x2142   :  { %v7125_v28 = vsel %vm7124_vm15, %v7112_v60, %v7123_v46  ;;  %v7116_v2 = vmul.f32 %v11293_v30, %v7111_v54  ;;  %v12787_v60 = vadd.f32 %v9775_v21, %v7356_v36 }
0x2143   :  { %v7128_v6 = vsel %vm7126_vm5, %v7127_v8, %v7125_v28 }
0x2144   :  { %v7144_v44 = vadd.f32 1e-06, %v7128_v6  ;;  %v7118_v55 = vsel %vm7117_vm7, %v7111_v54, %v7116_v2  ;;  %v7365_v54 = vld [vmem:[#allocation2 + $0x388] sm:$0xff]  ;;  %10900 = vmatprep.subr.msk.mxu0 %vm75_vm0, %v12787_v60 }
0x2145   :  { %v7121_v47 = vsel %vm7119_vm8, %v7120_v7, %v7118_v55  ;;  %10901 = vmatpush3.xpose.msk.msra.mxu0 %vm75_vm0, %v12787_v60 }
0x2146   :  { %v11295_v19 = vpop.eup %11294  ;;  %11298 = vrcp.f32 %v7144_v44  ;;  %v7143_v12 = vadd.f32 1e-06, %v7121_v47  ;;  %10910 = vmatprep.subr.msk.mxu0 %vm75_vm0, %v12787_v60 }
0x2147   :  { %v7137_v59 = vmul.f32 %v11295_v19, %v7114_v40 }
0x2148   :  { %v11297_v3 = vpop.eup %11296  ;;  %11300 = vrcp.f32 %v7143_v12 }
0x2149   :  { %v7139_v58 = vsel %vm7138_vm9, %v7114_v40, %v7137_v59  ;;  %v7130_v15 = vmul.f32 %v11297_v3, %v7113_v45 }
0x214a   :  { %v7142_v62 = vsel %vm7140_vm11, %v7141_v35, %v7139_v58  ;;  %v9779_v58 = vld [vmem:[%s13120_s4 + $0x19] ss:$0 sm:$0xff] }
0x214b   :  { %v7146_v0 = vadd.f32 1e-06, %v7142_v62  ;;  %v7132_v13 = vsel %vm7131_vm12, %v7113_v45, %v7130_v15 }
0x214c   :  { %v7135_v11 = vsel %vm7133_vm13, %v7134_v20, %v7132_v13 }
0x214d   :  { %11302 = vrcp.f32 %v7146_v0  ;;  %v7145_v50 = vadd.f32 1e-06, %v7135_v11 }
0x214f   :  { %11304 = vrcp.f32 %v7145_v50 }
0x2153   :  { %v11299_v26 = vpop.eup %11298 }
0x2154   :  { %v7164_v4 = vmul.f32 %v11299_v26, %v7160_v16 }
0x2155   :  { %v11301_v25 = vpop.eup %11300 }
0x2156   :  { %v7163_v57 = vmul.f32 %v11301_v25, %v7159_v17  ;;  %v7172_v39 = vadd.f32 %v9767_v34, %v7164_v4 }
0x2158   :  { %v7171_v37 = vadd.f32 %v9767_v34, %v7163_v57 }
0x215a   :  { %v11303_v14 = vpop.eup %11302  ;;  %10872 = vmatprep.mubr.msk.f32.mxu1 %vm75_vm0, %v7171_v37 }
0x215b   :  { %10873 = vmatmul.mubr.msk.f32.vlgmr.msra.gmra.mxu1 %vm75_vm0, %v7172_v39  ;;  %v7166_v1 = vmul.f32 %v11303_v14, %v7162_v38 }
0x215c   :  { %v11305_v56 = vpop.eup %11304  ;;  %10890 = vmatpush3.msra.mxu1 %v12764_v53  ;;  %v7366_v53 = vld [vmem:[#allocation2 + $0x3f0] sm:$0xff] }
0x215d   :  { %v7165_v24 = vmul.f32 %v11305_v56, %v7161_v51  ;;  %v7174_v18 = vadd.f32 %v9767_v34, %v7166_v1  ;;  %10891 = vmatprep.subr.mxu1 %v7367_v9 }
0x215e   :  { %10892 = vmatpush3.msra.mxu1 %v7367_v9 }
0x215f   :  { %v7173_v32 = vadd.f32 %v9767_v34, %v7165_v24  ;;  %10893 = vmatprep.subr.mxu1 %v7366_v53 }
0x2160   :  { %10894 = vmatpush3.msra.mxu1 %v7366_v53 }
0x2161   :  { %10875 = vmatprep.mubr.msk.f32.mxu1 %vm75_vm0, %v7173_v32  ;;  %10895 = vmatprep.subr.mxu1 %v7365_v54 }
0x2162   :  { %10876 = vmatmul.mubr.msk.f32.gmra.mxu1 %vm75_vm0, %v7174_v18 }
0x2163   :  { %10897 = vmatprep.mubr.msk.f32.mxu1 %vm75_vm0, %v12706_v27  ;;  %10896 = vmatpush3.msra.mxu1 %v7365_v54  ;;  %v9769_v27 = vld [vmem:[%s13120_s4 + $0x17] ss:$0 sm:$0xff] }
0x2164   :  { %10905 = vmatprep.subr.msk.mxu1 %vm75_vm0, %v12789_v63 }
0x2166   :  { %10898 = vmatmul.mubr.msk.f32.vlgmr.msra.gmra.mxu1 %vm75_vm0, %v12760_v43 }
0x2167   :  { %10906 = vmatpush3.xpose.msk.msra.mxu1 %vm75_vm0, %v12789_v63 }
0x2168   :  { %10915 = vmatprep.subr.msk.mxu1 %vm75_vm0, %v12789_v63 }
0x221b   :  { %v10874_v23 = vpop.f32.mrf.mxu1 }
0x221c   :  { %v7268_v40 = vadd.f32 %v10874_v23, %v9769_v27 }
0x221d   :  { %v7262_v52 = vpop.f32.mrf.mxu1 }
0x221e   :  { %v7263_v45 = vadd.f32 %v9769_v27, %v7262_v52  ;;  %v12808_v48 = vmul.f32 0.35355338, %v7268_v40 }
0x2220   :  { %v12810_v43 = vmul.f32 0.35355338, %v7263_v45  ;;  %v7454_v28 = vmul.f32 %v12808_v48, %v11609_v5  ;;  %v7672_v55 = vmul.f32 %v12808_v48, %v11657_v29 }
0x2222   :  { %v10877_v46 = vpop.f32.mrf.mxu1  ;;  %v7453_v30 = vmul.f32 %v12810_v43, %v11609_v5  ;;  %v7671_v44 = vmul.f32 %v12810_v43, %v11657_v29 }
0x2223   :  { %v7278_v8 = vadd.f32 %v10877_v46, %v9769_v27 }
0x2224   :  { %v7272_v6 = vpop.f32.mrf.mxu1  ;;  %10902 = vmatprep.mubr.msk.f32.mxu0 %vm75_vm0, %v7453_v30 }
0x2225   :  { %v7273_v2 = vadd.f32 %v9769_v27, %v7272_v6  ;;  %10903 = vmatmul.mubr.msk.f32.vlgmr.msra.gmra.mxu0 %vm75_vm0, %v7454_v28  ;;  %v12820_v7 = vmul.f32 0.35355338, %v7278_v8 }
0x2226   :  { %10911 = vmatpush3.xpose.msk.msra.mxu0 %vm75_vm0, %v12787_v60  ;;  %10912 = vmatprep.mubr.msk.f32.mxu0 %vm75_vm0, %v7671_v44  ;;  %v10899_v3 = vpop.f32.mrf.mxu1 }
0x2227   :  { %v12826_v19 = vmul.f32 0.35355338, %v7273_v2  ;;  %v7456_v12 = vmul.f32 %v12820_v7, %v11609_v5  ;;  %v7674_v35 = vmul.f32 %v12820_v7, %v11657_v29  ;;  %v12847_v15 = vadd.f32 %v10899_v3, %v9779_v58 }
0x2228   :  { %v7440_v62 = vpop.f32.mrf.mxu1 }
0x2229   :  { %10913 = vmatmul.mubr.msk.f32.vlgmr.msra.gmra.mxu0 %vm75_vm0, %v7672_v55  ;;  %v7455_v47 = vmul.f32 %v12826_v19, %v11609_v5  ;;  %v7673_v59 = vmul.f32 %v12826_v19, %v11657_v29  ;;  %v12849_v0 = vadd.f32 %v9779_v58, %v7440_v62  ;;  %v7882_v13 = vmul.f32 %v12847_v15, %v11657_v29 }
0x222a   :  { %v12861_v50 = vmul.f32 %v12847_v15, %v11609_v5 }
0x222b   :  { %10907 = vmatprep.mubr.msk.f32.mxu1 %vm75_vm0, %v7455_v47  ;;  %v7881_v20 = vmul.f32 %v12849_v0, %v11657_v29  ;;  %v12857_v11 = vmul.f32 %v12849_v0, %v11609_v5 }
0x222c   :  { %10908 = vmatmul.mubr.msk.f32.vlgmr.msra.gmra.mxu1 %vm75_vm0, %v7456_v12 }
0x222d   :  { %10916 = vmatpush3.xpose.msk.msra.mxu1 %vm75_vm0, %v12789_v63  ;;  %10917 = vmatprep.mubr.msk.f32.mxu1 %vm75_vm0, %v7673_v59 }
0x222e   :  { %10920 = vmatprep.subr.mxu0 %v7881_v20  ;;  %10925 = vmatprep.subr.mxu1 %v7882_v13 }
0x222f   :  { %10921 = vmatpush3.msra.mxu0 %v7881_v20 }
0x2230   :  { %10918 = vmatmul.mubr.msk.f32.vlgmr.msra.gmra.mxu1 %vm75_vm0, %v7674_v35  ;;  %10930 = vmatprep.subr.mxu0 %v12857_v11 }
0x2231   :  { %10926 = vmatpush3.msra.mxu1 %v7882_v13 }
0x2232   :  { %10935 = vmatprep.subr.mxu1 %v12861_v50 }
0x22e5   :  { %v10904_v10 = vpop.f32.mrf.mxu0 }
0x22e6   :  { %v7628_v37 = vsel %vm2964_vm14, %v10904_v10, -inf }
0x22e7   :  { %v7532_v26 = vpop.f32.mrf.mxu0 }
0x22e8   :  { %v7625_v29 = vsel %vm2964_vm14, %v7532_v26, -inf }
0x22e9   :  { %v10914_v16 = vpop.f32.mrf.mxu0  ;;  %7626 = vmax.xlane.f32.xlu0 %v7625_v29 }
0x22ea   :  { %v7840_v17 = vsel %vm2964_vm14, %v10914_v16, -inf }
0x22eb   :  { %7841 = vmax.xlane.f32.xlu1 %v7840_v17  ;;  %v7747_v25 = vpop.f32.mrf.mxu0 }
0x22ec   :  { %v10909_v4 = vpop.f32.mrf.mxu1  ;;  %v7837_v5 = vsel %vm2964_vm14, %v7747_v25, -inf }
0x22ed   :  { %7838 = vmax.xlane.f32.xlu0 %v7837_v5  ;;  %v7634_v56 = vsel %vm2964_vm14, %v10909_v4, -inf }
0x22ee   :  { %v7616_v34 = vpop.f32.mrf.mxu1 }
0x22ef   :  { %v7631_v38 = vsel %vm2964_vm14, %v7616_v34, -inf }
0x22f0   :  { %v10919_v57 = vpop.f32.mrf.mxu1 }
0x22f1   :  { %7629 = vmax.xlane.f32.xlu0 %v7628_v37  ;;  %v7846_v51 = vsel %vm2964_vm14, %v10919_v57, -inf }
0x22f2   :  { %v7828_v14 = vpop.f32.mrf.mxu1 }
0x22f3   :  { %v7843_v39 = vsel %vm2964_vm14, %v7828_v14, -inf }
0x22f4   :  { %7844 = vmax.xlane.f32.xlu1 %v7843_v39 }
0x22f5   :  { %7632 = vmax.xlane.f32.xlu0 %v7631_v38 }
0x22f8   :  { %7847 = vmax.xlane.f32.xlu1 %v7846_v51 }
0x22fc   :  { %7635 = vmax.xlane.f32.xlu1 %v7634_v56 }
0x2372   :  { %v7627_v1 = vpop.xlane.xlu0 %7626 }
0x2373   :  { %v7637_v24 = vsub.f32 %v7532_v26, %v7627_v1 }
0x2374   :  { %v7842_v32 = vpop.xlane.xlu1 %7841 }
0x2375   :  { %v7641_v18 = vmul.f32 1.442695, %v7637_v24  ;;  %v7850_v33 = vsub.f32 %v10914_v16, %v7842_v32 }
0x2376   :  { %v7839_v9 = vpop.xlane.xlu0 %7838 }
0x2377   :  { %11306 = vpow2.f32 %v7641_v18  ;;  %v7855_v21 = vmul.f32 1.442695, %v7850_v33  ;;  %v7849_v36 = vsub.f32 %v7747_v25, %v7839_v9 }
0x2379   :  { %11308 = vpow2.f32 %v7855_v21  ;;  %v7853_v53 = vmul.f32 1.442695, %v7849_v36 }
0x237a   :  { %v7630_v54 = vpop.xlane.xlu0 %7629 }
0x237b   :  { %11310 = vpow2.f32 %v7853_v53  ;;  %v7638_v27 = vsub.f32 %v10904_v10, %v7630_v54  ;;  %v8207_v54 = vmul.f32 %v12810_v43, %v11584_v41 }
0x237d   :  { %v7643_v23 = vmul.f32 1.442695, %v7638_v27  ;;  %v7845_v40 = vpop.xlane.xlu1 %7844  ;;  %v8417_v27 = vmul.f32 %v12849_v0, %v11584_v41 }
0x237e   :  { %v7851_v52 = vsub.f32 %v7828_v14, %v7845_v40  ;;  %v7633_v45 = vpop.xlane.xlu0 %7632  ;;  %v8208_v40 = vmul.f32 %v12808_v48, %v11584_v41 }
0x237f   :  { %11312 = vpow2.f32 %v7643_v23  ;;  %v7639_v46 = vsub.f32 %v7616_v34, %v7633_v45 }
0x2380   :  { %v7857_v8 = vmul.f32 1.442695, %v7851_v52 }
0x2381   :  { %v7645_v30 = vmul.f32 1.442695, %v7639_v46  ;;  %v7848_v28 = vpop.xlane.xlu1 %7847 }
0x2382   :  { %11314 = vpow2.f32 %v7857_v8  ;;  %v7852_v6 = vsub.f32 %v10919_v57, %v7848_v28  ;;  %v8209_v28 = vmul.f32 %v12826_v19, %v11584_v41 }
0x2383   :  { %11316 = vpow2.f32 %v7645_v30 }
0x2384   :  { %v11307_v2 = vpop.eup %11306  ;;  %v7859_v44 = vmul.f32 1.442695, %v7852_v6  ;;  %v8418_v6 = vmul.f32 %v12847_v15, %v11584_v41 }
0x2385   :  { %v7636_v55 = vpop.xlane.xlu1 %7635  ;;  %v7649_v47 = vsel %vm2964_vm14, %v11307_v2, 0.0 }
0x2386   :  { %v11309_v12 = vpop.eup %11308  ;;  %11318 = vpow2.f32 %v7859_v44  ;;  %v7640_v59 = vsub.f32 %v10909_v4, %v7636_v55  ;;  %7650 = vadd.xlane.f32.xlu0 %v7649_v47 }
0x2387   :  { %v7864_v35 = vsel %vm2964_vm14, %v11309_v12, 0.0 }
0x2388   :  { %v11311_v3 = vpop.eup %11310  ;;  %v7647_v58 = vmul.f32 1.442695, %v7640_v59  ;;  %7865 = vadd.xlane.f32.xlu1 %v7864_v35 }
0x2389   :  { %v7861_v62 = vsel %vm2964_vm14, %v11311_v3, 0.0 }
0x238a   :  { %11320 = vpow2.f32 %v7647_v58  ;;  %7862 = vadd.xlane.f32.xlu0 %v7861_v62 }
0x238c   :  { %v11313_v20 = vpop.eup %11312 }
0x238d   :  { %v7652_v13 = vsel %vm2964_vm14, %v11313_v20, 0.0 }
0x238e   :  { %7653 = vadd.xlane.f32.xlu0 %v7652_v13 }
0x238f   :  { %v11315_v10 = vpop.eup %11314 }
0x2390   :  { %v11317_v26 = vpop.eup %11316  ;;  %v7867_v29 = vsel %vm2964_vm14, %v11315_v10, 0.0 }
0x2391   :  { %7868 = vadd.xlane.f32.xlu1 %v7867_v29  ;;  %v7655_v16 = vsel %vm2964_vm14, %v11317_v26, 0.0 }
0x2392   :  { %7656 = vadd.xlane.f32.xlu0 %v7655_v16 }
0x2393   :  { %v11319_v17 = vpop.eup %11318 }
0x2394   :  { %v7870_v25 = vsel %vm2964_vm14, %v11319_v17, 0.0 }
0x2395   :  { %7871 = vadd.xlane.f32.xlu1 %v7870_v25 }
0x2397   :  { %v11321_v4 = vpop.eup %11320 }
0x2398   :  { %v7658_v5 = vsel %vm2964_vm14, %v11321_v4, 0.0 }
0x2399   :  { %7659 = vadd.xlane.f32.xlu1 %v7658_v5 }
0x240f   :  { %v7651_v34 = vpop.xlane.xlu0 %7650 }
0x2410   :  { %11322 = vrcp.f32 %v7651_v34 }
0x2411   :  { %v7866_v57 = vpop.xlane.xlu1 %7865 }
0x2412   :  { %11324 = vrcp.f32 %v7866_v57 }
0x2413   :  { %v7863_v37 = vpop.xlane.xlu0 %7862 }
0x2414   :  { %11326 = vrcp.f32 %v7863_v37 }
0x2417   :  { %v7654_v14 = vpop.xlane.xlu0 %7653 }
0x2418   :  { %11328 = vrcp.f32 %v7654_v14 }
0x241a   :  { %v7869_v39 = vpop.xlane.xlu1 %7868 }
0x241b   :  { %11330 = vrcp.f32 %v7869_v39  ;;  %v7657_v38 = vpop.xlane.xlu0 %7656 }
0x241c   :  { %11332 = vrcp.f32 %v7657_v38 }
0x241d   :  { %v11323_v56 = vpop.eup %11322 }
0x241e   :  { %v7872_v51 = vpop.xlane.xlu1 %7871  ;;  %v7665_v9 = vmul.f32 %v11323_v56, %v11307_v2 }
0x241f   :  { %11334 = vrcp.f32 %v7872_v51  ;;  %v11325_v1 = vpop.eup %11324 }
0x2420   :  { %v7878_v33 = vmul.f32 %v11325_v1, %v11309_v12 }
0x2421   :  { %v11327_v24 = vpop.eup %11326 }
0x2422   :  { %v7660_v32 = vpop.xlane.xlu1 %7659  ;;  %v7877_v18 = vmul.f32 %v11327_v24, %v11311_v3 }
0x2423   :  { %11336 = vrcp.f32 %v7660_v32 }
0x2424   :  { %10922 = vmatprep.mubr.msk.f32.mxu0 %vm2964_vm14, %v7877_v18 }
0x2425   :  { %v11329_v21 = vpop.eup %11328  ;;  %10923 = vmatmul.mubr.msk.f32.vlgmr.msra.gmra.mxu0 %vm2964_vm14, %v7878_v33 }
0x2426   :  { %10931 = vmatpush3.msra.mxu0 %v12857_v11  ;;  %10932 = vmatprep.mubr.msk.f32.mxu0 %vm2964_vm14, %v7665_v9  ;;  %v7666_v36 = vmul.f32 %v11329_v21, %v11313_v20 }
0x2427   :  { %10940 = vmatprep.subr.msk.mxu0 %vm75_vm0, %v12787_v60 }
0x2428   :  { %v11331_v53 = vpop.eup %11330 }
0x2429   :  { %10933 = vmatmul.mubr.msk.f32.vlgmr.msra.gmra.mxu0 %vm2964_vm14, %v7666_v36  ;;  %v7879_v23 = vmul.f32 %v11331_v53, %v11315_v10  ;;  %v11333_v11 = vpop.eup %11332 }
0x242a   :  { %10941 = vmatpush3.xpose.msk.msra.mxu0 %vm75_vm0, %v12787_v60  ;;  %10942 = vmatprep.mubr.msk.f32.mxu0 %vm75_vm0, %v8207_v54  ;;  %v7667_v46 = vmul.f32 %v11333_v11, %v11317_v26 }
0x242b   :  { %10950 = vmatprep.subr.mxu0 %v8417_v27  ;;  %10927 = vmatprep.mubr.msk.f32.mxu1 %vm2964_vm14, %v7879_v23 }
0x242c   :  { %v11335_v52 = vpop.eup %11334 }
0x242d   :  { %10943 = vmatmul.mubr.msk.f32.vlgmr.msra.gmra.mxu0 %vm75_vm0, %v8208_v40  ;;  %v7880_v45 = vmul.f32 %v11335_v52, %v11319_v17 }
0x242e   :  { %10951 = vmatpush3.msra.mxu0 %v8417_v27 }
0x242f   :  { %10960 = vmatprep.subr.msk.mxu0 %vm75_vm0, %v12787_v60  ;;  %10928 = vmatmul.mubr.msk.f32.vlgmr.msra.gmra.mxu1 %vm2964_vm14, %v7880_v45 }
0x2430   :  { %v11337_v8 = vpop.eup %11336  ;;  %10936 = vmatpush3.msra.mxu1 %v12861_v50  ;;  %10937 = vmatprep.mubr.msk.f32.mxu1 %vm2964_vm14, %v7667_v46  ;;  %v8210_v50 = vmul.f32 %v12820_v7, %v11584_v41 }
0x2431   :  { %10945 = vmatprep.subr.msk.mxu1 %vm75_vm0, %v12789_v63  ;;  %v7668_v30 = vmul.f32 %v11337_v8, %v11321_v4 }
0x2433   :  { %10938 = vmatmul.mubr.msk.f32.vlgmr.msra.gmra.mxu1 %vm2964_vm14, %v7668_v30 }
0x2434   :  { %10946 = vmatpush3.xpose.msk.msra.mxu1 %vm75_vm0, %v12789_v63  ;;  %10947 = vmatprep.mubr.msk.f32.mxu1 %vm75_vm0, %v8209_v28  ;;  %v8585_v28 = vmul.f32 %v12810_v43, %v11587_v42 }
0x2435   :  { %10955 = vmatprep.subr.mxu1 %v8418_v6 }
0x2437   :  { %10948 = vmatmul.mubr.msk.f32.vlgmr.msra.gmra.mxu1 %vm75_vm0, %v8210_v50  ;;  %v8586_v50 = vmul.f32 %v12808_v48, %v11587_v42  ;;  %v8588_v48 = vmul.f32 %v12820_v7, %v11587_v42 }
0x2438   :  { %10956 = vmatpush3.msra.mxu1 %v8418_v6  ;;  %v8795_v6 = vmul.f32 %v12849_v0, %v11587_v42  ;;  %v8587_v0 = vmul.f32 %v12826_v19, %v11587_v42 }
0x2439   :  { %10965 = vmatprep.subr.msk.mxu1 %vm75_vm0, %v12789_v63 }
0x24e5   :  { %v10924_v2 = vpop.f32.mrf.mxu0 }
0x24e7   :  { %v7955_v44 = vpop.f32.mrf.mxu0 }
0x24e9   :  { %v10934_v55 = vpop.f32.mrf.mxu0 }
0x24ea   :  { %v12919_v47 = vadd.f32 %v10934_v55, %v10924_v2 }
0x24eb   :  { %v8117_v12 = vpop.f32.mrf.mxu0 }
0x24ec   :  { %v12921_v59 = vadd.f32 %v8117_v12, %v7955_v44 }
0x24ed   :  { %v10944_v35 = vpop.f32.mrf.mxu0 }
0x24ee   :  { %v8376_v3 = vsel %vm2964_vm14, %v10944_v35, -inf }
0x24ef   :  { %v10929_v58 = vpop.f32.mrf.mxu1  ;;  %8377 = vmax.xlane.f32.xlu1 %v8376_v3  ;;  %v8283_v41 = vpop.f32.mrf.mxu0 }
0x24f0   :  { %v8373_v62 = vsel %vm2964_vm14, %v8283_v41, -inf }
0x24f1   :  { %v8036_v20 = vpop.f32.mrf.mxu1  ;;  %8374 = vmax.xlane.f32.xlu0 %v8373_v62 }
0x24f3   :  { %v10939_v13 = vpop.f32.mrf.mxu1 }
0x24f4   :  { %v12925_v10 = vadd.f32 %v10939_v13, %v10929_v58 }
0x24f5   :  { %v8198_v26 = vpop.f32.mrf.mxu1 }
0x24f6   :  { %v12927_v29 = vadd.f32 %v8198_v26, %v8036_v20 }
0x24f7   :  { %v10949_v16 = vpop.f32.mrf.mxu1 }
0x24f8   :  { %v8382_v17 = vsel %vm2964_vm14, %v10949_v16, -inf }
0x24f9   :  { %8383 = vmax.xlane.f32.xlu1 %v8382_v17  ;;  %v8364_v25 = vpop.f32.mrf.mxu1 }
0x24fa   :  { %v8379_v4 = vsel %vm2964_vm14, %v8364_v25, -inf }
0x24fb   :  { %8380 = vmax.xlane.f32.xlu0 %v8379_v4 }
0x2578   :  { %v8378_v5 = vpop.xlane.xlu1 %8377 }
0x2579   :  { %v8386_v34 = vsub.f32 %v10944_v35, %v8378_v5 }
0x257a   :  { %v8375_v57 = vpop.xlane.xlu0 %8374 }
0x257b   :  { %v8391_v37 = vmul.f32 1.442695, %v8386_v34  ;;  %v8385_v14 = vsub.f32 %v8283_v41, %v8375_v57 }
0x257d   :  { %11338 = vpow2.f32 %v8391_v37  ;;  %v8389_v39 = vmul.f32 1.442695, %v8385_v14 }
0x257f   :  { %11340 = vpow2.f32 %v8389_v39 }
0x2582   :  { %v8384_v38 = vpop.xlane.xlu1 %8383 }
0x2583   :  { %v8388_v51 = vsub.f32 %v10949_v16, %v8384_v38 }
0x2584   :  { %v8381_v56 = vpop.xlane.xlu0 %8380 }
0x2585   :  { %v8395_v1 = vmul.f32 1.442695, %v8388_v51  ;;  %v8387_v24 = vsub.f32 %v8364_v25, %v8381_v56 }
0x2587   :  { %11342 = vpow2.f32 %v8395_v1  ;;  %v8393_v32 = vmul.f32 1.442695, %v8387_v24 }
0x2589   :  { %11344 = vpow2.f32 %v8393_v32 }
0x258a   :  { %v11339_v18 = vpop.eup %11338 }
0x258b   :  { %v8400_v33 = vsel %vm2964_vm14, %v11339_v18, 0.0 }
0x258c   :  { %v11341_v9 = vpop.eup %11340  ;;  %8401 = vadd.xlane.f32.xlu1 %v8400_v33 }
0x258d   :  { %v8397_v21 = vsel %vm2964_vm14, %v11341_v9, 0.0 }
0x258e   :  { %8398 = vadd.xlane.f32.xlu0 %v8397_v21 }
0x2594   :  { %v11343_v36 = vpop.eup %11342 }
0x2595   :  { %v8406_v53 = vsel %vm2964_vm14, %v11343_v36, 0.0 }
0x2596   :  { %v11345_v54 = vpop.eup %11344  ;;  %8407 = vadd.xlane.f32.xlu1 %v8406_v53 }
0x2597   :  { %v8403_v27 = vsel %vm2964_vm14, %v11345_v54, 0.0 }
0x2598   :  { %8404 = vadd.xlane.f32.xlu0 %v8403_v27 }
0x2615   :  { %v8402_v23 = vpop.xlane.xlu1 %8401 }
0x2616   :  { %11346 = vrcp.f32 %v8402_v23 }
0x2617   :  { %v8399_v11 = vpop.xlane.xlu0 %8398 }
0x2618   :  { %11348 = vrcp.f32 %v8399_v11 }
0x261f   :  { %v8408_v40 = vpop.xlane.xlu1 %8407 }
0x2620   :  { %11350 = vrcp.f32 %v8408_v40 }
0x2621   :  { %v8405_v52 = vpop.xlane.xlu0 %8404 }
0x2622   :  { %11352 = vrcp.f32 %v8405_v52 }
0x2623   :  { %v11347_v45 = vpop.eup %11346 }
0x2624   :  { %v8414_v30 = vmul.f32 %v11347_v45, %v11339_v18 }
0x2625   :  { %v11349_v46 = vpop.eup %11348 }
0x2626   :  { %v8413_v8 = vmul.f32 %v11349_v46, %v11341_v9  ;;  %v8966_v9 = vld [vmem:[#allocation2 + $0x4c8] sm:$0xff] }
0x2628   :  { %10952 = vmatprep.mubr.msk.f32.mxu0 %vm2964_vm14, %v8413_v8 }
0x2629   :  { %10953 = vmatmul.mubr.msk.f32.vlgmr.msra.gmra.mxu0 %vm2964_vm14, %v8414_v30  ;;  %v8965_v30 = vld [vmem:[#allocation2 + $0x460] sm:$0xff] }
0x262a   :  { %10961 = vmatpush3.xpose.msk.msra.mxu0 %vm75_vm0, %v12787_v60  ;;  %10962 = vmatprep.mubr.msk.f32.mxu0 %vm75_vm0, %v8585_v28  ;;  %v8796_v60 = vmul.f32 %v12847_v15, %v11587_v42  ;;  %v8964_v28 = vld [vmem:[#allocation2 + $0x3f8] sm:$0xff] }
0x262b   :  { %10970 = vmatprep.subr.mxu0 %v8795_v6 }
0x262d   :  { %10963 = vmatmul.mubr.msk.f32.vlgmr.msra.gmra.mxu0 %vm75_vm0, %v8586_v50  ;;  %v11351_v2 = vpop.eup %11350 }
0x262e   :  { %10971 = vmatpush3.msra.mxu0 %v8795_v6  ;;  %v8416_v55 = vmul.f32 %v11351_v2, %v11343_v36  ;;  %v8963_v6 = vld [vmem:[#allocation2 + $0x390] sm:$0xff] }
0x262f   :  { %v11353_v44 = vpop.eup %11352  ;;  %10980 = vmatprep.subr.mxu0 %v8966_v9 }
0x2630   :  { %v8415_v43 = vmul.f32 %v11353_v44, %v11345_v54 }
0x2632   :  { %10957 = vmatprep.mubr.msk.f32.mxu1 %vm2964_vm14, %v8415_v43 }
0x2633   :  { %10958 = vmatmul.mubr.msk.f32.vlgmr.msra.gmra.mxu1 %vm2964_vm14, %v8416_v55 }
0x2634   :  { %10966 = vmatpush3.xpose.msk.msra.mxu1 %vm75_vm0, %v12789_v63  ;;  %10967 = vmatprep.mubr.msk.f32.mxu1 %vm75_vm0, %v8587_v0 }
0x2635   :  { %10975 = vmatprep.subr.mxu1 %v8796_v60 }
0x2637   :  { %10968 = vmatmul.mubr.msk.f32.vlgmr.msra.gmra.mxu1 %vm75_vm0, %v8588_v48 }
0x2638   :  { %10976 = vmatpush3.msra.mxu1 %v8796_v60 }
0x26e9   :  { %v10954_v12 = vpop.f32.mrf.mxu0 }
0x26ea   :  { %v12960_v19 = vadd.f32 %v10954_v12, %v12919_v47  ;;  %v9823_v12 = vld [vmem:[%s13120_s4 + $0x1a] ss:$0 sm:$0xff] }
0x26eb   :  { %v8491_v35 = vpop.f32.mrf.mxu0 }
0x26ec   :  { %v12963_v3 = vadd.f32 %v8491_v35, %v12921_v59 }
0x26ed   :  { %v10964_v15 = vpop.f32.mrf.mxu0 }
0x26ee   :  { %v8754_v63 = vsel %vm2964_vm14, %v10964_v15, -inf }
0x26ef   :  { %8755 = vmax.xlane.f32.xlu1 %v8754_v63  ;;  %v8661_v58 = vpop.f32.mrf.mxu0 }
0x26f0   :  { %v8751_v41 = vsel %vm2964_vm14, %v8661_v58, -inf }
0x26f1   :  { %8752 = vmax.xlane.f32.xlu0 %v8751_v41 }
0x26f3   :  { %v10959_v42 = vpop.f32.mrf.mxu1 }
0x26f4   :  { %v12968_v7 = vadd.f32 %v10959_v42, %v12925_v10 }
0x26f5   :  { %v8572_v62 = vpop.f32.mrf.mxu1 }
0x26f6   :  { %v12971_v47 = vadd.f32 %v8572_v62, %v12927_v29 }
0x26f7   :  { %v10969_v20 = vpop.f32.mrf.mxu1 }
0x26f8   :  { %v8760_v59 = vsel %vm2964_vm14, %v10969_v20, -inf }
0x26f9   :  { %8761 = vmax.xlane.f32.xlu1 %v8760_v59  ;;  %v8742_v13 = vpop.f32.mrf.mxu1 }
0x26fa   :  { %v8757_v26 = vsel %vm2964_vm14, %v8742_v13, -inf }
0x26fb   :  { %8758 = vmax.xlane.f32.xlu0 %v8757_v26 }
0x2778   :  { %v8756_v16 = vpop.xlane.xlu1 %8755 }
0x2779   :  { %v8764_v17 = vsub.f32 %v10964_v15, %v8756_v16 }
0x277a   :  { %v8753_v25 = vpop.xlane.xlu0 %8752 }
0x277b   :  { %v8769_v4 = vmul.f32 1.442695, %v8764_v17  ;;  %v8763_v5 = vsub.f32 %v8661_v58, %v8753_v25 }
0x277d   :  { %11354 = vpow2.f32 %v8769_v4  ;;  %v8767_v10 = vmul.f32 1.442695, %v8763_v5 }
0x277f   :  { %11356 = vpow2.f32 %v8767_v10 }
0x2782   :  { %v8762_v34 = vpop.xlane.xlu1 %8761 }
0x2783   :  { %v8766_v57 = vsub.f32 %v10969_v20, %v8762_v34 }
0x2784   :  { %v8759_v29 = vpop.xlane.xlu0 %8758 }
0x2785   :  { %v8773_v37 = vmul.f32 1.442695, %v8766_v57  ;;  %v8765_v14 = vsub.f32 %v8742_v13, %v8759_v29 }
0x2787   :  { %11358 = vpow2.f32 %v8773_v37  ;;  %v8771_v39 = vmul.f32 1.442695, %v8765_v14 }
0x2789   :  { %11360 = vpow2.f32 %v8771_v39 }
0x278a   :  { %v11355_v38 = vpop.eup %11354 }
0x278b   :  { %v8778_v51 = vsel %vm2964_vm14, %v11355_v38, 0.0 }
0x278c   :  { %v11357_v56 = vpop.eup %11356  ;;  %8779 = vadd.xlane.f32.xlu1 %v8778_v51 }
0x278d   :  { %v8775_v1 = vsel %vm2964_vm14, %v11357_v56, 0.0 }
0x278e   :  { %8776 = vadd.xlane.f32.xlu0 %v8775_v1 }
0x2794   :  { %v11359_v24 = vpop.eup %11358 }
0x2795   :  { %v8784_v32 = vsel %vm2964_vm14, %v11359_v24, 0.0 }
0x2796   :  { %v11361_v18 = vpop.eup %11360  ;;  %8785 = vadd.xlane.f32.xlu1 %v8784_v32  ;;  %v9179_v32 = vld [vmem:[#allocation2 + $0x4d0] sm:$0xff] }
0x2797   :  { %v8781_v33 = vsel %vm2964_vm14, %v11361_v18, 0.0  ;;  %10994 = vmatprep.subr.mxu1 %v9179_v32 }
0x2798   :  { %8782 = vadd.xlane.f32.xlu0 %v8781_v33  ;;  %v9177_v33 = vld [vmem:[#allocation2 + $0x400] sm:$0xff] }
0x2815   :  { %v8780_v21 = vpop.xlane.xlu1 %8779 }
0x2816   :  { %11362 = vrcp.f32 %v8780_v21  ;;  %v9293_v21 = vld [vmem:[#allocation2 + $0x678] sm:$0xff] }
0x2817   :  { %v8777_v36 = vpop.xlane.xlu0 %8776 }
0x2818   :  { %11364 = vrcp.f32 %v8777_v36  ;;  %v9292_v36 = vld [vmem:[#allocation2 + $0x610] sm:$0xff] }
0x281f   :  { %v8786_v53 = vpop.xlane.xlu1 %8785 }
0x2820   :  { %11366 = vrcp.f32 %v8786_v53  ;;  %v9291_v53 = vld [vmem:[#allocation2 + $0x5a8] sm:$0xff] }
0x2821   :  { %v8783_v54 = vpop.xlane.xlu0 %8782 }
0x2822   :  { %11368 = vrcp.f32 %v8783_v54  ;;  %v9290_v54 = vld [vmem:[#allocation2 + $0x540] sm:$0xff] }
0x2823   :  { %v11363_v27 = vpop.eup %11362 }
0x2824   :  { %v8792_v40 = vmul.f32 %v11363_v27, %v11355_v38 }
0x2825   :  { %v11365_v23 = vpop.eup %11364 }
0x2826   :  { %v8791_v11 = vmul.f32 %v11365_v23, %v11357_v56 }
0x2828   :  { %10972 = vmatprep.mubr.msk.f32.mxu0 %vm2964_vm14, %v8791_v11 }
0x2829   :  { %10973 = vmatmul.mubr.msk.f32.vlgmr.msra.gmra.mxu0 %vm2964_vm14, %v8792_v40 }
0x282a   :  { %10981 = vmatpush3.msra.mxu0 %v8966_v9  ;;  %v9176_v9 = vld [vmem:[#allocation2 + $0x398] sm:$0xff] }
0x282b   :  { %10982 = vmatprep.subr.mxu0 %v8965_v30 }
0x282c   :  { %10983 = vmatpush3.msra.mxu0 %v8965_v30 }
0x282d   :  { %v11367_v52 = vpop.eup %11366  ;;  %10984 = vmatprep.subr.mxu0 %v8964_v28 }
0x282e   :  { %v8794_v8 = vmul.f32 %v11367_v52, %v11359_v24  ;;  %10985 = vmatpush3.msra.mxu0 %v8964_v28 }
0x282f   :  { %v11369_v45 = vpop.eup %11368  ;;  %10986 = vmatprep.subr.mxu0 %v8963_v6 }
0x2830   :  { %v8793_v46 = vmul.f32 %v11369_v45, %v11361_v18  ;;  %10987 = vmatpush3.msra.mxu0 %v8963_v6  ;;  %v9178_v18 = vld [vmem:[#allocation2 + $0x468] sm:$0xff] }
0x2831   :  { %11008 = vmatprep.subr.mxu0 %v9293_v21 }
0x2832   :  { %10977 = vmatprep.mubr.msk.f32.mxu1 %vm2964_vm14, %v8793_v46 }
0x2833   :  { %10978 = vmatmul.mubr.msk.f32.vlgmr.msra.gmra.mxu1 %vm2964_vm14, %v8794_v8 }
0x2834   :  { %10995 = vmatpush3.msra.mxu1 %v9179_v32  ;;  %v9289_v32 = vld [vmem:[#allocation2 + $0x4d8] sm:$0xff] }
0x2835   :  { %10996 = vmatprep.subr.mxu1 %v9178_v18 }
0x2836   :  { %10997 = vmatpush3.msra.mxu1 %v9178_v18  ;;  %v9288_v18 = vld [vmem:[#allocation2 + $0x470] sm:$0xff] }
0x2837   :  { %10998 = vmatprep.subr.mxu1 %v9177_v33 }
0x2838   :  { %10999 = vmatpush3.msra.mxu1 %v9177_v33  ;;  %v9287_v33 = vld [vmem:[#allocation2 + $0x408] sm:$0xff] }
0x2839   :  { %11000 = vmatprep.subr.mxu1 %v9176_v9 }
0x283a   :  { %11001 = vmatpush3.msra.mxu1 %v9176_v9 }
0x28e9   :  { %v10974_v50 = vpop.f32.mrf.mxu0 }
0x28ea   :  { %v8960_v43 = vadd.f32 %v10974_v50, %v12960_v19 }
0x28eb   :  { %v8869_v2 = vpop.f32.mrf.mxu0 }
0x28ec   :  { %v8959_v44 = vadd.f32 %v8869_v2, %v12963_v3 }
0x28ee   :  { %10988 = vmatprep.mubr.msk.f32.mxu0 %vm75_vm0, %v8959_v44 }
0x28ef   :  { %10989 = vmatmul.mubr.msk.f32.vlgmr.msra.gmra.mxu0 %vm75_vm0, %v8960_v43 }
0x28f0   :  { %11009 = vmatpush3.msra.mxu0 %v9293_v21 }
0x28f1   :  { %11010 = vmatprep.subr.mxu0 %v9292_v36 }
0x28f2   :  { %11011 = vmatpush3.msra.mxu0 %v9292_v36 }
0x28f3   :  { %v10979_v55 = vpop.f32.mrf.mxu1  ;;  %11012 = vmatprep.subr.mxu0 %v9291_v53 }
0x28f4   :  { %v8962_v48 = vadd.f32 %v10979_v55, %v12968_v7  ;;  %11013 = vmatpush3.msra.mxu0 %v9291_v53 }
0x28f5   :  { %v8950_v0 = vpop.f32.mrf.mxu1  ;;  %11014 = vmatprep.subr.mxu0 %v9290_v54 }
0x28f6   :  { %v8961_v60 = vadd.f32 %v8950_v0, %v12971_v47  ;;  %11015 = vmatpush3.msra.mxu0 %v9290_v54 }
0x28f7   :  { %11016 = vmatprep.subr.mxu0 %v9289_v32 }
0x28f8   :  { %10991 = vmatprep.mubr.msk.f32.mxu0 %vm75_vm0, %v8961_v60  ;;  %11017 = vmatpush3.msra.mxu0 %v9289_v32 }
0x28f9   :  { %10992 = vmatmul.mubr.msk.f32.gmra.mxu0 %vm75_vm0, %v8962_v48  ;;  %11018 = vmatprep.subr.mxu0 %v9288_v18 }
0x28fa   :  { %11019 = vmatpush3.msra.mxu0 %v9288_v18 }
0x28fb   :  { %11020 = vmatprep.subr.mxu0 %v9287_v33 }
0x28fc   :  { %11021 = vmatpush3.msra.mxu0 %v9287_v33 }
0x29af   :  { %v10990_v35 = vpop.f32.mrf.mxu0 }
0x29b0   :  { %v9056_v19 = vadd.f32 %v10990_v35, %v9823_v12 }
0x29b1   :  { %v9050_v3 = vpop.f32.mrf.mxu0 }
0x29b2   :  { %v12995_v15 = vadd.f32 %v9056_v19, %v12714_v49  ;;  %v9051_v63 = vadd.f32 %v9823_v12, %v9050_v3 }
0x29b4   :  { %v12998_v58 = vadd.f32 %v9051_v63, %v12717_v31  ;;  %v9079_v41 = vsel %vm75_vm0, %v12995_v15, 0.0 }
0x29b5   :  { %9080 = vadd.xlane.f32.xlu1 %v9079_v41 }
0x29b6   :  { %v9076_v42 = vsel %vm75_vm0, %v12998_v58, 0.0 }
0x29b7   :  { %9077 = vadd.xlane.f32.xlu0 %v9076_v42 }
0x29b9   :  { %v10993_v7 = vpop.f32.mrf.mxu0 }
0x29ba   :  { %v9066_v62 = vadd.f32 %v10993_v7, %v9823_v12 }
0x29bb   :  { %v9060_v47 = vpop.f32.mrf.mxu0 }
0x29bc   :  { %v13005_v20 = vadd.f32 %v9066_v62, %v12724_v22  ;;  %v9061_v49 = vadd.f32 %v9823_v12, %v9060_v47 }
0x29be   :  { %v13008_v59 = vadd.f32 %v9061_v49, %v12727_v61  ;;  %v9085_v31 = vsel %vm75_vm0, %v13005_v20, 0.0 }
0x29bf   :  { %9086 = vadd.xlane.f32.xlu1 %v9085_v31 }
0x29c0   :  { %v9082_v13 = vsel %vm75_vm0, %v13008_v59, 0.0 }
0x29c1   :  { %9083 = vadd.xlane.f32.xlu0 %v9082_v13  ;;  %v9830_v13 = vld [vmem:[%s13121_s5 + $0xa] ss:$0 sm:$0xff] }
0x2a3e   :  { %v9081_v26 = vpop.xlane.xlu1 %9080 }
0x2a3f   :  { %v9089_v16 = vmul.f32 0.03125, %v9081_v26 }
0x2a40   :  { %v9078_v17 = vpop.xlane.xlu0 %9077 }
0x2a41   :  { %v13015_v25 = vsub.f32 %v12995_v15, %v9089_v16  ;;  %v9088_v22 = vmul.f32 0.03125, %v9078_v17 }
0x2a43   :  { %v13018_v4 = vsub.f32 %v12998_v58, %v9088_v22  ;;  %v9097_v61 = vmul.f32 %v13015_v25, %v13015_v25  ;;  %v9161_v17 = vmul.f32 %v9830_v13, %v13015_v25 }
0x2a45   :  { %v9103_v5 = vsel %vm75_vm0, %v9097_v61, 0.0  ;;  %v9096_v10 = vmul.f32 %v13018_v4, %v13018_v4  ;;  %v9160_v22 = vmul.f32 %v9830_v13, %v13018_v4 }
0x2a46   :  { %9104 = vadd.xlane.f32.xlu1 %v9103_v5 }
0x2a47   :  { %v9100_v34 = vsel %vm75_vm0, %v9096_v10, 0.0  ;;  %v9831_v10 = vld [vmem:[%s13121_s5 + $0xb] ss:$0 sm:$0xff] }
0x2a48   :  { %v9087_v57 = vpop.xlane.xlu1 %9086  ;;  %9101 = vadd.xlane.f32.xlu0 %v9100_v34 }
0x2a49   :  { %v9091_v29 = vmul.f32 0.03125, %v9087_v57 }
0x2a4a   :  { %v9084_v37 = vpop.xlane.xlu0 %9083 }
0x2a4b   :  { %v13027_v14 = vsub.f32 %v13005_v20, %v9091_v29  ;;  %v9090_v39 = vmul.f32 0.03125, %v9084_v37 }
0x2a4d   :  { %v13030_v38 = vsub.f32 %v13008_v59, %v9090_v39  ;;  %v9099_v51 = vmul.f32 %v13027_v14, %v13027_v14  ;;  %v9163_v39 = vmul.f32 %v9830_v13, %v13027_v14  ;;  %v9286_v14 = vld [vmem:[#allocation2 + $0x3a0] sm:$0xff] }
0x2a4e   :  { %11022 = vmatprep.subr.mxu0 %v9286_v14 }
0x2a4f   :  { %v9109_v56 = vsel %vm75_vm0, %v9099_v51, 0.0  ;;  %v9098_v1 = vmul.f32 %v13030_v38, %v13030_v38  ;;  %v9162_v25 = vmul.f32 %v9830_v13, %v13030_v38  ;;  %11023 = vmatpush3.msra.mxu0 %v9286_v14  ;;  %v9833_v38 = vld [vmem:[%s13120_s4 + $0x1b] ss:$0 sm:$0xff] }
0x2a50   :  { %9110 = vadd.xlane.f32.xlu1 %v9109_v56 }
0x2a51   :  { %v9106_v24 = vsel %vm75_vm0, %v9098_v1, 0.0 }
0x2a52   :  { %9107 = vadd.xlane.f32.xlu0 %v9106_v24 }
0x2acf   :  { %v9105_v27 = vpop.xlane.xlu1 %9104 }
0x2ad0   :  { %v9113_v23 = vmul.f32 0.032258064, %v9105_v27 }
0x2ad1   :  { %v9102_v11 = vpop.xlane.xlu0 %9101 }
0x2ad2   :  { %11370 = vrsqrt.f32 %v9113_v23  ;;  %v9112_v40 = vmul.f32 0.032258064, %v9102_v11  ;;  %vm9125_vm14 = vcmp.eq.f32.partialorder %v9113_v23, inf  ;;  %v9128_v6 = vand.u32 2147483648, %v9113_v23 }
0x2ad3   :  { %vm9127_vm1 = vcmp.eq.f32.partialorder %v9113_v23, 0.0 }
0x2ad4   :  { %11372 = vrsqrt.f32 %v9112_v40  ;;  %vm9118_vm2 = vcmp.eq.f32.partialorder %v9112_v40, inf  ;;  %v9121_v0 = vand.u32 2147483648, %v9112_v40  ;;  %vm9120_vm3 = vcmp.eq.f32.partialorder %v9112_v40, 0.0 }
0x2ad9   :  { %v9111_v52 = vpop.xlane.xlu1 %9110 }
0x2ada   :  { %v9115_v45 = vmul.f32 0.032258064, %v9111_v52 }
0x2adb   :  { %v9108_v46 = vpop.xlane.xlu0 %9107 }
0x2adc   :  { %11374 = vrsqrt.f32 %v9115_v45  ;;  %v9114_v8 = vmul.f32 0.032258064, %v9108_v46  ;;  %vm9139_vm4 = vcmp.eq.f32.partialorder %v9115_v45, inf  ;;  %v9142_v3 = vand.u32 2147483648, %v9115_v45 }
0x2add   :  { %vm9141_vm6 = vcmp.eq.f32.partialorder %v9115_v45, 0.0 }
0x2ade   :  { %11376 = vrsqrt.f32 %v9114_v8  ;;  %vm9132_vm15 = vcmp.eq.f32.partialorder %v9114_v8, inf  ;;  %v9135_v47 = vand.u32 2147483648, %v9114_v8  ;;  %vm9134_vm5 = vcmp.eq.f32.partialorder %v9114_v8, 0.0 }
0x2adf   :  { %v11371_v30 = vpop.eup %11370 }
0x2ae0   :  { %v9124_v28 = vmul.f32 %v11371_v30, %v9113_v23 }
0x2ae1   :  { %v11373_v50 = vpop.eup %11372 }
0x2ae2   :  { %v9126_v2 = vsel %vm9125_vm14, %v9113_v23, %v9124_v28  ;;  %v9117_v43 = vmul.f32 %v11373_v50, %v9112_v40 }
0x2ae3   :  { %v9129_v44 = vsel %vm9127_vm1, %v9128_v6, %v9126_v2 }
0x2ae4   :  { %v9145_v55 = vadd.f32 1e-06, %v9129_v44  ;;  %v9119_v60 = vsel %vm9118_vm2, %v9112_v40, %v9117_v43 }
0x2ae5   :  { %v9122_v48 = vsel %vm9120_vm3, %v9121_v0, %v9119_v60 }
0x2ae6   :  { %11378 = vrcp.f32 %v9145_v55  ;;  %v9144_v12 = vadd.f32 1e-06, %v9122_v48 }
0x2ae8   :  { %11380 = vrcp.f32 %v9144_v12 }
0x2ae9   :  { %v11375_v35 = vpop.eup %11374 }
0x2aea   :  { %v9138_v19 = vmul.f32 %v11375_v35, %v9115_v45 }
0x2aeb   :  { %v11377_v63 = vpop.eup %11376 }
0x2aec   :  { %v9140_v41 = vsel %vm9139_vm4, %v9115_v45, %v9138_v19  ;;  %v9131_v7 = vmul.f32 %v11377_v63, %v9114_v8 }
0x2aed   :  { %v9143_v42 = vsel %vm9141_vm6, %v9142_v3, %v9140_v41 }
0x2aee   :  { %v9147_v62 = vadd.f32 1e-06, %v9143_v42  ;;  %v9133_v49 = vsel %vm9132_vm15, %v9114_v8, %v9131_v7  ;;  %v9839_v8 = vld [vmem:[%s13120_s4 + $0x1c] ss:$0 sm:$0xff] }
0x2aef   :  { %v9136_v31 = vsel %vm9134_vm5, %v9135_v47, %v9133_v49 }
0x2af0   :  { %11382 = vrcp.f32 %v9147_v62  ;;  %v9146_v26 = vadd.f32 1e-06, %v9136_v31 }
0x2af2   :  { %11384 = vrcp.f32 %v9146_v26 }
0x2af3   :  { %v11379_v16 = vpop.eup %11378 }
0x2af4   :  { %v9165_v5 = vmul.f32 %v11379_v16, %v9161_v17 }
0x2af5   :  { %v11381_v61 = vpop.eup %11380 }
0x2af6   :  { %v9164_v34 = vmul.f32 %v11381_v61, %v9160_v22  ;;  %v9173_v29 = vadd.f32 %v9831_v10, %v9165_v5 }
0x2af8   :  { %v9172_v57 = vadd.f32 %v9831_v10, %v9164_v34 }
0x2afa   :  { %11002 = vmatprep.mubr.msk.f32.mxu1 %vm75_vm0, %v9172_v57 }
0x2afb   :  { %11003 = vmatmul.mubr.msk.f32.vlgmr.msra.gmra.mxu1 %vm75_vm0, %v9173_v29 }
0x2afd   :  { %v11383_v37 = vpop.eup %11382 }
0x2afe   :  { %v9167_v4 = vmul.f32 %v11383_v37, %v9163_v39 }
0x2aff   :  { %v11385_v51 = vpop.eup %11384 }
0x2b00   :  { %v9166_v56 = vmul.f32 %v11385_v51, %v9162_v25  ;;  %v9175_v24 = vadd.f32 %v9831_v10, %v9167_v4 }
0x2b02   :  { %v9174_v1 = vadd.f32 %v9831_v10, %v9166_v56 }
0x2b04   :  { %11005 = vmatprep.mubr.msk.f32.mxu1 %vm75_vm0, %v9174_v1 }
0x2b05   :  { %11006 = vmatmul.mubr.msk.f32.gmra.mxu1 %vm75_vm0, %v9175_v24 }
0x2bbb   :  { %v11004_v9 = vpop.f32.mrf.mxu1 }
0x2bbc   :  { %v9269_v21 = vadd.f32 %v11004_v9, %v9833_v38 }
0x2bbd   :  { %v9263_v36 = vpop.f32.mrf.mxu1 }
0x2bbe   :  { %v9264_v53 = vadd.f32 %v9833_v38, %v9263_v36  ;;  %v9283_v27 = vmax.f32 %v9269_v21, 0.0 }
0x2bc0   :  { %v9282_v54 = vmax.f32 %v9264_v53, 0.0 }
0x2bc2   :  { %11024 = vmatprep.mubr.msk.f32.mxu0 %vm4639_vm10, %v9282_v54 }
0x2bc3   :  { %11025 = vmatmul.mubr.msk.f32.vlgmr.msra.gmra.mxu0 %vm4639_vm10, %v9283_v27 }
0x2bc5   :  { %v11007_v23 = vpop.f32.mrf.mxu1 }
0x2bc6   :  { %v9279_v11 = vadd.f32 %v11007_v23, %v9833_v38 }
0x2bc7   :  { %v9273_v40 = vpop.f32.mrf.mxu1 }
0x2bc8   :  { %v9274_v52 = vadd.f32 %v9833_v38, %v9273_v40  ;;  %v9285_v46 = vmax.f32 %v9279_v11, 0.0 }
0x2bca   :  { %v9284_v45 = vmax.f32 %v9274_v52, 0.0 }
0x2bcc   :  { %11027 = vmatprep.mubr.msk.f32.mxu0 %vm4639_vm10, %v9284_v45 }
0x2bcd   :  { %11028 = vmatmul.mubr.msk.f32.gmra.mxu0 %vm4639_vm10, %v9285_v46 }
0x2c83   :  { %v11026_v30 = vpop.f32.mrf.mxu0 }
0x2c84   :  { %v9383_v28 = vadd.f32 %v11026_v30, %v9839_v8 }
0x2c85   :  { %v9377_v6 = vpop.f32.mrf.mxu0 }
0x2c86   :  { %v9397_v50 = vadd.f32 %v9383_v28, %v12995_v15  ;;  %v9378_v2 = vadd.f32 %v9839_v8, %v9377_v6  ;;  %v9844_v28 = vld [vmem:[%s13122_s6] ss:$0 sm:$0xff] }
0x2c88   :  { %v9396_v44 = vadd.f32 %v9378_v2, %v12998_v58  ;;  %v9405_v43 = vsel %vm75_vm0, %v9397_v50, 0.0 }
0x2c89   :  { %9406 = vadd.xlane.f32.xlu1 %v9405_v43 }
0x2c8a   :  { %v9402_v55 = vsel %vm75_vm0, %v9396_v44, 0.0 }
0x2c8b   :  { %9403 = vadd.xlane.f32.xlu0 %v9402_v55  ;;  %v9845_v55 = vld [vmem:[%s13122_s6 + $0x1] ss:$0 sm:$0xff] }
0x2c8d   :  { %v11029_v0 = vpop.f32.mrf.mxu0 }
0x2c8e   :  { %v9393_v60 = vadd.f32 %v11029_v0, %v9839_v8 }
0x2c8f   :  { %v9387_v48 = vpop.f32.mrf.mxu0 }
0x2c90   :  { %v9399_v12 = vadd.f32 %v9393_v60, %v13005_v20  ;;  %v9388_v35 = vadd.f32 %v9839_v8, %v9387_v48 }
0x2c92   :  { %v9398_v19 = vadd.f32 %v9388_v35, %v13008_v59  ;;  %v9411_v3 = vsel %vm75_vm0, %v9399_v12, 0.0 }
0x2c93   :  { %9412 = vadd.xlane.f32.xlu1 %v9411_v3 }
0x2c94   :  { %v9408_v15 = vsel %vm75_vm0, %v9398_v19, 0.0 }
0x2c95   :  { %9409 = vadd.xlane.f32.xlu0 %v9408_v15 }
0x2d12   :  { %v9407_v58 = vpop.xlane.xlu1 %9406 }
0x2d13   :  { %v9415_v63 = vmul.f32 0.03125, %v9407_v58 }
0x2d14   :  { %v9404_v41 = vpop.xlane.xlu0 %9403 }
0x2d15   :  { %v13070_v42 = vsub.f32 %v9397_v50, %v9415_v63  ;;  %v9414_v7 = vmul.f32 0.03125, %v9404_v41 }
0x2d17   :  { %v13072_v62 = vsub.f32 %v9396_v44, %v9414_v7  ;;  %v9423_v20 = vmul.f32 %v13070_v42, %v13070_v42  ;;  %v9487_v44 = vmul.f32 %v9844_v28, %v13070_v42 }
0x2d19   :  { %v9429_v47 = vsel %vm75_vm0, %v9423_v20, 0.0  ;;  %v9422_v59 = vmul.f32 %v13072_v62, %v13072_v62  ;;  %v9486_v60 = vmul.f32 %v9844_v28, %v13072_v62 }
0x2d1a   :  { %9430 = vadd.xlane.f32.xlu1 %v9429_v47 }
0x2d1b   :  { %v9426_v49 = vsel %vm75_vm0, %v9422_v59, 0.0 }
0x2d1c   :  { %v9413_v31 = vpop.xlane.xlu1 %9412  ;;  %9427 = vadd.xlane.f32.xlu0 %v9426_v49 }
0x2d1d   :  { %v9417_v13 = vmul.f32 0.03125, %v9413_v31 }
0x2d1e   :  { %v9410_v26 = vpop.xlane.xlu0 %9409 }
0x2d1f   :  { %v13080_v16 = vsub.f32 %v9399_v12, %v9417_v13  ;;  %v9416_v17 = vmul.f32 0.03125, %v9410_v26 }
0x2d21   :  { %v13082_v22 = vsub.f32 %v9398_v19, %v9416_v17  ;;  %v9425_v61 = vmul.f32 %v13080_v16, %v13080_v16  ;;  %v9489_v3 = vmul.f32 %v9844_v28, %v13080_v16 }
0x2d23   :  { %v9435_v5 = vsel %vm75_vm0, %v9425_v61, 0.0  ;;  %v9424_v10 = vmul.f32 %v13082_v22, %v13082_v22  ;;  %v9488_v63 = vmul.f32 %v9844_v28, %v13082_v22 }
0x2d24   :  { %9436 = vadd.xlane.f32.xlu1 %v9435_v5 }
0x2d25   :  { %v9432_v34 = vsel %vm75_vm0, %v9424_v10, 0.0 }
0x2d26   :  { %9433 = vadd.xlane.f32.xlu0 %v9432_v34 }
0x2da3   :  { %v9431_v57 = vpop.xlane.xlu1 %9430 }
0x2da4   :  { %v9439_v29 = vmul.f32 0.032258064, %v9431_v57 }
0x2da5   :  { %v9428_v37 = vpop.xlane.xlu0 %9427 }
0x2da6   :  { %11386 = vrsqrt.f32 %v9439_v29  ;;  %v9438_v39 = vmul.f32 0.032258064, %v9428_v37  ;;  %vm9451_vm10 = vcmp.eq.f32.partialorder %v9439_v29, inf  ;;  %v9454_v32 = vand.u32 2147483648, %v9439_v29 }
0x2da7   :  { %vm9453_vm7 = vcmp.eq.f32.partialorder %v9439_v29, 0.0 }
0x2da8   :  { %11388 = vrsqrt.f32 %v9438_v39  ;;  %vm9444_vm8 = vcmp.eq.f32.partialorder %v9438_v39, inf  ;;  %v9447_v21 = vand.u32 2147483648, %v9438_v39  ;;  %vm9446_vm9 = vcmp.eq.f32.partialorder %v9438_v39, 0.0 }
0x2dad   :  { %v9437_v25 = vpop.xlane.xlu1 %9436 }
0x2dae   :  { %v9441_v51 = vmul.f32 0.032258064, %v9437_v25 }
0x2daf   :  { %v9434_v4 = vpop.xlane.xlu0 %9433 }
0x2db0   :  { %11390 = vrsqrt.f32 %v9441_v51  ;;  %v9440_v56 = vmul.f32 0.032258064, %v9434_v4  ;;  %vm9465_vm11 = vcmp.eq.f32.partialorder %v9441_v51, inf  ;;  %v9468_v11 = vand.u32 2147483648, %v9441_v51 }
0x2db1   :  { %vm9467_vm12 = vcmp.eq.f32.partialorder %v9441_v51, 0.0 }
0x2db2   :  { %11392 = vrsqrt.f32 %v9440_v56  ;;  %vm9458_vm13 = vcmp.eq.f32.partialorder %v9440_v56, inf  ;;  %v9461_v30 = vand.u32 2147483648, %v9440_v56  ;;  %vm9460_vm14 = vcmp.eq.f32.partialorder %v9440_v56, 0.0 }
0x2db3   :  { %v11387_v1 = vpop.eup %11386 }
0x2db4   :  { %v9450_v24 = vmul.f32 %v11387_v1, %v9439_v29 }
0x2db5   :  { %v11389_v18 = vpop.eup %11388 }
0x2db6   :  { %v9452_v33 = vsel %vm9451_vm10, %v9439_v29, %v9450_v24  ;;  %v9443_v38 = vmul.f32 %v11389_v18, %v9438_v39 }
0x2db7   :  { %v9455_v14 = vsel %vm9453_vm7, %v9454_v32, %v9452_v33 }
0x2db8   :  { %v9471_v9 = vadd.f32 1e-06, %v9455_v14  ;;  %v9445_v36 = vsel %vm9444_vm8, %v9438_v39, %v9443_v38 }
0x2db9   :  { %v9448_v53 = vsel %vm9446_vm9, %v9447_v21, %v9445_v36 }
0x2dba   :  { %11394 = vrcp.f32 %v9471_v9  ;;  %v9470_v54 = vadd.f32 1e-06, %v9448_v53 }
0x2dbc   :  { %11396 = vrcp.f32 %v9470_v54 }
0x2dbd   :  { %v11391_v27 = vpop.eup %11390 }
0x2dbe   :  { %v9464_v23 = vmul.f32 %v11391_v27, %v9441_v51 }
0x2dbf   :  { %v11393_v40 = vpop.eup %11392 }
0x2dc0   :  { %v9466_v52 = vsel %vm9465_vm11, %v9441_v51, %v9464_v23  ;;  %v9457_v46 = vmul.f32 %v11393_v40, %v9440_v56 }
0x2dc1   :  { %v9469_v45 = vsel %vm9467_vm12, %v9468_v11, %v9466_v52 }
0x2dc2   :  { %v9473_v8 = vadd.f32 1e-06, %v9469_v45  ;;  %v9459_v6 = vsel %vm9458_vm13, %v9440_v56, %v9457_v46 }
0x2dc3   :  { %v9462_v50 = vsel %vm9460_vm14, %v9461_v30, %v9459_v6 }
0x2dc4   :  { %11398 = vrcp.f32 %v9473_v8  ;;  %v9472_v2 = vadd.f32 1e-06, %v9462_v50 }
0x2dc6   :  { %11400 = vrcp.f32 %v9472_v2 }
0x2dc7   :  { %v11395_v43 = vpop.eup %11394 }
0x2dc8   :  { %v9491_v0 = vmul.f32 %v11395_v43, %v9487_v44 }
0x2dc9   :  { %v11397_v48 = vpop.eup %11396 }
0x2dca   :  { %v9499_v12 = vadd.f32 %v9845_v55, %v9491_v0  ;;  %v9490_v35 = vmul.f32 %v11397_v48, %v9486_v60 }
0x2dcc   :  { %9503 = vst.msk [vmem:[%s13123_s7 + $0x8] sm:$0xff] %vm75_vm0, %v9499_v12  ;;  %v9498_v19 = vadd.f32 %v9845_v55, %v9490_v35 }
0x2dce   :  { %9502 = vst.msk [vmem:[%s13123_s7] sm:$0xff] %vm75_vm0, %v9498_v19 }
0x2dd1   :  { %v11399_v15 = vpop.eup %11398 }
0x2dd2   :  { %v9493_v58 = vmul.f32 %v11399_v15, %v9489_v3 }
0x2dd3   :  { %v11401_v41 = vpop.eup %11400 }
0x2dd4   :  { %v9501_v42 = vadd.f32 %v9845_v55, %v9493_v58  ;;  %v9492_v7 = vmul.f32 %v11401_v41, %v9488_v63 }
0x2dd6   :  { %9505 = vst.msk [vmem:[%s13123_s7 + $0x18] sm:$0xff] %vm75_vm0, %v9501_v42  ;;  %v9500_v62 = vadd.f32 %v9845_v55, %v9492_v7 }
0x2dd8   :  { %9504 = vst.msk [vmem:[%s13123_s7 + $0x10] sm:$0xff] %vm75_vm0, %v9500_v62 }
0x2dd9   :  { %9510 = vsyncpa [#allocation3], 1 }

</bundles_post_ra>
